<compile_context>
chip_gen: v7x
topology: tpu7x:2x2x1
jax: 0.10.0
libtpu: 0.0.40
codegen_flags: <defaults>
</compile_context>

<pallas_src>
import jax
import jax.numpy as jnp
from jax.experimental import pallas as pl
from jax.experimental.pallas import tpu as pltpu

# ---- small shapes consistent with the module --------------------------------------
B = 2      # batch_size
T = 8      # time_steps
E = 16     # token embedding dim fed to the Lstm2SeqEncoder
H = 32     # hid_dim
C = 8      # num_classes per task (offsets +8 / +16 in forward imply 8 tags per CRF)


# =============================== fused forward kernel ===============================
def _fused_tagger_kernel(x_ref, wih_ref, whh_ref, blstm_ref, wproj_ref, bproj_ref,
                         trans_ref, logits_ref, tags_ref, enc_scr):
    """x_ref:    (T*B, E)   time-major-flattened embeddings (row = t*B + b)
       wih_ref:  (E, 4H)    whh_ref: (H, 4H)    blstm_ref: (1, 4H)
       wproj_ref:(H, 3C)    bproj_ref: (1, 3C)
       trans_ref:(3C, C)    stacked CRF transition matrices [task; process; material]
       logits_ref out: (T*B, 3C)   tags_ref out: (3B, T) int32   enc_scr: (T*B, H)
    """
    f32 = jnp.float32
    Hh = whh_ref.shape[0]
    Cc = trans_ref.shape[1]
    nB = tags_ref.shape[0] // 3
    Tt = tags_ref.shape[1]

    # ---------------- 1) Lstm2SeqEncoder: unrolled recurrence ----------------------
    # Input projection hoisted out of the recurrence (one batched MXU matmul);
    # bias broadcast hoisted (single add, not per-timestep).
    gates_x = (jnp.dot(x_ref[...], wih_ref[...], preferred_element_type=f32)
               + blstm_ref[...])                                   # (T*B, 4H)
    whh = whh_ref[...]                                             # (H, 4H)

    def sigmoid(z):
        # exp -> EUP, approx reciprocal -> EUP (keeps VPU off the recurrent path)
        return pl.reciprocal(1.0 + jnp.exp(-z), approx=True)

    h = jnp.zeros((nB, Hh), f32)
    c = jnp.zeros((nB, Hh), f32)
    for t in range(Tt):                                            # static unroll, T=8
        g = gates_x[t * nB:(t + 1) * nB, :] + jnp.dot(h, whh,
                                                      preferred_element_type=f32)
        i_g = sigmoid(g[:, 0 * Hh:1 * Hh])
        f_g = sigmoid(g[:, 1 * Hh:2 * Hh])
        g_g = jnp.tanh(g[:, 2 * Hh:3 * Hh])
        o_g = sigmoid(g[:, 3 * Hh:4 * Hh])
        c = f_g * c + i_g * g_g
        h = o_g * jnp.tanh(c)
        enc_scr[t * nB:(t + 1) * nB, :] = h                        # static partial store

    # ------------- 2) fused hidden2{task,process,material} projection --------------
    logits = (jnp.dot(enc_scr[...], wproj_ref[...], preferred_element_type=f32)
              + bproj_ref[...])                                    # (T*B, 3C)
    logits_ref[...] = logits                                       # one store

    # ---------------- 3) Viterbi decode: all 3*B problems in-kernel ----------------
    # constraints=None + include_start_end_transitions=False + all-ones mask
    # -> plain Viterbi over (emissions, transitions) for each (crf, batch) problem.
    trans_all = trans_ref[...]                                     # (3C, C)
    lane_c = jax.lax.broadcasted_iota(jnp.int32, (1, Cc), 1).astype(f32)
    row_cc = jax.lax.broadcasted_iota(jnp.int32, (Cc, Cc), 0).astype(f32)
    col_cc = jax.lax.broadcasted_iota(jnp.int32, (Cc, Cc), 1).astype(f32)
    eye = (row_cc == col_cc).astype(f32)
    lane_t = jax.lax.broadcasted_iota(jnp.int32, (1, Tt), 1)
    sub_p = jax.lax.broadcasted_iota(jnp.int32, (3 * nB, 1), 0)

    tags_acc = jnp.zeros((3 * nB, Tt), f32)
    for k in range(3):                                             # task / process / material
        trans_k = trans_all[k * Cc:(k + 1) * Cc, :]                # (C, C)
        for b in range(nB):
            p = k * nB + b
            # emissions for this problem (static slices of the logits value)
            em = [logits[t * nB + b: t * nB + b + 1, k * Cc:(k + 1) * Cc]
                  for t in range(Tt)]                              # T x (1, C)

            # forward max-plus recursion (backpointers held as unrolled values;
            # float indices are exact for C=8)
            score = em[0]                                          # (1, C)
            bps = []
            for t in range(1, Tt):
                score_col = jnp.sum(score * eye, axis=1, keepdims=True)   # (C, 1)
                a = score_col + trans_k                                    # (C, C)
                best = jnp.max(a, axis=0, keepdims=True)                   # (1, C)
                bp = jnp.min(jnp.where(a == best, row_cc, float(Cc)),
                             axis=0, keepdims=True)                        # (1, C)
                bps.append(bp)
                score = best + em[t]

            # final tag (lowest index on ties)
            m = jnp.max(score, axis=1, keepdims=True)                      # (1, 1)
            tag = jnp.min(jnp.where(score == m, lane_c, float(Cc)),
                          axis=1, keepdims=True)                           # (1, 1)

            # backtrack, assembling the (1, T) tag row for this problem
            row = (lane_t == (Tt - 1)).astype(f32) * tag
            cur = tag
            for t in range(Tt - 1, 0, -1):
                onehot = (lane_c == cur).astype(f32)                        # (1, C)
                prev = jnp.sum(bps[t - 1] * onehot, axis=1, keepdims=True)  # (1, 1)
                row = row + (lane_t == (t - 1)).astype(f32) * prev
                cur = prev

            tags_acc = tags_acc + (sub_p == p).astype(f32) * row           # place row p

    tags_ref[...] = tags_acc.astype(jnp.int32)                     # single (3B, T) store


# ================================== full forward ====================================
def science_ie_tagger_forward(x_emb, params):
    Bx, Tx, Ex = x_emb.shape
    Cx = params["transitions"].shape[-1]
    Hx = params["w_hh"].shape[0]

    # cheap host-side layout prep (tiny arrays): time-major flatten + stacked CRFs
    x_tm = jnp.transpose(x_emb, (1, 0, 2)).reshape(Tx * Bx, Ex)     # rows = t*B + b
    trans2d = params["transitions"].reshape(3 * Cx, Cx)

    logits_flat, tags2d = pl.pallas_call(
        _fused_tagger_kernel,
        out_shape=(jax.ShapeDtypeStruct((Tx * Bx, 3 * Cx), jnp.float32),
                   jax.ShapeDtypeStruct((3 * Bx, Tx), jnp.int32)),
        scratch_shapes=[pltpu.VMEM((Tx * Bx, Hx), jnp.float32)],
    )(x_tm, params["w_ih"], params["w_hh"], params["b_lstm"],
      params["w_proj"], params["b_proj"], trans2d)

    logits_btc = jnp.transpose(logits_flat.reshape(Tx, Bx, 3 * Cx), (1, 0, 2))
    task_logits = logits_btc[:, :, 0 * Cx:1 * Cx]
    process_logits = logits_btc[:, :, 1 * Cx:2 * Cx]
    material_logits = logits_btc[:, :, 2 * Cx:3 * Cx]

    tags3 = tags2d.reshape(3, Bx, Tx)
    predicted_task_tags = tags3[0]
    predicted_process_tags = tags3[1] + 8
    predicted_material_tags = tags3[2] + 16
    predicted_tags = jnp.concatenate(
        [predicted_task_tags, predicted_process_tags, predicted_material_tags], axis=1)

    return {
        "task_logits": task_logits,
        "process_logits": process_logits,
        "material_logits": material_logits,
        "predicted_task_tags": predicted_task_tags,
        "predicted_process_tags": predicted_process_tags,
        "predicted_material_tags": predicted_material_tags,
        "predicted_tags": predicted_tags,
    }


if __name__ == "__main__":
    key = jax.random.PRNGKey(0)
    ks = jax.random.split(key, 7)
    x_emb = jax.random.normal(ks[0], (B, T, E), jnp.float32)
    params = {
        "w_ih": 0.1 * jax.random.normal(ks[1], (E, 4 * H), jnp.float32),
        "w_hh": 0.1 * jax.random.normal(ks[2], (H, 4 * H), jnp.float32),
        "b_lstm": 0.1 * jax.random.normal(ks[3], (1, 4 * H), jnp.float32),
        "w_proj": (1.0 / jnp.sqrt(1.0 * H)) * jax.random.normal(ks[4], (H, 3 * C), jnp.float32),
        "b_proj": 0.1 * jax.random.normal(ks[5], (1, 3 * C), jnp.float32),
        "transitions": 0.1 * jax.random.normal(ks[6], (3, C, C), jnp.float32),
    }

    fwd = jax.jit(science_ie_tagger_forward)
    out = fwd(x_emb, params)
    jax.block_until_ready(out)

    assert out["task_logits"].shape == (B, T, C)
    assert out["process_logits"].shape == (B, T, C)
    assert out["material_logits"].shape == (B, T, C)
    assert out["predicted_task_tags"].shape == (B, T)
    assert out["predicted_tags"].shape == (B, 3 * T)
    assert int(out["predicted_task_tags"].min()) >= 0
    assert int(out["predicted_task_tags"].max()) < C
    assert int(out["predicted_process_tags"].min()) >= 8
    assert int(out["predicted_process_tags"].max()) < 8 + C
    assert int(out["predicted_material_tags"].min()) >= 16
    assert int(out["predicted_material_tags"].max()) < 16 + C

    print("KERNEL_OK")
</pallas_src>

<mosaic_0001>
module attributes {stable_mosaic.version = 11 : i64} {
  func.func @_fused_tagger_kernel(%arg0: memref<16x16xf32, #tpu.memory_space<vmem>>, %arg1: memref<16x128xf32, #tpu.memory_space<vmem>>, %arg2: memref<32x128xf32, #tpu.memory_space<vmem>>, %arg3: memref<1x128xf32, #tpu.memory_space<vmem>>, %arg4: memref<32x24xf32, #tpu.memory_space<vmem>>, %arg5: memref<1x24xf32, #tpu.memory_space<vmem>>, %arg6: memref<24x8xf32, #tpu.memory_space<vmem>>, %arg7: memref<16x24xf32, #tpu.memory_space<vmem>>, %arg8: memref<6x8xi32, #tpu.memory_space<vmem>>, %arg9: memref<16x32xf32, #tpu.memory_space<vmem>>) attributes {dimension_semantics = [], scalar_prefetch = 0 : i64, scratch_operands = 1 : i64, tpu.core_type = #tpu.core_type<tc>} {
    %c0 = arith.constant 0 : index
    %c0_0 = arith.constant 0 : index
    %0 = vector.load %arg0[%c0, %c0_0] : memref<16x16xf32, #tpu.memory_space<vmem>>, vector<16x16xf32>
    %c0_1 = arith.constant 0 : index
    %c0_2 = arith.constant 0 : index
    %1 = vector.load %arg1[%c0_1, %c0_2] : memref<16x128xf32, #tpu.memory_space<vmem>>, vector<16x128xf32>
    %cst = arith.constant dense<0.000000e+00> : vector<16x128xf32>
    %2 = tpu.matmul %0, %1, %cst {dimension_numbers = #tpu.dot_dimension_numbers<[1], [0], [0], [1], [0, 0, 1, 1], [], []>} : vector<16x16xf32>, vector<16x128xf32>, vector<16x128xf32> -> vector<16x128xf32>
    %c0_3 = arith.constant 0 : index
    %c0_4 = arith.constant 0 : index
    %3 = vector.load %arg3[%c0_3, %c0_4] : memref<1x128xf32, #tpu.memory_space<vmem>>, vector<1x128xf32>
    %4 = vector.broadcast %3 : vector<1x128xf32> to vector<16x128xf32>
    %5 = arith.addf %2, %4 : vector<16x128xf32>
    %c0_5 = arith.constant 0 : index
    %c0_6 = arith.constant 0 : index
    %6 = vector.load %arg2[%c0_5, %c0_6] : memref<32x128xf32, #tpu.memory_space<vmem>>, vector<32x128xf32>
    %cst_7 = arith.constant 0.000000e+00 : f32
    %7 = vector.broadcast %cst_7 : f32 to vector<2x32xf32>
    %cst_8 = arith.constant 0.000000e+00 : f32
    %8 = vector.broadcast %cst_8 : f32 to vector<2x32xf32>
    %9 = vector.extract_strided_slice %5 {offsets = [0, 0], sizes = [2, 128], strides = [1, 1]} : vector<16x128xf32> to vector<2x128xf32>
    %cst_9 = arith.constant dense<0.000000e+00> : vector<2x128xf32>
    %10 = tpu.matmul %7, %6, %cst_9 {dimension_numbers = #tpu.dot_dimension_numbers<[1], [0], [0], [1], [0, 0, 1, 1], [], []>} : vector<2x32xf32>, vector<32x128xf32>, vector<2x128xf32> -> vector<2x128xf32>
    %11 = arith.addf %9, %10 : vector<2x128xf32>
    %12 = vector.extract_strided_slice %11 {offsets = [0, 0], sizes = [2, 32], strides = [1, 1]} : vector<2x128xf32> to vector<2x32xf32>
    %cst_10 = arith.constant 0.000000e+00 : f32
    %13 = vector.broadcast %cst_10 : f32 to vector<2x32xf32>
    %14 = arith.subf %13, %12 : vector<2x32xf32>
    %15 = math.exp %14 : vector<2x32xf32>
    %cst_11 = arith.constant 1.000000e+00 : f32
    %16 = vector.broadcast %cst_11 : f32 to vector<2x32xf32>
    %17 = arith.addf %16, %15 : vector<2x32xf32>
    %18 = tpu.reciprocal %17 {approx = true} : vector<2x32xf32> -> vector<2x32xf32>
    %19 = vector.extract_strided_slice %11 {offsets = [0, 32], sizes = [2, 32], strides = [1, 1]} : vector<2x128xf32> to vector<2x32xf32>
    %cst_12 = arith.constant 0.000000e+00 : f32
    %20 = vector.broadcast %cst_12 : f32 to vector<2x32xf32>
    %21 = arith.subf %20, %19 : vector<2x32xf32>
    %22 = math.exp %21 : vector<2x32xf32>
    %cst_13 = arith.constant 1.000000e+00 : f32
    %23 = vector.broadcast %cst_13 : f32 to vector<2x32xf32>
    %24 = arith.addf %23, %22 : vector<2x32xf32>
    %25 = tpu.reciprocal %24 {approx = true} : vector<2x32xf32> -> vector<2x32xf32>
    %26 = vector.extract_strided_slice %11 {offsets = [0, 64], sizes = [2, 32], strides = [1, 1]} : vector<2x128xf32> to vector<2x32xf32>
    %27 = math.tanh %26 : vector<2x32xf32>
    %28 = vector.extract_strided_slice %11 {offsets = [0, 96], sizes = [2, 32], strides = [1, 1]} : vector<2x128xf32> to vector<2x32xf32>
    %cst_14 = arith.constant 0.000000e+00 : f32
    %29 = vector.broadcast %cst_14 : f32 to vector<2x32xf32>
    %30 = arith.subf %29, %28 : vector<2x32xf32>
    %31 = math.exp %30 : vector<2x32xf32>
    %cst_15 = arith.constant 1.000000e+00 : f32
    %32 = vector.broadcast %cst_15 : f32 to vector<2x32xf32>
    %33 = arith.addf %32, %31 : vector<2x32xf32>
    %34 = tpu.reciprocal %33 {approx = true} : vector<2x32xf32> -> vector<2x32xf32>
    %35 = arith.mulf %25, %8 : vector<2x32xf32>
    %36 = arith.mulf %18, %27 : vector<2x32xf32>
    %37 = arith.addf %35, %36 : vector<2x32xf32>
    %38 = math.tanh %37 : vector<2x32xf32>
    %39 = arith.mulf %34, %38 : vector<2x32xf32>
    %c0_16 = arith.constant 0 : index
    %c0_17 = arith.constant 0 : index
    %40 = vector.load %arg9[%c0_16, %c0_17] : memref<16x32xf32, #tpu.memory_space<vmem>>, vector<2x32xf32>
    tpu.vector_store %arg9[%c0_16, %c0_17], %39 {strides = array<i32>} : memref<16x32xf32, #tpu.memory_space<vmem>>, vector<2x32xf32>,
    %41 = vector.extract_strided_slice %5 {offsets = [2, 0], sizes = [2, 128], strides = [1, 1]} : vector<16x128xf32> to vector<2x128xf32>
    %cst_18 = arith.constant dense<0.000000e+00> : vector<2x128xf32>
    %42 = tpu.matmul %39, %6, %cst_18 {dimension_numbers = #tpu.dot_dimension_numbers<[1], [0], [0], [1], [0, 0, 1, 1], [], []>} : vector<2x32xf32>, vector<32x128xf32>, vector<2x128xf32> -> vector<2x128xf32>
    %43 = arith.addf %41, %42 : vector<2x128xf32>
    %44 = vector.extract_strided_slice %43 {offsets = [0, 0], sizes = [2, 32], strides = [1, 1]} : vector<2x128xf32> to vector<2x32xf32>
    %cst_19 = arith.constant 0.000000e+00 : f32
    %45 = vector.broadcast %cst_19 : f32 to vector<2x32xf32>
    %46 = arith.subf %45, %44 : vector<2x32xf32>
    %47 = math.exp %46 : vector<2x32xf32>
    %cst_20 = arith.constant 1.000000e+00 : f32
    %48 = vector.broadcast %cst_20 : f32 to vector<2x32xf32>
    %49 = arith.addf %48, %47 : vector<2x32xf32>
    %50 = tpu.reciprocal %49 {approx = true} : vector<2x32xf32> -> vector<2x32xf32>
    %51 = vector.extract_strided_slice %43 {offsets = [0, 32], sizes = [2, 32], strides = [1, 1]} : vector<2x128xf32> to vector<2x32xf32>
    %cst_21 = arith.constant 0.000000e+00 : f32
    %52 = vector.broadcast %cst_21 : f32 to vector<2x32xf32>
    %53 = arith.subf %52, %51 : vector<2x32xf32>
    %54 = math.exp %53 : vector<2x32xf32>
    %cst_22 = arith.constant 1.000000e+00 : f32
    %55 = vector.broadcast %cst_22 : f32 to vector<2x32xf32>
    %56 = arith.addf %55, %54 : vector<2x32xf32>
    %57 = tpu.reciprocal %56 {approx = true} : vector<2x32xf32> -> vector<2x32xf32>
    %58 = vector.extract_strided_slice %43 {offsets = [0, 64], sizes = [2, 32], strides = [1, 1]} : vector<2x128xf32> to vector<2x32xf32>
    %59 = math.tanh %58 : vector<2x32xf32>
    %60 = vector.extract_strided_slice %43 {offsets = [0, 96], sizes = [2, 32], strides = [1, 1]} : vector<2x128xf32> to vector<2x32xf32>
    %cst_23 = arith.constant 0.000000e+00 : f32
    %61 = vector.broadcast %cst_23 : f32 to vector<2x32xf32>
    %62 = arith.subf %61, %60 : vector<2x32xf32>
    %63 = math.exp %62 : vector<2x32xf32>
    %cst_24 = arith.constant 1.000000e+00 : f32
    %64 = vector.broadcast %cst_24 : f32 to vector<2x32xf32>
    %65 = arith.addf %64, %63 : vector<2x32xf32>
    %66 = tpu.reciprocal %65 {approx = true} : vector<2x32xf32> -> vector<2x32xf32>
    %67 = arith.mulf %57, %37 : vector<2x32xf32>
    %68 = arith.mulf %50, %59 : vector<2x32xf32>
    %69 = arith.addf %67, %68 : vector<2x32xf32>
    %70 = math.tanh %69 : vector<2x32xf32>
    %71 = arith.mulf %66, %70 : vector<2x32xf32>
    %c2 = arith.constant 2 : index
    %c0_25 = arith.constant 0 : index
    %72 = vector.load %arg9[%c2, %c0_25] : memref<16x32xf32, #tpu.memory_space<vmem>>, vector<2x32xf32>
    tpu.vector_store %arg9[%c2, %c0_25], %71 {strides = array<i32>} : memref<16x32xf32, #tpu.memory_space<vmem>>, vector<2x32xf32>,
    %73 = vector.extract_strided_slice %5 {offsets = [4, 0], sizes = [2, 128], strides = [1, 1]} : vector<16x128xf32> to vector<2x128xf32>
    %cst_26 = arith.constant dense<0.000000e+00> : vector<2x128xf32>
    %74 = tpu.matmul %71, %6, %cst_26 {dimension_numbers = #tpu.dot_dimension_numbers<[1], [0], [0], [1], [0, 0, 1, 1], [], []>} : vector<2x32xf32>, vector<32x128xf32>, vector<2x128xf32> -> vector<2x128xf32>
    %75 = arith.addf %73, %74 : vector<2x128xf32>
    %76 = vector.extract_strided_slice %75 {offsets = [0, 0], sizes = [2, 32], strides = [1, 1]} : vector<2x128xf32> to vector<2x32xf32>
    %cst_27 = arith.constant 0.000000e+00 : f32
    %77 = vector.broadcast %cst_27 : f32 to vector<2x32xf32>
    %78 = arith.subf %77, %76 : vector<2x32xf32>
    %79 = math.exp %78 : vector<2x32xf32>
    %cst_28 = arith.constant 1.000000e+00 : f32
    %80 = vector.broadcast %cst_28 : f32 to vector<2x32xf32>
    %81 = arith.addf %80, %79 : vector<2x32xf32>
    %82 = tpu.reciprocal %81 {approx = true} : vector<2x32xf32> -> vector<2x32xf32>
    %83 = vector.extract_strided_slice %75 {offsets = [0, 32], sizes = [2, 32], strides = [1, 1]} : vector<2x128xf32> to vector<2x32xf32>
    %cst_29 = arith.constant 0.000000e+00 : f32
    %84 = vector.broadcast %cst_29 : f32 to vector<2x32xf32>
    %85 = arith.subf %84, %83 : vector<2x32xf32>
    %86 = math.exp %85 : vector<2x32xf32>
    %cst_30 = arith.constant 1.000000e+00 : f32
    %87 = vector.broadcast %cst_30 : f32 to vector<2x32xf32>
    %88 = arith.addf %87, %86 : vector<2x32xf32>
    %89 = tpu.reciprocal %88 {approx = true} : vector<2x32xf32> -> vector<2x32xf32>
    %90 = vector.extract_strided_slice %75 {offsets = [0, 64], sizes = [2, 32], strides = [1, 1]} : vector<2x128xf32> to vector<2x32xf32>
    %91 = math.tanh %90 : vector<2x32xf32>
    %92 = vector.extract_strided_slice %75 {offsets = [0, 96], sizes = [2, 32], strides = [1, 1]} : vector<2x128xf32> to vector<2x32xf32>
    %cst_31 = arith.constant 0.000000e+00 : f32
    %93 = vector.broadcast %cst_31 : f32 to vector<2x32xf32>
    %94 = arith.subf %93, %92 : vector<2x32xf32>
    %95 = math.exp %94 : vector<2x32xf32>
    %cst_32 = arith.constant 1.000000e+00 : f32
    %96 = vector.broadcast %cst_32 : f32 to vector<2x32xf32>
    %97 = arith.addf %96, %95 : vector<2x32xf32>
    %98 = tpu.reciprocal %97 {approx = true} : vector<2x32xf32> -> vector<2x32xf32>
    %99 = arith.mulf %89, %69 : vector<2x32xf32>
    %100 = arith.mulf %82, %91 : vector<2x32xf32>
    %101 = arith.addf %99, %100 : vector<2x32xf32>
    %102 = math.tanh %101 : vector<2x32xf32>
    %103 = arith.mulf %98, %102 : vector<2x32xf32>
    %c4 = arith.constant 4 : index
    %c0_33 = arith.constant 0 : index
    %104 = vector.load %arg9[%c4, %c0_33] : memref<16x32xf32, #tpu.memory_space<vmem>>, vector<2x32xf32>
    tpu.vector_store %arg9[%c4, %c0_33], %103 {strides = array<i32>} : memref<16x32xf32, #tpu.memory_space<vmem>>, vector<2x32xf32>,
    %105 = vector.extract_strided_slice %5 {offsets = [6, 0], sizes = [2, 128], strides = [1, 1]} : vector<16x128xf32> to vector<2x128xf32>
    %cst_34 = arith.constant dense<0.000000e+00> : vector<2x128xf32>
    %106 = tpu.matmul %103, %6, %cst_34 {dimension_numbers = #tpu.dot_dimension_numbers<[1], [0], [0], [1], [0, 0, 1, 1], [], []>} : vector<2x32xf32>, vector<32x128xf32>, vector<2x128xf32> -> vector<2x128xf32>
    %107 = arith.addf %105, %106 : vector<2x128xf32>
    %108 = vector.extract_strided_slice %107 {offsets = [0, 0], sizes = [2, 32], strides = [1, 1]} : vector<2x128xf32> to vector<2x32xf32>
    %cst_35 = arith.constant 0.000000e+00 : f32
    %109 = vector.broadcast %cst_35 : f32 to vector<2x32xf32>
    %110 = arith.subf %109, %108 : vector<2x32xf32>
    %111 = math.exp %110 : vector<2x32xf32>
    %cst_36 = arith.constant 1.000000e+00 : f32
    %112 = vector.broadcast %cst_36 : f32 to vector<2x32xf32>
    %113 = arith.addf %112, %111 : vector<2x32xf32>
    %114 = tpu.reciprocal %113 {approx = true} : vector<2x32xf32> -> vector<2x32xf32>
    %115 = vector.extract_strided_slice %107 {offsets = [0, 32], sizes = [2, 32], strides = [1, 1]} : vector<2x128xf32> to vector<2x32xf32>
    %cst_37 = arith.constant 0.000000e+00 : f32
    %116 = vector.broadcast %cst_37 : f32 to vector<2x32xf32>
    %117 = arith.subf %116, %115 : vector<2x32xf32>
    %118 = math.exp %117 : vector<2x32xf32>
    %cst_38 = arith.constant 1.000000e+00 : f32
    %119 = vector.broadcast %cst_38 : f32 to vector<2x32xf32>
    %120 = arith.addf %119, %118 : vector<2x32xf32>
    %121 = tpu.reciprocal %120 {approx = true} : vector<2x32xf32> -> vector<2x32xf32>
    %122 = vector.extract_strided_slice %107 {offsets = [0, 64], sizes = [2, 32], strides = [1, 1]} : vector<2x128xf32> to vector<2x32xf32>
    %123 = math.tanh %122 : vector<2x32xf32>
    %124 = vector.extract_strided_slice %107 {offsets = [0, 96], sizes = [2, 32], strides = [1, 1]} : vector<2x128xf32> to vector<2x32xf32>
    %cst_39 = arith.constant 0.000000e+00 : f32
    %125 = vector.broadcast %cst_39 : f32 to vector<2x32xf32>
    %126 = arith.subf %125, %124 : vector<2x32xf32>
    %127 = math.exp %126 : vector<2x32xf32>
    %cst_40 = arith.constant 1.000000e+00 : f32
    %128 = vector.broadcast %cst_40 : f32 to vector<2x32xf32>
    %129 = arith.addf %128, %127 : vector<2x32xf32>
    %130 = tpu.reciprocal %129 {approx = true} : vector<2x32xf32> -> vector<2x32xf32>
    %131 = arith.mulf %121, %101 : vector<2x32xf32>
    %132 = arith.mulf %114, %123 : vector<2x32xf32>
    %133 = arith.addf %131, %132 : vector<2x32xf32>
    %134 = math.tanh %133 : vector<2x32xf32>
    %135 = arith.mulf %130, %134 : vector<2x32xf32>
    %c6 = arith.constant 6 : index
    %c0_41 = arith.constant 0 : index
    %136 = vector.load %arg9[%c6, %c0_41] : memref<16x32xf32, #tpu.memory_space<vmem>>, vector<2x32xf32>
    tpu.vector_store %arg9[%c6, %c0_41], %135 {strides = array<i32>} : memref<16x32xf32, #tpu.memory_space<vmem>>, vector<2x32xf32>,
    %137 = vector.extract_strided_slice %5 {offsets = [8, 0], sizes = [2, 128], strides = [1, 1]} : vector<16x128xf32> to vector<2x128xf32>
    %cst_42 = arith.constant dense<0.000000e+00> : vector<2x128xf32>
    %138 = tpu.matmul %135, %6, %cst_42 {dimension_numbers = #tpu.dot_dimension_numbers<[1], [0], [0], [1], [0, 0, 1, 1], [], []>} : vector<2x32xf32>, vector<32x128xf32>, vector<2x128xf32> -> vector<2x128xf32>
    %139 = arith.addf %137, %138 : vector<2x128xf32>
    %140 = vector.extract_strided_slice %139 {offsets = [0, 0], sizes = [2, 32], strides = [1, 1]} : vector<2x128xf32> to vector<2x32xf32>
    %cst_43 = arith.constant 0.000000e+00 : f32
    %141 = vector.broadcast %cst_43 : f32 to vector<2x32xf32>
    %142 = arith.subf %141, %140 : vector<2x32xf32>
    %143 = math.exp %142 : vector<2x32xf32>
    %cst_44 = arith.constant 1.000000e+00 : f32
    %144 = vector.broadcast %cst_44 : f32 to vector<2x32xf32>
    %145 = arith.addf %144, %143 : vector<2x32xf32>
    %146 = tpu.reciprocal %145 {approx = true} : vector<2x32xf32> -> vector<2x32xf32>
    %147 = vector.extract_strided_slice %139 {offsets = [0, 32], sizes = [2, 32], strides = [1, 1]} : vector<2x128xf32> to vector<2x32xf32>
    %cst_45 = arith.constant 0.000000e+00 : f32
    %148 = vector.broadcast %cst_45 : f32 to vector<2x32xf32>
    %149 = arith.subf %148, %147 : vector<2x32xf32>
    %150 = math.exp %149 : vector<2x32xf32>
    %cst_46 = arith.constant 1.000000e+00 : f32
    %151 = vector.broadcast %cst_46 : f32 to vector<2x32xf32>
    %152 = arith.addf %151, %150 : vector<2x32xf32>
    %153 = tpu.reciprocal %152 {approx = true} : vector<2x32xf32> -> vector<2x32xf32>
    %154 = vector.extract_strided_slice %139 {offsets = [0, 64], sizes = [2, 32], strides = [1, 1]} : vector<2x128xf32> to vector<2x32xf32>
    %155 = math.tanh %154 : vector<2x32xf32>
    %156 = vector.extract_strided_slice %139 {offsets = [0, 96], sizes = [2, 32], strides = [1, 1]} : vector<2x128xf32> to vector<2x32xf32>
    %cst_47 = arith.constant 0.000000e+00 : f32
    %157 = vector.broadcast %cst_47 : f32 to vector<2x32xf32>
    %158 = arith.subf %157, %156 : vector<2x32xf32>
    %159 = math.exp %158 : vector<2x32xf32>
    %cst_48 = arith.constant 1.000000e+00 : f32
    %160 = vector.broadcast %cst_48 : f32 to vector<2x32xf32>
    %161 = arith.addf %160, %159 : vector<2x32xf32>
    %162 = tpu.reciprocal %161 {approx = true} : vector<2x32xf32> -> vector<2x32xf32>
    %163 = arith.mulf %153, %133 : vector<2x32xf32>
    %164 = arith.mulf %146, %155 : vector<2x32xf32>
    %165 = arith.addf %163, %164 : vector<2x32xf32>
    %166 = math.tanh %165 : vector<2x32xf32>
    %167 = arith.mulf %162, %166 : vector<2x32xf32>
    %c8 = arith.constant 8 : index
    %c0_49 = arith.constant 0 : index
    %168 = vector.load %arg9[%c8, %c0_49] : memref<16x32xf32, #tpu.memory_space<vmem>>, vector<2x32xf32>
    tpu.vector_store %arg9[%c8, %c0_49], %167 {strides = array<i32>} : memref<16x32xf32, #tpu.memory_space<vmem>>, vector<2x32xf32>,
    %169 = vector.extract_strided_slice %5 {offsets = [10, 0], sizes = [2, 128], strides = [1, 1]} : vector<16x128xf32> to vector<2x128xf32>
    %cst_50 = arith.constant dense<0.000000e+00> : vector<2x128xf32>
    %170 = tpu.matmul %167, %6, %cst_50 {dimension_numbers = #tpu.dot_dimension_numbers<[1], [0], [0], [1], [0, 0, 1, 1], [], []>} : vector<2x32xf32>, vector<32x128xf32>, vector<2x128xf32> -> vector<2x128xf32>
    %171 = arith.addf %169, %170 : vector<2x128xf32>
    %172 = vector.extract_strided_slice %171 {offsets = [0, 0], sizes = [2, 32], strides = [1, 1]} : vector<2x128xf32> to vector<2x32xf32>
    %cst_51 = arith.constant 0.000000e+00 : f32
    %173 = vector.broadcast %cst_51 : f32 to vector<2x32xf32>
    %174 = arith.subf %173, %172 : vector<2x32xf32>
    %175 = math.exp %174 : vector<2x32xf32>
    %cst_52 = arith.constant 1.000000e+00 : f32
    %176 = vector.broadcast %cst_52 : f32 to vector<2x32xf32>
    %177 = arith.addf %176, %175 : vector<2x32xf32>
    %178 = tpu.reciprocal %177 {approx = true} : vector<2x32xf32> -> vector<2x32xf32>
    %179 = vector.extract_strided_slice %171 {offsets = [0, 32], sizes = [2, 32], strides = [1, 1]} : vector<2x128xf32> to vector<2x32xf32>
    %cst_53 = arith.constant 0.000000e+00 : f32
    %180 = vector.broadcast %cst_53 : f32 to vector<2x32xf32>
    %181 = arith.subf %180, %179 : vector<2x32xf32>
    %182 = math.exp %181 : vector<2x32xf32>
    %cst_54 = arith.constant 1.000000e+00 : f32
    %183 = vector.broadcast %cst_54 : f32 to vector<2x32xf32>
    %184 = arith.addf %183, %182 : vector<2x32xf32>
    %185 = tpu.reciprocal %184 {approx = true} : vector<2x32xf32> -> vector<2x32xf32>
    %186 = vector.extract_strided_slice %171 {offsets = [0, 64], sizes = [2, 32], strides = [1, 1]} : vector<2x128xf32> to vector<2x32xf32>
    %187 = math.tanh %186 : vector<2x32xf32>
    %188 = vector.extract_strided_slice %171 {offsets = [0, 96], sizes = [2, 32], strides = [1, 1]} : vector<2x128xf32> to vector<2x32xf32>
    %cst_55 = arith.constant 0.000000e+00 : f32
    %189 = vector.broadcast %cst_55 : f32 to vector<2x32xf32>
    %190 = arith.subf %189, %188 : vector<2x32xf32>
    %191 = math.exp %190 : vector<2x32xf32>
    %cst_56 = arith.constant 1.000000e+00 : f32
    %192 = vector.broadcast %cst_56 : f32 to vector<2x32xf32>
    %193 = arith.addf %192, %191 : vector<2x32xf32>
    %194 = tpu.reciprocal %193 {approx = true} : vector<2x32xf32> -> vector<2x32xf32>
    %195 = arith.mulf %185, %165 : vector<2x32xf32>
    %196 = arith.mulf %178, %187 : vector<2x32xf32>
    %197 = arith.addf %195, %196 : vector<2x32xf32>
    %198 = math.tanh %197 : vector<2x32xf32>
    %199 = arith.mulf %194, %198 : vector<2x32xf32>
    %c10 = arith.constant 10 : index
    %c0_57 = arith.constant 0 : index
    %200 = vector.load %arg9[%c10, %c0_57] : memref<16x32xf32, #tpu.memory_space<vmem>>, vector<2x32xf32>
    tpu.vector_store %arg9[%c10, %c0_57], %199 {strides = array<i32>} : memref<16x32xf32, #tpu.memory_space<vmem>>, vector<2x32xf32>,
    %201 = vector.extract_strided_slice %5 {offsets = [12, 0], sizes = [2, 128], strides = [1, 1]} : vector<16x128xf32> to vector<2x128xf32>
    %cst_58 = arith.constant dense<0.000000e+00> : vector<2x128xf32>
    %202 = tpu.matmul %199, %6, %cst_58 {dimension_numbers = #tpu.dot_dimension_numbers<[1], [0], [0], [1], [0, 0, 1, 1], [], []>} : vector<2x32xf32>, vector<32x128xf32>, vector<2x128xf32> -> vector<2x128xf32>
    %203 = arith.addf %201, %202 : vector<2x128xf32>
    %204 = vector.extract_strided_slice %203 {offsets = [0, 0], sizes = [2, 32], strides = [1, 1]} : vector<2x128xf32> to vector<2x32xf32>
    %cst_59 = arith.constant 0.000000e+00 : f32
    %205 = vector.broadcast %cst_59 : f32 to vector<2x32xf32>
    %206 = arith.subf %205, %204 : vector<2x32xf32>
    %207 = math.exp %206 : vector<2x32xf32>
    %cst_60 = arith.constant 1.000000e+00 : f32
    %208 = vector.broadcast %cst_60 : f32 to vector<2x32xf32>
    %209 = arith.addf %208, %207 : vector<2x32xf32>
    %210 = tpu.reciprocal %209 {approx = true} : vector<2x32xf32> -> vector<2x32xf32>
    %211 = vector.extract_strided_slice %203 {offsets = [0, 32], sizes = [2, 32], strides = [1, 1]} : vector<2x128xf32> to vector<2x32xf32>
    %cst_61 = arith.constant 0.000000e+00 : f32
    %212 = vector.broadcast %cst_61 : f32 to vector<2x32xf32>
    %213 = arith.subf %212, %211 : vector<2x32xf32>
    %214 = math.exp %213 : vector<2x32xf32>
    %cst_62 = arith.constant 1.000000e+00 : f32
    %215 = vector.broadcast %cst_62 : f32 to vector<2x32xf32>
    %216 = arith.addf %215, %214 : vector<2x32xf32>
    %217 = tpu.reciprocal %216 {approx = true} : vector<2x32xf32> -> vector<2x32xf32>
    %218 = vector.extract_strided_slice %203 {offsets = [0, 64], sizes = [2, 32], strides = [1, 1]} : vector<2x128xf32> to vector<2x32xf32>
    %219 = math.tanh %218 : vector<2x32xf32>
    %220 = vector.extract_strided_slice %203 {offsets = [0, 96], sizes = [2, 32], strides = [1, 1]} : vector<2x128xf32> to vector<2x32xf32>
    %cst_63 = arith.constant 0.000000e+00 : f32
    %221 = vector.broadcast %cst_63 : f32 to vector<2x32xf32>
    %222 = arith.subf %221, %220 : vector<2x32xf32>
    %223 = math.exp %222 : vector<2x32xf32>
    %cst_64 = arith.constant 1.000000e+00 : f32
    %224 = vector.broadcast %cst_64 : f32 to vector<2x32xf32>
    %225 = arith.addf %224, %223 : vector<2x32xf32>
    %226 = tpu.reciprocal %225 {approx = true} : vector<2x32xf32> -> vector<2x32xf32>
    %227 = arith.mulf %217, %197 : vector<2x32xf32>
    %228 = arith.mulf %210, %219 : vector<2x32xf32>
    %229 = arith.addf %227, %228 : vector<2x32xf32>
    %230 = math.tanh %229 : vector<2x32xf32>
    %231 = arith.mulf %226, %230 : vector<2x32xf32>
    %c12 = arith.constant 12 : index
    %c0_65 = arith.constant 0 : index
    %232 = vector.load %arg9[%c12, %c0_65] : memref<16x32xf32, #tpu.memory_space<vmem>>, vector<2x32xf32>
    tpu.vector_store %arg9[%c12, %c0_65], %231 {strides = array<i32>} : memref<16x32xf32, #tpu.memory_space<vmem>>, vector<2x32xf32>,
    %233 = vector.extract_strided_slice %5 {offsets = [14, 0], sizes = [2, 128], strides = [1, 1]} : vector<16x128xf32> to vector<2x128xf32>
    %cst_66 = arith.constant dense<0.000000e+00> : vector<2x128xf32>
    %234 = tpu.matmul %231, %6, %cst_66 {dimension_numbers = #tpu.dot_dimension_numbers<[1], [0], [0], [1], [0, 0, 1, 1], [], []>} : vector<2x32xf32>, vector<32x128xf32>, vector<2x128xf32> -> vector<2x128xf32>
    %235 = arith.addf %233, %234 : vector<2x128xf32>
    %236 = vector.extract_strided_slice %235 {offsets = [0, 0], sizes = [2, 32], strides = [1, 1]} : vector<2x128xf32> to vector<2x32xf32>
    %cst_67 = arith.constant 0.000000e+00 : f32
    %237 = vector.broadcast %cst_67 : f32 to vector<2x32xf32>
    %238 = arith.subf %237, %236 : vector<2x32xf32>
    %239 = math.exp %238 : vector<2x32xf32>
    %cst_68 = arith.constant 1.000000e+00 : f32
    %240 = vector.broadcast %cst_68 : f32 to vector<2x32xf32>
    %241 = arith.addf %240, %239 : vector<2x32xf32>
    %242 = tpu.reciprocal %241 {approx = true} : vector<2x32xf32> -> vector<2x32xf32>
    %243 = vector.extract_strided_slice %235 {offsets = [0, 32], sizes = [2, 32], strides = [1, 1]} : vector<2x128xf32> to vector<2x32xf32>
    %cst_69 = arith.constant 0.000000e+00 : f32
    %244 = vector.broadcast %cst_69 : f32 to vector<2x32xf32>
    %245 = arith.subf %244, %243 : vector<2x32xf32>
    %246 = math.exp %245 : vector<2x32xf32>
    %cst_70 = arith.constant 1.000000e+00 : f32
    %247 = vector.broadcast %cst_70 : f32 to vector<2x32xf32>
    %248 = arith.addf %247, %246 : vector<2x32xf32>
    %249 = tpu.reciprocal %248 {approx = true} : vector<2x32xf32> -> vector<2x32xf32>
    %250 = vector.extract_strided_slice %235 {offsets = [0, 64], sizes = [2, 32], strides = [1, 1]} : vector<2x128xf32> to vector<2x32xf32>
    %251 = math.tanh %250 : vector<2x32xf32>
    %252 = vector.extract_strided_slice %235 {offsets = [0, 96], sizes = [2, 32], strides = [1, 1]} : vector<2x128xf32> to vector<2x32xf32>
    %cst_71 = arith.constant 0.000000e+00 : f32
    %253 = vector.broadcast %cst_71 : f32 to vector<2x32xf32>
    %254 = arith.subf %253, %252 : vector<2x32xf32>
    %255 = math.exp %254 : vector<2x32xf32>
    %cst_72 = arith.constant 1.000000e+00 : f32
    %256 = vector.broadcast %cst_72 : f32 to vector<2x32xf32>
    %257 = arith.addf %256, %255 : vector<2x32xf32>
    %258 = tpu.reciprocal %257 {approx = true} : vector<2x32xf32> -> vector<2x32xf32>
    %259 = arith.mulf %249, %229 : vector<2x32xf32>
    %260 = arith.mulf %242, %251 : vector<2x32xf32>
    %261 = arith.addf %259, %260 : vector<2x32xf32>
    %262 = math.tanh %261 : vector<2x32xf32>
    %263 = arith.mulf %258, %262 : vector<2x32xf32>
    %c14 = arith.constant 14 : index
    %c0_73 = arith.constant 0 : index
    %264 = vector.load %arg9[%c14, %c0_73] : memref<16x32xf32, #tpu.memory_space<vmem>>, vector<2x32xf32>
    tpu.vector_store %arg9[%c14, %c0_73], %263 {strides = array<i32>} : memref<16x32xf32, #tpu.memory_space<vmem>>, vector<2x32xf32>,
    %c0_74 = arith.constant 0 : index
    %c0_75 = arith.constant 0 : index
    %265 = vector.load %arg9[%c0_74, %c0_75] : memref<16x32xf32, #tpu.memory_space<vmem>>, vector<16x32xf32>
    %c0_76 = arith.constant 0 : index
    %c0_77 = arith.constant 0 : index
    %266 = vector.load %arg4[%c0_76, %c0_77] : memref<32x24xf32, #tpu.memory_space<vmem>>, vector<32x24xf32>
    %cst_78 = arith.constant dense<0.000000e+00> : vector<16x24xf32>
    %267 = tpu.matmul %265, %266, %cst_78 {dimension_numbers = #tpu.dot_dimension_numbers<[1], [0], [0], [1], [0, 0, 1, 1], [], []>} : vector<16x32xf32>, vector<32x24xf32>, vector<16x24xf32> -> vector<16x24xf32>
    %c0_79 = arith.constant 0 : index
    %c0_80 = arith.constant 0 : index
    %268 = vector.load %arg5[%c0_79, %c0_80] : memref<1x24xf32, #tpu.memory_space<vmem>>, vector<1x24xf32>
    %269 = vector.broadcast %268 : vector<1x24xf32> to vector<16x24xf32>
    %270 = arith.addf %267, %269 : vector<16x24xf32>
    %c0_81 = arith.constant 0 : index
    %c0_82 = arith.constant 0 : index
    %271 = vector.load %arg7[%c0_81, %c0_82] : memref<16x24xf32, #tpu.memory_space<vmem>>, vector<16x24xf32>
    tpu.vector_store %arg7[%c0_81, %c0_82], %270 {strides = array<i32>} : memref<16x24xf32, #tpu.memory_space<vmem>>, vector<16x24xf32>,
    %c0_83 = arith.constant 0 : index
    %c0_84 = arith.constant 0 : index
    %272 = vector.load %arg6[%c0_83, %c0_84] : memref<24x8xf32, #tpu.memory_space<vmem>>, vector<24x8xf32>
    %273 = tpu.iota {dimensions = array<i32: 1>} : vector<1x8xi32>
    %274 = arith.sitofp %273 : vector<1x8xi32> to vector<1x8xf32>
    %275 = tpu.iota {dimensions = array<i32: 0>} : vector<8x8xi32>
    %276 = arith.sitofp %275 : vector<8x8xi32> to vector<8x8xf32>
    %277 = tpu.iota {dimensions = array<i32: 1>} : vector<8x8xi32>
    %278 = arith.sitofp %277 : vector<8x8xi32> to vector<8x8xf32>
    %279 = arith.cmpf oeq, %276, %278 : vector<8x8xf32>
    %280 = arith.extui %279 : vector<8x8xi1> to vector<8x8xi32>
    %281 = arith.sitofp %280 : vector<8x8xi32> to vector<8x8xf32>
    %282 = tpu.iota {dimensions = array<i32: 1>} : vector<1x8xi32>
    %283 = tpu.iota {dimensions = array<i32: 0>} : vector<6x1xi32>
    %cst_85 = arith.constant 0.000000e+00 : f32
    %284 = vector.broadcast %cst_85 : f32 to vector<6x8xf32>
    %285 = vector.extract_strided_slice %272 {offsets = [0, 0], sizes = [8, 8], strides = [1, 1]} : vector<24x8xf32> to vector<8x8xf32>
    %286 = vector.extract_strided_slice %270 {offsets = [0, 0], sizes = [1, 8], strides = [1, 1]} : vector<16x24xf32> to vector<1x8xf32>
    %287 = vector.extract_strided_slice %270 {offsets = [2, 0], sizes = [1, 8], strides = [1, 1]} : vector<16x24xf32> to vector<1x8xf32>
    %288 = vector.extract_strided_slice %270 {offsets = [4, 0], sizes = [1, 8], strides = [1, 1]} : vector<16x24xf32> to vector<1x8xf32>
    %289 = vector.extract_strided_slice %270 {offsets = [6, 0], sizes = [1, 8], strides = [1, 1]} : vector<16x24xf32> to vector<1x8xf32>
    %290 = vector.extract_strided_slice %270 {offsets = [8, 0], sizes = [1, 8], strides = [1, 1]} : vector<16x24xf32> to vector<1x8xf32>
    %291 = vector.extract_strided_slice %270 {offsets = [10, 0], sizes = [1, 8], strides = [1, 1]} : vector<16x24xf32> to vector<1x8xf32>
    %292 = vector.extract_strided_slice %270 {offsets = [12, 0], sizes = [1, 8], strides = [1, 1]} : vector<16x24xf32> to vector<1x8xf32>
    %293 = vector.extract_strided_slice %270 {offsets = [14, 0], sizes = [1, 8], strides = [1, 1]} : vector<16x24xf32> to vector<1x8xf32>
    %294 = vector.broadcast %286 : vector<1x8xf32> to vector<8x8xf32>
    %295 = arith.mulf %294, %281 : vector<8x8xf32>
    %cst_86 = arith.constant dense<0.000000e+00> : vector<8xf32>
    %296 = vector.multi_reduction <add>, %295, %cst_86 [1] : vector<8x8xf32> to vector<8xf32>
    %297 = vector.shape_cast %296 : vector<8xf32> to vector<8x1xf32>
    %298 = vector.broadcast %297 : vector<8x1xf32> to vector<8x8xf32>
    %299 = arith.addf %298, %285 : vector<8x8xf32>
    %cst_87 = arith.constant dense<0xFF800000> : vector<8xf32>
    %300 = vector.multi_reduction <maximumf>, %299, %cst_87 [0] : vector<8x8xf32> to vector<8xf32>
    %301 = vector.shape_cast %300 : vector<8xf32> to vector<1x8xf32>
    %302 = vector.broadcast %301 : vector<1x8xf32> to vector<8x8xf32>
    %303 = arith.cmpf oeq, %299, %302 : vector<8x8xf32>
    %cst_88 = arith.constant 8.000000e+00 : f32
    %304 = vector.broadcast %cst_88 : f32 to vector<8x8xf32>
    %305 = arith.select %303, %276, %304 : vector<8x8xi1>, vector<8x8xf32>
    %cst_89 = arith.constant dense<0x7F800000> : vector<8xf32>
    %306 = vector.multi_reduction <minimumf>, %305, %cst_89 [0] : vector<8x8xf32> to vector<8xf32>
    %307 = vector.shape_cast %306 : vector<8xf32> to vector<1x8xf32>
    %308 = arith.addf %301, %287 : vector<1x8xf32>
    %309 = vector.broadcast %308 : vector<1x8xf32> to vector<8x8xf32>
    %310 = arith.mulf %309, %281 : vector<8x8xf32>
    %cst_90 = arith.constant dense<0.000000e+00> : vector<8xf32>
    %311 = vector.multi_reduction <add>, %310, %cst_90 [1] : vector<8x8xf32> to vector<8xf32>
    %312 = vector.shape_cast %311 : vector<8xf32> to vector<8x1xf32>
    %313 = vector.broadcast %312 : vector<8x1xf32> to vector<8x8xf32>
    %314 = arith.addf %313, %285 : vector<8x8xf32>
    %cst_91 = arith.constant dense<0xFF800000> : vector<8xf32>
    %315 = vector.multi_reduction <maximumf>, %314, %cst_91 [0] : vector<8x8xf32> to vector<8xf32>
    %316 = vector.shape_cast %315 : vector<8xf32> to vector<1x8xf32>
    %317 = vector.broadcast %316 : vector<1x8xf32> to vector<8x8xf32>
    %318 = arith.cmpf oeq, %314, %317 : vector<8x8xf32>
    %cst_92 = arith.constant 8.000000e+00 : f32
    %319 = vector.broadcast %cst_92 : f32 to vector<8x8xf32>
    %320 = arith.select %318, %276, %319 : vector<8x8xi1>, vector<8x8xf32>
    %cst_93 = arith.constant dense<0x7F800000> : vector<8xf32>
    %321 = vector.multi_reduction <minimumf>, %320, %cst_93 [0] : vector<8x8xf32> to vector<8xf32>
    %322 = vector.shape_cast %321 : vector<8xf32> to vector<1x8xf32>
    %323 = arith.addf %316, %288 : vector<1x8xf32>
    %324 = vector.broadcast %323 : vector<1x8xf32> to vector<8x8xf32>
    %325 = arith.mulf %324, %281 : vector<8x8xf32>
    %cst_94 = arith.constant dense<0.000000e+00> : vector<8xf32>
    %326 = vector.multi_reduction <add>, %325, %cst_94 [1] : vector<8x8xf32> to vector<8xf32>
    %327 = vector.shape_cast %326 : vector<8xf32> to vector<8x1xf32>
    %328 = vector.broadcast %327 : vector<8x1xf32> to vector<8x8xf32>
    %329 = arith.addf %328, %285 : vector<8x8xf32>
    %cst_95 = arith.constant dense<0xFF800000> : vector<8xf32>
    %330 = vector.multi_reduction <maximumf>, %329, %cst_95 [0] : vector<8x8xf32> to vector<8xf32>
    %331 = vector.shape_cast %330 : vector<8xf32> to vector<1x8xf32>
    %332 = vector.broadcast %331 : vector<1x8xf32> to vector<8x8xf32>
    %333 = arith.cmpf oeq, %329, %332 : vector<8x8xf32>
    %cst_96 = arith.constant 8.000000e+00 : f32
    %334 = vector.broadcast %cst_96 : f32 to vector<8x8xf32>
    %335 = arith.select %333, %276, %334 : vector<8x8xi1>, vector<8x8xf32>
    %cst_97 = arith.constant dense<0x7F800000> : vector<8xf32>
    %336 = vector.multi_reduction <minimumf>, %335, %cst_97 [0] : vector<8x8xf32> to vector<8xf32>
    %337 = vector.shape_cast %336 : vector<8xf32> to vector<1x8xf32>
    %338 = arith.addf %331, %289 : vector<1x8xf32>
    %339 = vector.broadcast %338 : vector<1x8xf32> to vector<8x8xf32>
    %340 = arith.mulf %339, %281 : vector<8x8xf32>
    %cst_98 = arith.constant dense<0.000000e+00> : vector<8xf32>
    %341 = vector.multi_reduction <add>, %340, %cst_98 [1] : vector<8x8xf32> to vector<8xf32>
    %342 = vector.shape_cast %341 : vector<8xf32> to vector<8x1xf32>
    %343 = vector.broadcast %342 : vector<8x1xf32> to vector<8x8xf32>
    %344 = arith.addf %343, %285 : vector<8x8xf32>
    %cst_99 = arith.constant dense<0xFF800000> : vector<8xf32>
    %345 = vector.multi_reduction <maximumf>, %344, %cst_99 [0] : vector<8x8xf32> to vector<8xf32>
    %346 = vector.shape_cast %345 : vector<8xf32> to vector<1x8xf32>
    %347 = vector.broadcast %346 : vector<1x8xf32> to vector<8x8xf32>
    %348 = arith.cmpf oeq, %344, %347 : vector<8x8xf32>
    %cst_100 = arith.constant 8.000000e+00 : f32
    %349 = vector.broadcast %cst_100 : f32 to vector<8x8xf32>
    %350 = arith.select %348, %276, %349 : vector<8x8xi1>, vector<8x8xf32>
    %cst_101 = arith.constant dense<0x7F800000> : vector<8xf32>
    %351 = vector.multi_reduction <minimumf>, %350, %cst_101 [0] : vector<8x8xf32> to vector<8xf32>
    %352 = vector.shape_cast %351 : vector<8xf32> to vector<1x8xf32>
    %353 = arith.addf %346, %290 : vector<1x8xf32>
    %354 = vector.broadcast %353 : vector<1x8xf32> to vector<8x8xf32>
    %355 = arith.mulf %354, %281 : vector<8x8xf32>
    %cst_102 = arith.constant dense<0.000000e+00> : vector<8xf32>
    %356 = vector.multi_reduction <add>, %355, %cst_102 [1] : vector<8x8xf32> to vector<8xf32>
    %357 = vector.shape_cast %356 : vector<8xf32> to vector<8x1xf32>
    %358 = vector.broadcast %357 : vector<8x1xf32> to vector<8x8xf32>
    %359 = arith.addf %358, %285 : vector<8x8xf32>
    %cst_103 = arith.constant dense<0xFF800000> : vector<8xf32>
    %360 = vector.multi_reduction <maximumf>, %359, %cst_103 [0] : vector<8x8xf32> to vector<8xf32>
    %361 = vector.shape_cast %360 : vector<8xf32> to vector<1x8xf32>
    %362 = vector.broadcast %361 : vector<1x8xf32> to vector<8x8xf32>
    %363 = arith.cmpf oeq, %359, %362 : vector<8x8xf32>
    %cst_104 = arith.constant 8.000000e+00 : f32
    %364 = vector.broadcast %cst_104 : f32 to vector<8x8xf32>
    %365 = arith.select %363, %276, %364 : vector<8x8xi1>, vector<8x8xf32>
    %cst_105 = arith.constant dense<0x7F800000> : vector<8xf32>
    %366 = vector.multi_reduction <minimumf>, %365, %cst_105 [0] : vector<8x8xf32> to vector<8xf32>
    %367 = vector.shape_cast %366 : vector<8xf32> to vector<1x8xf32>
    %368 = arith.addf %361, %291 : vector<1x8xf32>
    %369 = vector.broadcast %368 : vector<1x8xf32> to vector<8x8xf32>
    %370 = arith.mulf %369, %281 : vector<8x8xf32>
    %cst_106 = arith.constant dense<0.000000e+00> : vector<8xf32>
    %371 = vector.multi_reduction <add>, %370, %cst_106 [1] : vector<8x8xf32> to vector<8xf32>
    %372 = vector.shape_cast %371 : vector<8xf32> to vector<8x1xf32>
    %373 = vector.broadcast %372 : vector<8x1xf32> to vector<8x8xf32>
    %374 = arith.addf %373, %285 : vector<8x8xf32>
    %cst_107 = arith.constant dense<0xFF800000> : vector<8xf32>
    %375 = vector.multi_reduction <maximumf>, %374, %cst_107 [0] : vector<8x8xf32> to vector<8xf32>
    %376 = vector.shape_cast %375 : vector<8xf32> to vector<1x8xf32>
    %377 = vector.broadcast %376 : vector<1x8xf32> to vector<8x8xf32>
    %378 = arith.cmpf oeq, %374, %377 : vector<8x8xf32>
    %cst_108 = arith.constant 8.000000e+00 : f32
    %379 = vector.broadcast %cst_108 : f32 to vector<8x8xf32>
    %380 = arith.select %378, %276, %379 : vector<8x8xi1>, vector<8x8xf32>
    %cst_109 = arith.constant dense<0x7F800000> : vector<8xf32>
    %381 = vector.multi_reduction <minimumf>, %380, %cst_109 [0] : vector<8x8xf32> to vector<8xf32>
    %382 = vector.shape_cast %381 : vector<8xf32> to vector<1x8xf32>
    %383 = arith.addf %376, %292 : vector<1x8xf32>
    %384 = vector.broadcast %383 : vector<1x8xf32> to vector<8x8xf32>
    %385 = arith.mulf %384, %281 : vector<8x8xf32>
    %cst_110 = arith.constant dense<0.000000e+00> : vector<8xf32>
    %386 = vector.multi_reduction <add>, %385, %cst_110 [1] : vector<8x8xf32> to vector<8xf32>
    %387 = vector.shape_cast %386 : vector<8xf32> to vector<8x1xf32>
    %388 = vector.broadcast %387 : vector<8x1xf32> to vector<8x8xf32>
    %389 = arith.addf %388, %285 : vector<8x8xf32>
    %cst_111 = arith.constant dense<0xFF800000> : vector<8xf32>
    %390 = vector.multi_reduction <maximumf>, %389, %cst_111 [0] : vector<8x8xf32> to vector<8xf32>
    %391 = vector.shape_cast %390 : vector<8xf32> to vector<1x8xf32>
    %392 = vector.broadcast %391 : vector<1x8xf32> to vector<8x8xf32>
    %393 = arith.cmpf oeq, %389, %392 : vector<8x8xf32>
    %cst_112 = arith.constant 8.000000e+00 : f32
    %394 = vector.broadcast %cst_112 : f32 to vector<8x8xf32>
    %395 = arith.select %393, %276, %394 : vector<8x8xi1>, vector<8x8xf32>
    %cst_113 = arith.constant dense<0x7F800000> : vector<8xf32>
    %396 = vector.multi_reduction <minimumf>, %395, %cst_113 [0] : vector<8x8xf32> to vector<8xf32>
    %397 = vector.shape_cast %396 : vector<8xf32> to vector<1x8xf32>
    %398 = arith.addf %391, %293 : vector<1x8xf32>
    %cst_114 = arith.constant dense<0xFF800000> : vector<1xf32>
    %399 = vector.multi_reduction <maximumf>, %398, %cst_114 [1] : vector<1x8xf32> to vector<1xf32>
    %400 = vector.shape_cast %399 : vector<1xf32> to vector<1x1xf32>
    %401 = vector.broadcast %400 : vector<1x1xf32> to vector<1x8xf32>
    %402 = arith.cmpf oeq, %398, %401 : vector<1x8xf32>
    %cst_115 = arith.constant 8.000000e+00 : f32
    %403 = vector.broadcast %cst_115 : f32 to vector<1x8xf32>
    %404 = arith.select %402, %274, %403 : vector<1x8xi1>, vector<1x8xf32>
    %cst_116 = arith.constant dense<0x7F800000> : vector<1xf32>
    %405 = vector.multi_reduction <minimumf>, %404, %cst_116 [1] : vector<1x8xf32> to vector<1xf32>
    %406 = vector.shape_cast %405 : vector<1xf32> to vector<1x1xf32>
    %c7_i32 = arith.constant 7 : i32
    %407 = vector.broadcast %c7_i32 : i32 to vector<1x8xi32>
    %408 = arith.cmpi eq, %282, %407 : vector<1x8xi32>
    %409 = arith.extui %408 : vector<1x8xi1> to vector<1x8xi32>
    %410 = arith.sitofp %409 : vector<1x8xi32> to vector<1x8xf32>
    %411 = vector.broadcast %406 : vector<1x1xf32> to vector<1x8xf32>
    %412 = arith.mulf %410, %411 : vector<1x8xf32>
    %413 = vector.broadcast %406 : vector<1x1xf32> to vector<1x8xf32>
    %414 = arith.cmpf oeq, %274, %413 : vector<1x8xf32>
    %415 = arith.extui %414 : vector<1x8xi1> to vector<1x8xi32>
    %416 = arith.sitofp %415 : vector<1x8xi32> to vector<1x8xf32>
    %417 = arith.mulf %397, %416 : vector<1x8xf32>
    %cst_117 = arith.constant dense<0.000000e+00> : vector<1xf32>
    %418 = vector.multi_reduction <add>, %417, %cst_117 [1] : vector<1x8xf32> to vector<1xf32>
    %419 = vector.shape_cast %418 : vector<1xf32> to vector<1x1xf32>
    %c6_i32 = arith.constant 6 : i32
    %420 = vector.broadcast %c6_i32 : i32 to vector<1x8xi32>
    %421 = arith.cmpi eq, %282, %420 : vector<1x8xi32>
    %422 = arith.extui %421 : vector<1x8xi1> to vector<1x8xi32>
    %423 = arith.sitofp %422 : vector<1x8xi32> to vector<1x8xf32>
    %424 = vector.broadcast %419 : vector<1x1xf32> to vector<1x8xf32>
    %425 = arith.mulf %423, %424 : vector<1x8xf32>
    %426 = arith.addf %412, %425 : vector<1x8xf32>
    %427 = vector.broadcast %419 : vector<1x1xf32> to vector<1x8xf32>
    %428 = arith.cmpf oeq, %274, %427 : vector<1x8xf32>
    %429 = arith.extui %428 : vector<1x8xi1> to vector<1x8xi32>
    %430 = arith.sitofp %429 : vector<1x8xi32> to vector<1x8xf32>
    %431 = arith.mulf %382, %430 : vector<1x8xf32>
    %cst_118 = arith.constant dense<0.000000e+00> : vector<1xf32>
    %432 = vector.multi_reduction <add>, %431, %cst_118 [1] : vector<1x8xf32> to vector<1xf32>
    %433 = vector.shape_cast %432 : vector<1xf32> to vector<1x1xf32>
    %c5_i32 = arith.constant 5 : i32
    %434 = vector.broadcast %c5_i32 : i32 to vector<1x8xi32>
    %435 = arith.cmpi eq, %282, %434 : vector<1x8xi32>
    %436 = arith.extui %435 : vector<1x8xi1> to vector<1x8xi32>
    %437 = arith.sitofp %436 : vector<1x8xi32> to vector<1x8xf32>
    %438 = vector.broadcast %433 : vector<1x1xf32> to vector<1x8xf32>
    %439 = arith.mulf %437, %438 : vector<1x8xf32>
    %440 = arith.addf %426, %439 : vector<1x8xf32>
    %441 = vector.broadcast %433 : vector<1x1xf32> to vector<1x8xf32>
    %442 = arith.cmpf oeq, %274, %441 : vector<1x8xf32>
    %443 = arith.extui %442 : vector<1x8xi1> to vector<1x8xi32>
    %444 = arith.sitofp %443 : vector<1x8xi32> to vector<1x8xf32>
    %445 = arith.mulf %367, %444 : vector<1x8xf32>
    %cst_119 = arith.constant dense<0.000000e+00> : vector<1xf32>
    %446 = vector.multi_reduction <add>, %445, %cst_119 [1] : vector<1x8xf32> to vector<1xf32>
    %447 = vector.shape_cast %446 : vector<1xf32> to vector<1x1xf32>
    %c4_i32 = arith.constant 4 : i32
    %448 = vector.broadcast %c4_i32 : i32 to vector<1x8xi32>
    %449 = arith.cmpi eq, %282, %448 : vector<1x8xi32>
    %450 = arith.extui %449 : vector<1x8xi1> to vector<1x8xi32>
    %451 = arith.sitofp %450 : vector<1x8xi32> to vector<1x8xf32>
    %452 = vector.broadcast %447 : vector<1x1xf32> to vector<1x8xf32>
    %453 = arith.mulf %451, %452 : vector<1x8xf32>
    %454 = arith.addf %440, %453 : vector<1x8xf32>
    %455 = vector.broadcast %447 : vector<1x1xf32> to vector<1x8xf32>
    %456 = arith.cmpf oeq, %274, %455 : vector<1x8xf32>
    %457 = arith.extui %456 : vector<1x8xi1> to vector<1x8xi32>
    %458 = arith.sitofp %457 : vector<1x8xi32> to vector<1x8xf32>
    %459 = arith.mulf %352, %458 : vector<1x8xf32>
    %cst_120 = arith.constant dense<0.000000e+00> : vector<1xf32>
    %460 = vector.multi_reduction <add>, %459, %cst_120 [1] : vector<1x8xf32> to vector<1xf32>
    %461 = vector.shape_cast %460 : vector<1xf32> to vector<1x1xf32>
    %c3_i32 = arith.constant 3 : i32
    %462 = vector.broadcast %c3_i32 : i32 to vector<1x8xi32>
    %463 = arith.cmpi eq, %282, %462 : vector<1x8xi32>
    %464 = arith.extui %463 : vector<1x8xi1> to vector<1x8xi32>
    %465 = arith.sitofp %464 : vector<1x8xi32> to vector<1x8xf32>
    %466 = vector.broadcast %461 : vector<1x1xf32> to vector<1x8xf32>
    %467 = arith.mulf %465, %466 : vector<1x8xf32>
    %468 = arith.addf %454, %467 : vector<1x8xf32>
    %469 = vector.broadcast %461 : vector<1x1xf32> to vector<1x8xf32>
    %470 = arith.cmpf oeq, %274, %469 : vector<1x8xf32>
    %471 = arith.extui %470 : vector<1x8xi1> to vector<1x8xi32>
    %472 = arith.sitofp %471 : vector<1x8xi32> to vector<1x8xf32>
    %473 = arith.mulf %337, %472 : vector<1x8xf32>
    %cst_121 = arith.constant dense<0.000000e+00> : vector<1xf32>
    %474 = vector.multi_reduction <add>, %473, %cst_121 [1] : vector<1x8xf32> to vector<1xf32>
    %475 = vector.shape_cast %474 : vector<1xf32> to vector<1x1xf32>
    %c2_i32 = arith.constant 2 : i32
    %476 = vector.broadcast %c2_i32 : i32 to vector<1x8xi32>
    %477 = arith.cmpi eq, %282, %476 : vector<1x8xi32>
    %478 = arith.extui %477 : vector<1x8xi1> to vector<1x8xi32>
    %479 = arith.sitofp %478 : vector<1x8xi32> to vector<1x8xf32>
    %480 = vector.broadcast %475 : vector<1x1xf32> to vector<1x8xf32>
    %481 = arith.mulf %479, %480 : vector<1x8xf32>
    %482 = arith.addf %468, %481 : vector<1x8xf32>
    %483 = vector.broadcast %475 : vector<1x1xf32> to vector<1x8xf32>
    %484 = arith.cmpf oeq, %274, %483 : vector<1x8xf32>
    %485 = arith.extui %484 : vector<1x8xi1> to vector<1x8xi32>
    %486 = arith.sitofp %485 : vector<1x8xi32> to vector<1x8xf32>
    %487 = arith.mulf %322, %486 : vector<1x8xf32>
    %cst_122 = arith.constant dense<0.000000e+00> : vector<1xf32>
    %488 = vector.multi_reduction <add>, %487, %cst_122 [1] : vector<1x8xf32> to vector<1xf32>
    %489 = vector.shape_cast %488 : vector<1xf32> to vector<1x1xf32>
    %c1_i32 = arith.constant 1 : i32
    %490 = vector.broadcast %c1_i32 : i32 to vector<1x8xi32>
    %491 = arith.cmpi eq, %282, %490 : vector<1x8xi32>
    %492 = arith.extui %491 : vector<1x8xi1> to vector<1x8xi32>
    %493 = arith.sitofp %492 : vector<1x8xi32> to vector<1x8xf32>
    %494 = vector.broadcast %489 : vector<1x1xf32> to vector<1x8xf32>
    %495 = arith.mulf %493, %494 : vector<1x8xf32>
    %496 = arith.addf %482, %495 : vector<1x8xf32>
    %497 = vector.broadcast %489 : vector<1x1xf32> to vector<1x8xf32>
    %498 = arith.cmpf oeq, %274, %497 : vector<1x8xf32>
    %499 = arith.extui %498 : vector<1x8xi1> to vector<1x8xi32>
    %500 = arith.sitofp %499 : vector<1x8xi32> to vector<1x8xf32>
    %501 = arith.mulf %307, %500 : vector<1x8xf32>
    %cst_123 = arith.constant dense<0.000000e+00> : vector<1xf32>
    %502 = vector.multi_reduction <add>, %501, %cst_123 [1] : vector<1x8xf32> to vector<1xf32>
    %503 = vector.shape_cast %502 : vector<1xf32> to vector<1x1xf32>
    %c0_i32 = arith.constant 0 : i32
    %504 = vector.broadcast %c0_i32 : i32 to vector<1x8xi32>
    %505 = arith.cmpi eq, %282, %504 : vector<1x8xi32>
    %506 = arith.extui %505 : vector<1x8xi1> to vector<1x8xi32>
    %507 = arith.sitofp %506 : vector<1x8xi32> to vector<1x8xf32>
    %508 = vector.broadcast %503 : vector<1x1xf32> to vector<1x8xf32>
    %509 = arith.mulf %507, %508 : vector<1x8xf32>
    %510 = arith.addf %496, %509 : vector<1x8xf32>
    %c0_i32_124 = arith.constant 0 : i32
    %511 = vector.broadcast %c0_i32_124 : i32 to vector<6x1xi32>
    %512 = arith.cmpi eq, %283, %511 : vector<6x1xi32>
    %513 = arith.extui %512 : vector<6x1xi1> to vector<6x1xi32>
    %514 = arith.sitofp %513 : vector<6x1xi32> to vector<6x1xf32>
    %515 = vector.broadcast %514 : vector<6x1xf32> to vector<6x8xf32>
    %516 = vector.broadcast %510 : vector<1x8xf32> to vector<6x8xf32>
    %517 = arith.mulf %515, %516 : vector<6x8xf32>
    %518 = arith.addf %284, %517 : vector<6x8xf32>
    %519 = vector.extract_strided_slice %270 {offsets = [1, 0], sizes = [1, 8], strides = [1, 1]} : vector<16x24xf32> to vector<1x8xf32>
    %520 = vector.extract_strided_slice %270 {offsets = [3, 0], sizes = [1, 8], strides = [1, 1]} : vector<16x24xf32> to vector<1x8xf32>
    %521 = vector.extract_strided_slice %270 {offsets = [5, 0], sizes = [1, 8], strides = [1, 1]} : vector<16x24xf32> to vector<1x8xf32>
    %522 = vector.extract_strided_slice %270 {offsets = [7, 0], sizes = [1, 8], strides = [1, 1]} : vector<16x24xf32> to vector<1x8xf32>
    %523 = vector.extract_strided_slice %270 {offsets = [9, 0], sizes = [1, 8], strides = [1, 1]} : vector<16x24xf32> to vector<1x8xf32>
    %524 = vector.extract_strided_slice %270 {offsets = [11, 0], sizes = [1, 8], strides = [1, 1]} : vector<16x24xf32> to vector<1x8xf32>
    %525 = vector.extract_strided_slice %270 {offsets = [13, 0], sizes = [1, 8], strides = [1, 1]} : vector<16x24xf32> to vector<1x8xf32>
    %526 = vector.extract_strided_slice %270 {offsets = [15, 0], sizes = [1, 8], strides = [1, 1]} : vector<16x24xf32> to vector<1x8xf32>
    %527 = vector.broadcast %519 : vector<1x8xf32> to vector<8x8xf32>
    %528 = arith.mulf %527, %281 : vector<8x8xf32>
    %cst_125 = arith.constant dense<0.000000e+00> : vector<8xf32>
    %529 = vector.multi_reduction <add>, %528, %cst_125 [1] : vector<8x8xf32> to vector<8xf32>
    %530 = vector.shape_cast %529 : vector<8xf32> to vector<8x1xf32>
    %531 = vector.broadcast %530 : vector<8x1xf32> to vector<8x8xf32>
    %532 = arith.addf %531, %285 : vector<8x8xf32>
    %cst_126 = arith.constant dense<0xFF800000> : vector<8xf32>
    %533 = vector.multi_reduction <maximumf>, %532, %cst_126 [0] : vector<8x8xf32> to vector<8xf32>
    %534 = vector.shape_cast %533 : vector<8xf32> to vector<1x8xf32>
    %535 = vector.broadcast %534 : vector<1x8xf32> to vector<8x8xf32>
    %536 = arith.cmpf oeq, %532, %535 : vector<8x8xf32>
    %cst_127 = arith.constant 8.000000e+00 : f32
    %537 = vector.broadcast %cst_127 : f32 to vector<8x8xf32>
    %538 = arith.select %536, %276, %537 : vector<8x8xi1>, vector<8x8xf32>
    %cst_128 = arith.constant dense<0x7F800000> : vector<8xf32>
    %539 = vector.multi_reduction <minimumf>, %538, %cst_128 [0] : vector<8x8xf32> to vector<8xf32>
    %540 = vector.shape_cast %539 : vector<8xf32> to vector<1x8xf32>
    %541 = arith.addf %534, %520 : vector<1x8xf32>
    %542 = vector.broadcast %541 : vector<1x8xf32> to vector<8x8xf32>
    %543 = arith.mulf %542, %281 : vector<8x8xf32>
    %cst_129 = arith.constant dense<0.000000e+00> : vector<8xf32>
    %544 = vector.multi_reduction <add>, %543, %cst_129 [1] : vector<8x8xf32> to vector<8xf32>
    %545 = vector.shape_cast %544 : vector<8xf32> to vector<8x1xf32>
    %546 = vector.broadcast %545 : vector<8x1xf32> to vector<8x8xf32>
    %547 = arith.addf %546, %285 : vector<8x8xf32>
    %cst_130 = arith.constant dense<0xFF800000> : vector<8xf32>
    %548 = vector.multi_reduction <maximumf>, %547, %cst_130 [0] : vector<8x8xf32> to vector<8xf32>
    %549 = vector.shape_cast %548 : vector<8xf32> to vector<1x8xf32>
    %550 = vector.broadcast %549 : vector<1x8xf32> to vector<8x8xf32>
    %551 = arith.cmpf oeq, %547, %550 : vector<8x8xf32>
    %cst_131 = arith.constant 8.000000e+00 : f32
    %552 = vector.broadcast %cst_131 : f32 to vector<8x8xf32>
    %553 = arith.select %551, %276, %552 : vector<8x8xi1>, vector<8x8xf32>
    %cst_132 = arith.constant dense<0x7F800000> : vector<8xf32>
    %554 = vector.multi_reduction <minimumf>, %553, %cst_132 [0] : vector<8x8xf32> to vector<8xf32>
    %555 = vector.shape_cast %554 : vector<8xf32> to vector<1x8xf32>
    %556 = arith.addf %549, %521 : vector<1x8xf32>
    %557 = vector.broadcast %556 : vector<1x8xf32> to vector<8x8xf32>
    %558 = arith.mulf %557, %281 : vector<8x8xf32>
    %cst_133 = arith.constant dense<0.000000e+00> : vector<8xf32>
    %559 = vector.multi_reduction <add>, %558, %cst_133 [1] : vector<8x8xf32> to vector<8xf32>
    %560 = vector.shape_cast %559 : vector<8xf32> to vector<8x1xf32>
    %561 = vector.broadcast %560 : vector<8x1xf32> to vector<8x8xf32>
    %562 = arith.addf %561, %285 : vector<8x8xf32>
    %cst_134 = arith.constant dense<0xFF800000> : vector<8xf32>
    %563 = vector.multi_reduction <maximumf>, %562, %cst_134 [0] : vector<8x8xf32> to vector<8xf32>
    %564 = vector.shape_cast %563 : vector<8xf32> to vector<1x8xf32>
    %565 = vector.broadcast %564 : vector<1x8xf32> to vector<8x8xf32>
    %566 = arith.cmpf oeq, %562, %565 : vector<8x8xf32>
    %cst_135 = arith.constant 8.000000e+00 : f32
    %567 = vector.broadcast %cst_135 : f32 to vector<8x8xf32>
    %568 = arith.select %566, %276, %567 : vector<8x8xi1>, vector<8x8xf32>
    %cst_136 = arith.constant dense<0x7F800000> : vector<8xf32>
    %569 = vector.multi_reduction <minimumf>, %568, %cst_136 [0] : vector<8x8xf32> to vector<8xf32>
    %570 = vector.shape_cast %569 : vector<8xf32> to vector<1x8xf32>
    %571 = arith.addf %564, %522 : vector<1x8xf32>
    %572 = vector.broadcast %571 : vector<1x8xf32> to vector<8x8xf32>
    %573 = arith.mulf %572, %281 : vector<8x8xf32>
    %cst_137 = arith.constant dense<0.000000e+00> : vector<8xf32>
    %574 = vector.multi_reduction <add>, %573, %cst_137 [1] : vector<8x8xf32> to vector<8xf32>
    %575 = vector.shape_cast %574 : vector<8xf32> to vector<8x1xf32>
    %576 = vector.broadcast %575 : vector<8x1xf32> to vector<8x8xf32>
    %577 = arith.addf %576, %285 : vector<8x8xf32>
    %cst_138 = arith.constant dense<0xFF800000> : vector<8xf32>
    %578 = vector.multi_reduction <maximumf>, %577, %cst_138 [0] : vector<8x8xf32> to vector<8xf32>
    %579 = vector.shape_cast %578 : vector<8xf32> to vector<1x8xf32>
    %580 = vector.broadcast %579 : vector<1x8xf32> to vector<8x8xf32>
    %581 = arith.cmpf oeq, %577, %580 : vector<8x8xf32>
    %cst_139 = arith.constant 8.000000e+00 : f32
    %582 = vector.broadcast %cst_139 : f32 to vector<8x8xf32>
    %583 = arith.select %581, %276, %582 : vector<8x8xi1>, vector<8x8xf32>
    %cst_140 = arith.constant dense<0x7F800000> : vector<8xf32>
    %584 = vector.multi_reduction <minimumf>, %583, %cst_140 [0] : vector<8x8xf32> to vector<8xf32>
    %585 = vector.shape_cast %584 : vector<8xf32> to vector<1x8xf32>
    %586 = arith.addf %579, %523 : vector<1x8xf32>
    %587 = vector.broadcast %586 : vector<1x8xf32> to vector<8x8xf32>
    %588 = arith.mulf %587, %281 : vector<8x8xf32>
    %cst_141 = arith.constant dense<0.000000e+00> : vector<8xf32>
    %589 = vector.multi_reduction <add>, %588, %cst_141 [1] : vector<8x8xf32> to vector<8xf32>
    %590 = vector.shape_cast %589 : vector<8xf32> to vector<8x1xf32>
    %591 = vector.broadcast %590 : vector<8x1xf32> to vector<8x8xf32>
    %592 = arith.addf %591, %285 : vector<8x8xf32>
    %cst_142 = arith.constant dense<0xFF800000> : vector<8xf32>
    %593 = vector.multi_reduction <maximumf>, %592, %cst_142 [0] : vector<8x8xf32> to vector<8xf32>
    %594 = vector.shape_cast %593 : vector<8xf32> to vector<1x8xf32>
    %595 = vector.broadcast %594 : vector<1x8xf32> to vector<8x8xf32>
    %596 = arith.cmpf oeq, %592, %595 : vector<8x8xf32>
    %cst_143 = arith.constant 8.000000e+00 : f32
    %597 = vector.broadcast %cst_143 : f32 to vector<8x8xf32>
    %598 = arith.select %596, %276, %597 : vector<8x8xi1>, vector<8x8xf32>
    %cst_144 = arith.constant dense<0x7F800000> : vector<8xf32>
    %599 = vector.multi_reduction <minimumf>, %598, %cst_144 [0] : vector<8x8xf32> to vector<8xf32>
    %600 = vector.shape_cast %599 : vector<8xf32> to vector<1x8xf32>
    %601 = arith.addf %594, %524 : vector<1x8xf32>
    %602 = vector.broadcast %601 : vector<1x8xf32> to vector<8x8xf32>
    %603 = arith.mulf %602, %281 : vector<8x8xf32>
    %cst_145 = arith.constant dense<0.000000e+00> : vector<8xf32>
    %604 = vector.multi_reduction <add>, %603, %cst_145 [1] : vector<8x8xf32> to vector<8xf32>
    %605 = vector.shape_cast %604 : vector<8xf32> to vector<8x1xf32>
    %606 = vector.broadcast %605 : vector<8x1xf32> to vector<8x8xf32>
    %607 = arith.addf %606, %285 : vector<8x8xf32>
    %cst_146 = arith.constant dense<0xFF800000> : vector<8xf32>
    %608 = vector.multi_reduction <maximumf>, %607, %cst_146 [0] : vector<8x8xf32> to vector<8xf32>
    %609 = vector.shape_cast %608 : vector<8xf32> to vector<1x8xf32>
    %610 = vector.broadcast %609 : vector<1x8xf32> to vector<8x8xf32>
    %611 = arith.cmpf oeq, %607, %610 : vector<8x8xf32>
    %cst_147 = arith.constant 8.000000e+00 : f32
    %612 = vector.broadcast %cst_147 : f32 to vector<8x8xf32>
    %613 = arith.select %611, %276, %612 : vector<8x8xi1>, vector<8x8xf32>
    %cst_148 = arith.constant dense<0x7F800000> : vector<8xf32>
    %614 = vector.multi_reduction <minimumf>, %613, %cst_148 [0] : vector<8x8xf32> to vector<8xf32>
    %615 = vector.shape_cast %614 : vector<8xf32> to vector<1x8xf32>
    %616 = arith.addf %609, %525 : vector<1x8xf32>
    %617 = vector.broadcast %616 : vector<1x8xf32> to vector<8x8xf32>
    %618 = arith.mulf %617, %281 : vector<8x8xf32>
    %cst_149 = arith.constant dense<0.000000e+00> : vector<8xf32>
    %619 = vector.multi_reduction <add>, %618, %cst_149 [1] : vector<8x8xf32> to vector<8xf32>
    %620 = vector.shape_cast %619 : vector<8xf32> to vector<8x1xf32>
    %621 = vector.broadcast %620 : vector<8x1xf32> to vector<8x8xf32>
    %622 = arith.addf %621, %285 : vector<8x8xf32>
    %cst_150 = arith.constant dense<0xFF800000> : vector<8xf32>
    %623 = vector.multi_reduction <maximumf>, %622, %cst_150 [0] : vector<8x8xf32> to vector<8xf32>
    %624 = vector.shape_cast %623 : vector<8xf32> to vector<1x8xf32>
    %625 = vector.broadcast %624 : vector<1x8xf32> to vector<8x8xf32>
    %626 = arith.cmpf oeq, %622, %625 : vector<8x8xf32>
    %cst_151 = arith.constant 8.000000e+00 : f32
    %627 = vector.broadcast %cst_151 : f32 to vector<8x8xf32>
    %628 = arith.select %626, %276, %627 : vector<8x8xi1>, vector<8x8xf32>
    %cst_152 = arith.constant dense<0x7F800000> : vector<8xf32>
    %629 = vector.multi_reduction <minimumf>, %628, %cst_152 [0] : vector<8x8xf32> to vector<8xf32>
    %630 = vector.shape_cast %629 : vector<8xf32> to vector<1x8xf32>
    %631 = arith.addf %624, %526 : vector<1x8xf32>
    %cst_153 = arith.constant dense<0xFF800000> : vector<1xf32>
    %632 = vector.multi_reduction <maximumf>, %631, %cst_153 [1] : vector<1x8xf32> to vector<1xf32>
    %633 = vector.shape_cast %632 : vector<1xf32> to vector<1x1xf32>
    %634 = vector.broadcast %633 : vector<1x1xf32> to vector<1x8xf32>
    %635 = arith.cmpf oeq, %631, %634 : vector<1x8xf32>
    %cst_154 = arith.constant 8.000000e+00 : f32
    %636 = vector.broadcast %cst_154 : f32 to vector<1x8xf32>
    %637 = arith.select %635, %274, %636 : vector<1x8xi1>, vector<1x8xf32>
    %cst_155 = arith.constant dense<0x7F800000> : vector<1xf32>
    %638 = vector.multi_reduction <minimumf>, %637, %cst_155 [1] : vector<1x8xf32> to vector<1xf32>
    %639 = vector.shape_cast %638 : vector<1xf32> to vector<1x1xf32>
    %c7_i32_156 = arith.constant 7 : i32
    %640 = vector.broadcast %c7_i32_156 : i32 to vector<1x8xi32>
    %641 = arith.cmpi eq, %282, %640 : vector<1x8xi32>
    %642 = arith.extui %641 : vector<1x8xi1> to vector<1x8xi32>
    %643 = arith.sitofp %642 : vector<1x8xi32> to vector<1x8xf32>
    %644 = vector.broadcast %639 : vector<1x1xf32> to vector<1x8xf32>
    %645 = arith.mulf %643, %644 : vector<1x8xf32>
    %646 = vector.broadcast %639 : vector<1x1xf32> to vector<1x8xf32>
    %647 = arith.cmpf oeq, %274, %646 : vector<1x8xf32>
    %648 = arith.extui %647 : vector<1x8xi1> to vector<1x8xi32>
    %649 = arith.sitofp %648 : vector<1x8xi32> to vector<1x8xf32>
    %650 = arith.mulf %630, %649 : vector<1x8xf32>
    %cst_157 = arith.constant dense<0.000000e+00> : vector<1xf32>
    %651 = vector.multi_reduction <add>, %650, %cst_157 [1] : vector<1x8xf32> to vector<1xf32>
    %652 = vector.shape_cast %651 : vector<1xf32> to vector<1x1xf32>
    %c6_i32_158 = arith.constant 6 : i32
    %653 = vector.broadcast %c6_i32_158 : i32 to vector<1x8xi32>
    %654 = arith.cmpi eq, %282, %653 : vector<1x8xi32>
    %655 = arith.extui %654 : vector<1x8xi1> to vector<1x8xi32>
    %656 = arith.sitofp %655 : vector<1x8xi32> to vector<1x8xf32>
    %657 = vector.broadcast %652 : vector<1x1xf32> to vector<1x8xf32>
    %658 = arith.mulf %656, %657 : vector<1x8xf32>
    %659 = arith.addf %645, %658 : vector<1x8xf32>
    %660 = vector.broadcast %652 : vector<1x1xf32> to vector<1x8xf32>
    %661 = arith.cmpf oeq, %274, %660 : vector<1x8xf32>
    %662 = arith.extui %661 : vector<1x8xi1> to vector<1x8xi32>
    %663 = arith.sitofp %662 : vector<1x8xi32> to vector<1x8xf32>
    %664 = arith.mulf %615, %663 : vector<1x8xf32>
    %cst_159 = arith.constant dense<0.000000e+00> : vector<1xf32>
    %665 = vector.multi_reduction <add>, %664, %cst_159 [1] : vector<1x8xf32> to vector<1xf32>
    %666 = vector.shape_cast %665 : vector<1xf32> to vector<1x1xf32>
    %c5_i32_160 = arith.constant 5 : i32
    %667 = vector.broadcast %c5_i32_160 : i32 to vector<1x8xi32>
    %668 = arith.cmpi eq, %282, %667 : vector<1x8xi32>
    %669 = arith.extui %668 : vector<1x8xi1> to vector<1x8xi32>
    %670 = arith.sitofp %669 : vector<1x8xi32> to vector<1x8xf32>
    %671 = vector.broadcast %666 : vector<1x1xf32> to vector<1x8xf32>
    %672 = arith.mulf %670, %671 : vector<1x8xf32>
    %673 = arith.addf %659, %672 : vector<1x8xf32>
    %674 = vector.broadcast %666 : vector<1x1xf32> to vector<1x8xf32>
    %675 = arith.cmpf oeq, %274, %674 : vector<1x8xf32>
    %676 = arith.extui %675 : vector<1x8xi1> to vector<1x8xi32>
    %677 = arith.sitofp %676 : vector<1x8xi32> to vector<1x8xf32>
    %678 = arith.mulf %600, %677 : vector<1x8xf32>
    %cst_161 = arith.constant dense<0.000000e+00> : vector<1xf32>
    %679 = vector.multi_reduction <add>, %678, %cst_161 [1] : vector<1x8xf32> to vector<1xf32>
    %680 = vector.shape_cast %679 : vector<1xf32> to vector<1x1xf32>
    %c4_i32_162 = arith.constant 4 : i32
    %681 = vector.broadcast %c4_i32_162 : i32 to vector<1x8xi32>
    %682 = arith.cmpi eq, %282, %681 : vector<1x8xi32>
    %683 = arith.extui %682 : vector<1x8xi1> to vector<1x8xi32>
    %684 = arith.sitofp %683 : vector<1x8xi32> to vector<1x8xf32>
    %685 = vector.broadcast %680 : vector<1x1xf32> to vector<1x8xf32>
    %686 = arith.mulf %684, %685 : vector<1x8xf32>
    %687 = arith.addf %673, %686 : vector<1x8xf32>
    %688 = vector.broadcast %680 : vector<1x1xf32> to vector<1x8xf32>
    %689 = arith.cmpf oeq, %274, %688 : vector<1x8xf32>
    %690 = arith.extui %689 : vector<1x8xi1> to vector<1x8xi32>
    %691 = arith.sitofp %690 : vector<1x8xi32> to vector<1x8xf32>
    %692 = arith.mulf %585, %691 : vector<1x8xf32>
    %cst_163 = arith.constant dense<0.000000e+00> : vector<1xf32>
    %693 = vector.multi_reduction <add>, %692, %cst_163 [1] : vector<1x8xf32> to vector<1xf32>
    %694 = vector.shape_cast %693 : vector<1xf32> to vector<1x1xf32>
    %c3_i32_164 = arith.constant 3 : i32
    %695 = vector.broadcast %c3_i32_164 : i32 to vector<1x8xi32>
    %696 = arith.cmpi eq, %282, %695 : vector<1x8xi32>
    %697 = arith.extui %696 : vector<1x8xi1> to vector<1x8xi32>
    %698 = arith.sitofp %697 : vector<1x8xi32> to vector<1x8xf32>
    %699 = vector.broadcast %694 : vector<1x1xf32> to vector<1x8xf32>
    %700 = arith.mulf %698, %699 : vector<1x8xf32>
    %701 = arith.addf %687, %700 : vector<1x8xf32>
    %702 = vector.broadcast %694 : vector<1x1xf32> to vector<1x8xf32>
    %703 = arith.cmpf oeq, %274, %702 : vector<1x8xf32>
    %704 = arith.extui %703 : vector<1x8xi1> to vector<1x8xi32>
    %705 = arith.sitofp %704 : vector<1x8xi32> to vector<1x8xf32>
    %706 = arith.mulf %570, %705 : vector<1x8xf32>
    %cst_165 = arith.constant dense<0.000000e+00> : vector<1xf32>
    %707 = vector.multi_reduction <add>, %706, %cst_165 [1] : vector<1x8xf32> to vector<1xf32>
    %708 = vector.shape_cast %707 : vector<1xf32> to vector<1x1xf32>
    %c2_i32_166 = arith.constant 2 : i32
    %709 = vector.broadcast %c2_i32_166 : i32 to vector<1x8xi32>
    %710 = arith.cmpi eq, %282, %709 : vector<1x8xi32>
    %711 = arith.extui %710 : vector<1x8xi1> to vector<1x8xi32>
    %712 = arith.sitofp %711 : vector<1x8xi32> to vector<1x8xf32>
    %713 = vector.broadcast %708 : vector<1x1xf32> to vector<1x8xf32>
    %714 = arith.mulf %712, %713 : vector<1x8xf32>
    %715 = arith.addf %701, %714 : vector<1x8xf32>
    %716 = vector.broadcast %708 : vector<1x1xf32> to vector<1x8xf32>
    %717 = arith.cmpf oeq, %274, %716 : vector<1x8xf32>
    %718 = arith.extui %717 : vector<1x8xi1> to vector<1x8xi32>
    %719 = arith.sitofp %718 : vector<1x8xi32> to vector<1x8xf32>
    %720 = arith.mulf %555, %719 : vector<1x8xf32>
    %cst_167 = arith.constant dense<0.000000e+00> : vector<1xf32>
    %721 = vector.multi_reduction <add>, %720, %cst_167 [1] : vector<1x8xf32> to vector<1xf32>
    %722 = vector.shape_cast %721 : vector<1xf32> to vector<1x1xf32>
    %c1_i32_168 = arith.constant 1 : i32
    %723 = vector.broadcast %c1_i32_168 : i32 to vector<1x8xi32>
    %724 = arith.cmpi eq, %282, %723 : vector<1x8xi32>
    %725 = arith.extui %724 : vector<1x8xi1> to vector<1x8xi32>
    %726 = arith.sitofp %725 : vector<1x8xi32> to vector<1x8xf32>
    %727 = vector.broadcast %722 : vector<1x1xf32> to vector<1x8xf32>
    %728 = arith.mulf %726, %727 : vector<1x8xf32>
    %729 = arith.addf %715, %728 : vector<1x8xf32>
    %730 = vector.broadcast %722 : vector<1x1xf32> to vector<1x8xf32>
    %731 = arith.cmpf oeq, %274, %730 : vector<1x8xf32>
    %732 = arith.extui %731 : vector<1x8xi1> to vector<1x8xi32>
    %733 = arith.sitofp %732 : vector<1x8xi32> to vector<1x8xf32>
    %734 = arith.mulf %540, %733 : vector<1x8xf32>
    %cst_169 = arith.constant dense<0.000000e+00> : vector<1xf32>
    %735 = vector.multi_reduction <add>, %734, %cst_169 [1] : vector<1x8xf32> to vector<1xf32>
    %736 = vector.shape_cast %735 : vector<1xf32> to vector<1x1xf32>
    %c0_i32_170 = arith.constant 0 : i32
    %737 = vector.broadcast %c0_i32_170 : i32 to vector<1x8xi32>
    %738 = arith.cmpi eq, %282, %737 : vector<1x8xi32>
    %739 = arith.extui %738 : vector<1x8xi1> to vector<1x8xi32>
    %740 = arith.sitofp %739 : vector<1x8xi32> to vector<1x8xf32>
    %741 = vector.broadcast %736 : vector<1x1xf32> to vector<1x8xf32>
    %742 = arith.mulf %740, %741 : vector<1x8xf32>
    %743 = arith.addf %729, %742 : vector<1x8xf32>
    %c1_i32_171 = arith.constant 1 : i32
    %744 = vector.broadcast %c1_i32_171 : i32 to vector<6x1xi32>
    %745 = arith.cmpi eq, %283, %744 : vector<6x1xi32>
    %746 = arith.extui %745 : vector<6x1xi1> to vector<6x1xi32>
    %747 = arith.sitofp %746 : vector<6x1xi32> to vector<6x1xf32>
    %748 = vector.broadcast %747 : vector<6x1xf32> to vector<6x8xf32>
    %749 = vector.broadcast %743 : vector<1x8xf32> to vector<6x8xf32>
    %750 = arith.mulf %748, %749 : vector<6x8xf32>
    %751 = arith.addf %518, %750 : vector<6x8xf32>
    %752 = vector.extract_strided_slice %272 {offsets = [8, 0], sizes = [8, 8], strides = [1, 1]} : vector<24x8xf32> to vector<8x8xf32>
    %753 = vector.extract_strided_slice %270 {offsets = [0, 8], sizes = [1, 8], strides = [1, 1]} : vector<16x24xf32> to vector<1x8xf32>
    %754 = vector.extract_strided_slice %270 {offsets = [2, 8], sizes = [1, 8], strides = [1, 1]} : vector<16x24xf32> to vector<1x8xf32>
    %755 = vector.extract_strided_slice %270 {offsets = [4, 8], sizes = [1, 8], strides = [1, 1]} : vector<16x24xf32> to vector<1x8xf32>
    %756 = vector.extract_strided_slice %270 {offsets = [6, 8], sizes = [1, 8], strides = [1, 1]} : vector<16x24xf32> to vector<1x8xf32>
    %757 = vector.extract_strided_slice %270 {offsets = [8, 8], sizes = [1, 8], strides = [1, 1]} : vector<16x24xf32> to vector<1x8xf32>
    %758 = vector.extract_strided_slice %270 {offsets = [10, 8], sizes = [1, 8], strides = [1, 1]} : vector<16x24xf32> to vector<1x8xf32>
    %759 = vector.extract_strided_slice %270 {offsets = [12, 8], sizes = [1, 8], strides = [1, 1]} : vector<16x24xf32> to vector<1x8xf32>
    %760 = vector.extract_strided_slice %270 {offsets = [14, 8], sizes = [1, 8], strides = [1, 1]} : vector<16x24xf32> to vector<1x8xf32>
    %761 = vector.broadcast %753 : vector<1x8xf32> to vector<8x8xf32>
    %762 = arith.mulf %761, %281 : vector<8x8xf32>
    %cst_172 = arith.constant dense<0.000000e+00> : vector<8xf32>
    %763 = vector.multi_reduction <add>, %762, %cst_172 [1] : vector<8x8xf32> to vector<8xf32>
    %764 = vector.shape_cast %763 : vector<8xf32> to vector<8x1xf32>
    %765 = vector.broadcast %764 : vector<8x1xf32> to vector<8x8xf32>
    %766 = arith.addf %765, %752 : vector<8x8xf32>
    %cst_173 = arith.constant dense<0xFF800000> : vector<8xf32>
    %767 = vector.multi_reduction <maximumf>, %766, %cst_173 [0] : vector<8x8xf32> to vector<8xf32>
    %768 = vector.shape_cast %767 : vector<8xf32> to vector<1x8xf32>
    %769 = vector.broadcast %768 : vector<1x8xf32> to vector<8x8xf32>
    %770 = arith.cmpf oeq, %766, %769 : vector<8x8xf32>
    %cst_174 = arith.constant 8.000000e+00 : f32
    %771 = vector.broadcast %cst_174 : f32 to vector<8x8xf32>
    %772 = arith.select %770, %276, %771 : vector<8x8xi1>, vector<8x8xf32>
    %cst_175 = arith.constant dense<0x7F800000> : vector<8xf32>
    %773 = vector.multi_reduction <minimumf>, %772, %cst_175 [0] : vector<8x8xf32> to vector<8xf32>
    %774 = vector.shape_cast %773 : vector<8xf32> to vector<1x8xf32>
    %775 = arith.addf %768, %754 : vector<1x8xf32>
    %776 = vector.broadcast %775 : vector<1x8xf32> to vector<8x8xf32>
    %777 = arith.mulf %776, %281 : vector<8x8xf32>
    %cst_176 = arith.constant dense<0.000000e+00> : vector<8xf32>
    %778 = vector.multi_reduction <add>, %777, %cst_176 [1] : vector<8x8xf32> to vector<8xf32>
    %779 = vector.shape_cast %778 : vector<8xf32> to vector<8x1xf32>
    %780 = vector.broadcast %779 : vector<8x1xf32> to vector<8x8xf32>
    %781 = arith.addf %780, %752 : vector<8x8xf32>
    %cst_177 = arith.constant dense<0xFF800000> : vector<8xf32>
    %782 = vector.multi_reduction <maximumf>, %781, %cst_177 [0] : vector<8x8xf32> to vector<8xf32>
    %783 = vector.shape_cast %782 : vector<8xf32> to vector<1x8xf32>
    %784 = vector.broadcast %783 : vector<1x8xf32> to vector<8x8xf32>
    %785 = arith.cmpf oeq, %781, %784 : vector<8x8xf32>
    %cst_178 = arith.constant 8.000000e+00 : f32
    %786 = vector.broadcast %cst_178 : f32 to vector<8x8xf32>
    %787 = arith.select %785, %276, %786 : vector<8x8xi1>, vector<8x8xf32>
    %cst_179 = arith.constant dense<0x7F800000> : vector<8xf32>
    %788 = vector.multi_reduction <minimumf>, %787, %cst_179 [0] : vector<8x8xf32> to vector<8xf32>
    %789 = vector.shape_cast %788 : vector<8xf32> to vector<1x8xf32>
    %790 = arith.addf %783, %755 : vector<1x8xf32>
    %791 = vector.broadcast %790 : vector<1x8xf32> to vector<8x8xf32>
    %792 = arith.mulf %791, %281 : vector<8x8xf32>
    %cst_180 = arith.constant dense<0.000000e+00> : vector<8xf32>
    %793 = vector.multi_reduction <add>, %792, %cst_180 [1] : vector<8x8xf32> to vector<8xf32>
    %794 = vector.shape_cast %793 : vector<8xf32> to vector<8x1xf32>
    %795 = vector.broadcast %794 : vector<8x1xf32> to vector<8x8xf32>
    %796 = arith.addf %795, %752 : vector<8x8xf32>
    %cst_181 = arith.constant dense<0xFF800000> : vector<8xf32>
    %797 = vector.multi_reduction <maximumf>, %796, %cst_181 [0] : vector<8x8xf32> to vector<8xf32>
    %798 = vector.shape_cast %797 : vector<8xf32> to vector<1x8xf32>
    %799 = vector.broadcast %798 : vector<1x8xf32> to vector<8x8xf32>
    %800 = arith.cmpf oeq, %796, %799 : vector<8x8xf32>
    %cst_182 = arith.constant 8.000000e+00 : f32
    %801 = vector.broadcast %cst_182 : f32 to vector<8x8xf32>
    %802 = arith.select %800, %276, %801 : vector<8x8xi1>, vector<8x8xf32>
    %cst_183 = arith.constant dense<0x7F800000> : vector<8xf32>
    %803 = vector.multi_reduction <minimumf>, %802, %cst_183 [0] : vector<8x8xf32> to vector<8xf32>
    %804 = vector.shape_cast %803 : vector<8xf32> to vector<1x8xf32>
    %805 = arith.addf %798, %756 : vector<1x8xf32>
    %806 = vector.broadcast %805 : vector<1x8xf32> to vector<8x8xf32>
    %807 = arith.mulf %806, %281 : vector<8x8xf32>
    %cst_184 = arith.constant dense<0.000000e+00> : vector<8xf32>
    %808 = vector.multi_reduction <add>, %807, %cst_184 [1] : vector<8x8xf32> to vector<8xf32>
    %809 = vector.shape_cast %808 : vector<8xf32> to vector<8x1xf32>
    %810 = vector.broadcast %809 : vector<8x1xf32> to vector<8x8xf32>
    %811 = arith.addf %810, %752 : vector<8x8xf32>
    %cst_185 = arith.constant dense<0xFF800000> : vector<8xf32>
    %812 = vector.multi_reduction <maximumf>, %811, %cst_185 [0] : vector<8x8xf32> to vector<8xf32>
    %813 = vector.shape_cast %812 : vector<8xf32> to vector<1x8xf32>
    %814 = vector.broadcast %813 : vector<1x8xf32> to vector<8x8xf32>
    %815 = arith.cmpf oeq, %811, %814 : vector<8x8xf32>
    %cst_186 = arith.constant 8.000000e+00 : f32
    %816 = vector.broadcast %cst_186 : f32 to vector<8x8xf32>
    %817 = arith.select %815, %276, %816 : vector<8x8xi1>, vector<8x8xf32>
    %cst_187 = arith.constant dense<0x7F800000> : vector<8xf32>
    %818 = vector.multi_reduction <minimumf>, %817, %cst_187 [0] : vector<8x8xf32> to vector<8xf32>
    %819 = vector.shape_cast %818 : vector<8xf32> to vector<1x8xf32>
    %820 = arith.addf %813, %757 : vector<1x8xf32>
    %821 = vector.broadcast %820 : vector<1x8xf32> to vector<8x8xf32>
    %822 = arith.mulf %821, %281 : vector<8x8xf32>
    %cst_188 = arith.constant dense<0.000000e+00> : vector<8xf32>
    %823 = vector.multi_reduction <add>, %822, %cst_188 [1] : vector<8x8xf32> to vector<8xf32>
    %824 = vector.shape_cast %823 : vector<8xf32> to vector<8x1xf32>
    %825 = vector.broadcast %824 : vector<8x1xf32> to vector<8x8xf32>
    %826 = arith.addf %825, %752 : vector<8x8xf32>
    %cst_189 = arith.constant dense<0xFF800000> : vector<8xf32>
    %827 = vector.multi_reduction <maximumf>, %826, %cst_189 [0] : vector<8x8xf32> to vector<8xf32>
    %828 = vector.shape_cast %827 : vector<8xf32> to vector<1x8xf32>
    %829 = vector.broadcast %828 : vector<1x8xf32> to vector<8x8xf32>
    %830 = arith.cmpf oeq, %826, %829 : vector<8x8xf32>
    %cst_190 = arith.constant 8.000000e+00 : f32
    %831 = vector.broadcast %cst_190 : f32 to vector<8x8xf32>
    %832 = arith.select %830, %276, %831 : vector<8x8xi1>, vector<8x8xf32>
    %cst_191 = arith.constant dense<0x7F800000> : vector<8xf32>
    %833 = vector.multi_reduction <minimumf>, %832, %cst_191 [0] : vector<8x8xf32> to vector<8xf32>
    %834 = vector.shape_cast %833 : vector<8xf32> to vector<1x8xf32>
    %835 = arith.addf %828, %758 : vector<1x8xf32>
    %836 = vector.broadcast %835 : vector<1x8xf32> to vector<8x8xf32>
    %837 = arith.mulf %836, %281 : vector<8x8xf32>
    %cst_192 = arith.constant dense<0.000000e+00> : vector<8xf32>
    %838 = vector.multi_reduction <add>, %837, %cst_192 [1] : vector<8x8xf32> to vector<8xf32>
    %839 = vector.shape_cast %838 : vector<8xf32> to vector<8x1xf32>
    %840 = vector.broadcast %839 : vector<8x1xf32> to vector<8x8xf32>
    %841 = arith.addf %840, %752 : vector<8x8xf32>
    %cst_193 = arith.constant dense<0xFF800000> : vector<8xf32>
    %842 = vector.multi_reduction <maximumf>, %841, %cst_193 [0] : vector<8x8xf32> to vector<8xf32>
    %843 = vector.shape_cast %842 : vector<8xf32> to vector<1x8xf32>
    %844 = vector.broadcast %843 : vector<1x8xf32> to vector<8x8xf32>
    %845 = arith.cmpf oeq, %841, %844 : vector<8x8xf32>
    %cst_194 = arith.constant 8.000000e+00 : f32
    %846 = vector.broadcast %cst_194 : f32 to vector<8x8xf32>
    %847 = arith.select %845, %276, %846 : vector<8x8xi1>, vector<8x8xf32>
    %cst_195 = arith.constant dense<0x7F800000> : vector<8xf32>
    %848 = vector.multi_reduction <minimumf>, %847, %cst_195 [0] : vector<8x8xf32> to vector<8xf32>
    %849 = vector.shape_cast %848 : vector<8xf32> to vector<1x8xf32>
    %850 = arith.addf %843, %759 : vector<1x8xf32>
    %851 = vector.broadcast %850 : vector<1x8xf32> to vector<8x8xf32>
    %852 = arith.mulf %851, %281 : vector<8x8xf32>
    %cst_196 = arith.constant dense<0.000000e+00> : vector<8xf32>
    %853 = vector.multi_reduction <add>, %852, %cst_196 [1] : vector<8x8xf32> to vector<8xf32>
    %854 = vector.shape_cast %853 : vector<8xf32> to vector<8x1xf32>
    %855 = vector.broadcast %854 : vector<8x1xf32> to vector<8x8xf32>
    %856 = arith.addf %855, %752 : vector<8x8xf32>
    %cst_197 = arith.constant dense<0xFF800000> : vector<8xf32>
    %857 = vector.multi_reduction <maximumf>, %856, %cst_197 [0] : vector<8x8xf32> to vector<8xf32>
    %858 = vector.shape_cast %857 : vector<8xf32> to vector<1x8xf32>
    %859 = vector.broadcast %858 : vector<1x8xf32> to vector<8x8xf32>
    %860 = arith.cmpf oeq, %856, %859 : vector<8x8xf32>
    %cst_198 = arith.constant 8.000000e+00 : f32
    %861 = vector.broadcast %cst_198 : f32 to vector<8x8xf32>
    %862 = arith.select %860, %276, %861 : vector<8x8xi1>, vector<8x8xf32>
    %cst_199 = arith.constant dense<0x7F800000> : vector<8xf32>
    %863 = vector.multi_reduction <minimumf>, %862, %cst_199 [0] : vector<8x8xf32> to vector<8xf32>
    %864 = vector.shape_cast %863 : vector<8xf32> to vector<1x8xf32>
    %865 = arith.addf %858, %760 : vector<1x8xf32>
    %cst_200 = arith.constant dense<0xFF800000> : vector<1xf32>
    %866 = vector.multi_reduction <maximumf>, %865, %cst_200 [1] : vector<1x8xf32> to vector<1xf32>
    %867 = vector.shape_cast %866 : vector<1xf32> to vector<1x1xf32>
    %868 = vector.broadcast %867 : vector<1x1xf32> to vector<1x8xf32>
    %869 = arith.cmpf oeq, %865, %868 : vector<1x8xf32>
    %cst_201 = arith.constant 8.000000e+00 : f32
    %870 = vector.broadcast %cst_201 : f32 to vector<1x8xf32>
    %871 = arith.select %869, %274, %870 : vector<1x8xi1>, vector<1x8xf32>
    %cst_202 = arith.constant dense<0x7F800000> : vector<1xf32>
    %872 = vector.multi_reduction <minimumf>, %871, %cst_202 [1] : vector<1x8xf32> to vector<1xf32>
    %873 = vector.shape_cast %872 : vector<1xf32> to vector<1x1xf32>
    %c7_i32_203 = arith.constant 7 : i32
    %874 = vector.broadcast %c7_i32_203 : i32 to vector<1x8xi32>
    %875 = arith.cmpi eq, %282, %874 : vector<1x8xi32>
    %876 = arith.extui %875 : vector<1x8xi1> to vector<1x8xi32>
    %877 = arith.sitofp %876 : vector<1x8xi32> to vector<1x8xf32>
    %878 = vector.broadcast %873 : vector<1x1xf32> to vector<1x8xf32>
    %879 = arith.mulf %877, %878 : vector<1x8xf32>
    %880 = vector.broadcast %873 : vector<1x1xf32> to vector<1x8xf32>
    %881 = arith.cmpf oeq, %274, %880 : vector<1x8xf32>
    %882 = arith.extui %881 : vector<1x8xi1> to vector<1x8xi32>
    %883 = arith.sitofp %882 : vector<1x8xi32> to vector<1x8xf32>
    %884 = arith.mulf %864, %883 : vector<1x8xf32>
    %cst_204 = arith.constant dense<0.000000e+00> : vector<1xf32>
    %885 = vector.multi_reduction <add>, %884, %cst_204 [1] : vector<1x8xf32> to vector<1xf32>
    %886 = vector.shape_cast %885 : vector<1xf32> to vector<1x1xf32>
    %c6_i32_205 = arith.constant 6 : i32
    %887 = vector.broadcast %c6_i32_205 : i32 to vector<1x8xi32>
    %888 = arith.cmpi eq, %282, %887 : vector<1x8xi32>
    %889 = arith.extui %888 : vector<1x8xi1> to vector<1x8xi32>
    %890 = arith.sitofp %889 : vector<1x8xi32> to vector<1x8xf32>
    %891 = vector.broadcast %886 : vector<1x1xf32> to vector<1x8xf32>
    %892 = arith.mulf %890, %891 : vector<1x8xf32>
    %893 = arith.addf %879, %892 : vector<1x8xf32>
    %894 = vector.broadcast %886 : vector<1x1xf32> to vector<1x8xf32>
    %895 = arith.cmpf oeq, %274, %894 : vector<1x8xf32>
    %896 = arith.extui %895 : vector<1x8xi1> to vector<1x8xi32>
    %897 = arith.sitofp %896 : vector<1x8xi32> to vector<1x8xf32>
    %898 = arith.mulf %849, %897 : vector<1x8xf32>
    %cst_206 = arith.constant dense<0.000000e+00> : vector<1xf32>
    %899 = vector.multi_reduction <add>, %898, %cst_206 [1] : vector<1x8xf32> to vector<1xf32>
    %900 = vector.shape_cast %899 : vector<1xf32> to vector<1x1xf32>
    %c5_i32_207 = arith.constant 5 : i32
    %901 = vector.broadcast %c5_i32_207 : i32 to vector<1x8xi32>
    %902 = arith.cmpi eq, %282, %901 : vector<1x8xi32>
    %903 = arith.extui %902 : vector<1x8xi1> to vector<1x8xi32>
    %904 = arith.sitofp %903 : vector<1x8xi32> to vector<1x8xf32>
    %905 = vector.broadcast %900 : vector<1x1xf32> to vector<1x8xf32>
    %906 = arith.mulf %904, %905 : vector<1x8xf32>
    %907 = arith.addf %893, %906 : vector<1x8xf32>
    %908 = vector.broadcast %900 : vector<1x1xf32> to vector<1x8xf32>
    %909 = arith.cmpf oeq, %274, %908 : vector<1x8xf32>
    %910 = arith.extui %909 : vector<1x8xi1> to vector<1x8xi32>
    %911 = arith.sitofp %910 : vector<1x8xi32> to vector<1x8xf32>
    %912 = arith.mulf %834, %911 : vector<1x8xf32>
    %cst_208 = arith.constant dense<0.000000e+00> : vector<1xf32>
    %913 = vector.multi_reduction <add>, %912, %cst_208 [1] : vector<1x8xf32> to vector<1xf32>
    %914 = vector.shape_cast %913 : vector<1xf32> to vector<1x1xf32>
    %c4_i32_209 = arith.constant 4 : i32
    %915 = vector.broadcast %c4_i32_209 : i32 to vector<1x8xi32>
    %916 = arith.cmpi eq, %282, %915 : vector<1x8xi32>
    %917 = arith.extui %916 : vector<1x8xi1> to vector<1x8xi32>
    %918 = arith.sitofp %917 : vector<1x8xi32> to vector<1x8xf32>
    %919 = vector.broadcast %914 : vector<1x1xf32> to vector<1x8xf32>
    %920 = arith.mulf %918, %919 : vector<1x8xf32>
    %921 = arith.addf %907, %920 : vector<1x8xf32>
    %922 = vector.broadcast %914 : vector<1x1xf32> to vector<1x8xf32>
    %923 = arith.cmpf oeq, %274, %922 : vector<1x8xf32>
    %924 = arith.extui %923 : vector<1x8xi1> to vector<1x8xi32>
    %925 = arith.sitofp %924 : vector<1x8xi32> to vector<1x8xf32>
    %926 = arith.mulf %819, %925 : vector<1x8xf32>
    %cst_210 = arith.constant dense<0.000000e+00> : vector<1xf32>
    %927 = vector.multi_reduction <add>, %926, %cst_210 [1] : vector<1x8xf32> to vector<1xf32>
    %928 = vector.shape_cast %927 : vector<1xf32> to vector<1x1xf32>
    %c3_i32_211 = arith.constant 3 : i32
    %929 = vector.broadcast %c3_i32_211 : i32 to vector<1x8xi32>
    %930 = arith.cmpi eq, %282, %929 : vector<1x8xi32>
    %931 = arith.extui %930 : vector<1x8xi1> to vector<1x8xi32>
    %932 = arith.sitofp %931 : vector<1x8xi32> to vector<1x8xf32>
    %933 = vector.broadcast %928 : vector<1x1xf32> to vector<1x8xf32>
    %934 = arith.mulf %932, %933 : vector<1x8xf32>
    %935 = arith.addf %921, %934 : vector<1x8xf32>
    %936 = vector.broadcast %928 : vector<1x1xf32> to vector<1x8xf32>
    %937 = arith.cmpf oeq, %274, %936 : vector<1x8xf32>
    %938 = arith.extui %937 : vector<1x8xi1> to vector<1x8xi32>
    %939 = arith.sitofp %938 : vector<1x8xi32> to vector<1x8xf32>
    %940 = arith.mulf %804, %939 : vector<1x8xf32>
    %cst_212 = arith.constant dense<0.000000e+00> : vector<1xf32>
    %941 = vector.multi_reduction <add>, %940, %cst_212 [1] : vector<1x8xf32> to vector<1xf32>
    %942 = vector.shape_cast %941 : vector<1xf32> to vector<1x1xf32>
    %c2_i32_213 = arith.constant 2 : i32
    %943 = vector.broadcast %c2_i32_213 : i32 to vector<1x8xi32>
    %944 = arith.cmpi eq, %282, %943 : vector<1x8xi32>
    %945 = arith.extui %944 : vector<1x8xi1> to vector<1x8xi32>
    %946 = arith.sitofp %945 : vector<1x8xi32> to vector<1x8xf32>
    %947 = vector.broadcast %942 : vector<1x1xf32> to vector<1x8xf32>
    %948 = arith.mulf %946, %947 : vector<1x8xf32>
    %949 = arith.addf %935, %948 : vector<1x8xf32>
    %950 = vector.broadcast %942 : vector<1x1xf32> to vector<1x8xf32>
    %951 = arith.cmpf oeq, %274, %950 : vector<1x8xf32>
    %952 = arith.extui %951 : vector<1x8xi1> to vector<1x8xi32>
    %953 = arith.sitofp %952 : vector<1x8xi32> to vector<1x8xf32>
    %954 = arith.mulf %789, %953 : vector<1x8xf32>
    %cst_214 = arith.constant dense<0.000000e+00> : vector<1xf32>
    %955 = vector.multi_reduction <add>, %954, %cst_214 [1] : vector<1x8xf32> to vector<1xf32>
    %956 = vector.shape_cast %955 : vector<1xf32> to vector<1x1xf32>
    %c1_i32_215 = arith.constant 1 : i32
    %957 = vector.broadcast %c1_i32_215 : i32 to vector<1x8xi32>
    %958 = arith.cmpi eq, %282, %957 : vector<1x8xi32>
    %959 = arith.extui %958 : vector<1x8xi1> to vector<1x8xi32>
    %960 = arith.sitofp %959 : vector<1x8xi32> to vector<1x8xf32>
    %961 = vector.broadcast %956 : vector<1x1xf32> to vector<1x8xf32>
    %962 = arith.mulf %960, %961 : vector<1x8xf32>
    %963 = arith.addf %949, %962 : vector<1x8xf32>
    %964 = vector.broadcast %956 : vector<1x1xf32> to vector<1x8xf32>
    %965 = arith.cmpf oeq, %274, %964 : vector<1x8xf32>
    %966 = arith.extui %965 : vector<1x8xi1> to vector<1x8xi32>
    %967 = arith.sitofp %966 : vector<1x8xi32> to vector<1x8xf32>
    %968 = arith.mulf %774, %967 : vector<1x8xf32>
    %cst_216 = arith.constant dense<0.000000e+00> : vector<1xf32>
    %969 = vector.multi_reduction <add>, %968, %cst_216 [1] : vector<1x8xf32> to vector<1xf32>
    %970 = vector.shape_cast %969 : vector<1xf32> to vector<1x1xf32>
    %c0_i32_217 = arith.constant 0 : i32
    %971 = vector.broadcast %c0_i32_217 : i32 to vector<1x8xi32>
    %972 = arith.cmpi eq, %282, %971 : vector<1x8xi32>
    %973 = arith.extui %972 : vector<1x8xi1> to vector<1x8xi32>
    %974 = arith.sitofp %973 : vector<1x8xi32> to vector<1x8xf32>
    %975 = vector.broadcast %970 : vector<1x1xf32> to vector<1x8xf32>
    %976 = arith.mulf %974, %975 : vector<1x8xf32>
    %977 = arith.addf %963, %976 : vector<1x8xf32>
    %c2_i32_218 = arith.constant 2 : i32
    %978 = vector.broadcast %c2_i32_218 : i32 to vector<6x1xi32>
    %979 = arith.cmpi eq, %283, %978 : vector<6x1xi32>
    %980 = arith.extui %979 : vector<6x1xi1> to vector<6x1xi32>
    %981 = arith.sitofp %980 : vector<6x1xi32> to vector<6x1xf32>
    %982 = vector.broadcast %981 : vector<6x1xf32> to vector<6x8xf32>
    %983 = vector.broadcast %977 : vector<1x8xf32> to vector<6x8xf32>
    %984 = arith.mulf %982, %983 : vector<6x8xf32>
    %985 = arith.addf %751, %984 : vector<6x8xf32>
    %986 = vector.extract_strided_slice %270 {offsets = [1, 8], sizes = [1, 8], strides = [1, 1]} : vector<16x24xf32> to vector<1x8xf32>
    %987 = vector.extract_strided_slice %270 {offsets = [3, 8], sizes = [1, 8], strides = [1, 1]} : vector<16x24xf32> to vector<1x8xf32>
    %988 = vector.extract_strided_slice %270 {offsets = [5, 8], sizes = [1, 8], strides = [1, 1]} : vector<16x24xf32> to vector<1x8xf32>
    %989 = vector.extract_strided_slice %270 {offsets = [7, 8], sizes = [1, 8], strides = [1, 1]} : vector<16x24xf32> to vector<1x8xf32>
    %990 = vector.extract_strided_slice %270 {offsets = [9, 8], sizes = [1, 8], strides = [1, 1]} : vector<16x24xf32> to vector<1x8xf32>
    %991 = vector.extract_strided_slice %270 {offsets = [11, 8], sizes = [1, 8], strides = [1, 1]} : vector<16x24xf32> to vector<1x8xf32>
    %992 = vector.extract_strided_slice %270 {offsets = [13, 8], sizes = [1, 8], strides = [1, 1]} : vector<16x24xf32> to vector<1x8xf32>
    %993 = vector.extract_strided_slice %270 {offsets = [15, 8], sizes = [1, 8], strides = [1, 1]} : vector<16x24xf32> to vector<1x8xf32>
    %994 = vector.broadcast %986 : vector<1x8xf32> to vector<8x8xf32>
    %995 = arith.mulf %994, %281 : vector<8x8xf32>
    %cst_219 = arith.constant dense<0.000000e+00> : vector<8xf32>
    %996 = vector.multi_reduction <add>, %995, %cst_219 [1] : vector<8x8xf32> to vector<8xf32>
    %997 = vector.shape_cast %996 : vector<8xf32> to vector<8x1xf32>
    %998 = vector.broadcast %997 : vector<8x1xf32> to vector<8x8xf32>
    %999 = arith.addf %998, %752 : vector<8x8xf32>
    %cst_220 = arith.constant dense<0xFF800000> : vector<8xf32>
    %1000 = vector.multi_reduction <maximumf>, %999, %cst_220 [0] : vector<8x8xf32> to vector<8xf32>
    %1001 = vector.shape_cast %1000 : vector<8xf32> to vector<1x8xf32>
    %1002 = vector.broadcast %1001 : vector<1x8xf32> to vector<8x8xf32>
    %1003 = arith.cmpf oeq, %999, %1002 : vector<8x8xf32>
    %cst_221 = arith.constant 8.000000e+00 : f32
    %1004 = vector.broadcast %cst_221 : f32 to vector<8x8xf32>
    %1005 = arith.select %1003, %276, %1004 : vector<8x8xi1>, vector<8x8xf32>
    %cst_222 = arith.constant dense<0x7F800000> : vector<8xf32>
    %1006 = vector.multi_reduction <minimumf>, %1005, %cst_222 [0] : vector<8x8xf32> to vector<8xf32>
    %1007 = vector.shape_cast %1006 : vector<8xf32> to vector<1x8xf32>
    %1008 = arith.addf %1001, %987 : vector<1x8xf32>
    %1009 = vector.broadcast %1008 : vector<1x8xf32> to vector<8x8xf32>
    %1010 = arith.mulf %1009, %281 : vector<8x8xf32>
    %cst_223 = arith.constant dense<0.000000e+00> : vector<8xf32>
    %1011 = vector.multi_reduction <add>, %1010, %cst_223 [1] : vector<8x8xf32> to vector<8xf32>
    %1012 = vector.shape_cast %1011 : vector<8xf32> to vector<8x1xf32>
    %1013 = vector.broadcast %1012 : vector<8x1xf32> to vector<8x8xf32>
    %1014 = arith.addf %1013, %752 : vector<8x8xf32>
    %cst_224 = arith.constant dense<0xFF800000> : vector<8xf32>
    %1015 = vector.multi_reduction <maximumf>, %1014, %cst_224 [0] : vector<8x8xf32> to vector<8xf32>
    %1016 = vector.shape_cast %1015 : vector<8xf32> to vector<1x8xf32>
    %1017 = vector.broadcast %1016 : vector<1x8xf32> to vector<8x8xf32>
    %1018 = arith.cmpf oeq, %1014, %1017 : vector<8x8xf32>
    %cst_225 = arith.constant 8.000000e+00 : f32
    %1019 = vector.broadcast %cst_225 : f32 to vector<8x8xf32>
    %1020 = arith.select %1018, %276, %1019 : vector<8x8xi1>, vector<8x8xf32>
    %cst_226 = arith.constant dense<0x7F800000> : vector<8xf32>
    %1021 = vector.multi_reduction <minimumf>, %1020, %cst_226 [0] : vector<8x8xf32> to vector<8xf32>
    %1022 = vector.shape_cast %1021 : vector<8xf32> to vector<1x8xf32>
    %1023 = arith.addf %1016, %988 : vector<1x8xf32>
    %1024 = vector.broadcast %1023 : vector<1x8xf32> to vector<8x8xf32>
    %1025 = arith.mulf %1024, %281 : vector<8x8xf32>
    %cst_227 = arith.constant dense<0.000000e+00> : vector<8xf32>
    %1026 = vector.multi_reduction <add>, %1025, %cst_227 [1] : vector<8x8xf32> to vector<8xf32>
    %1027 = vector.shape_cast %1026 : vector<8xf32> to vector<8x1xf32>
    %1028 = vector.broadcast %1027 : vector<8x1xf32> to vector<8x8xf32>
    %1029 = arith.addf %1028, %752 : vector<8x8xf32>
    %cst_228 = arith.constant dense<0xFF800000> : vector<8xf32>
    %1030 = vector.multi_reduction <maximumf>, %1029, %cst_228 [0] : vector<8x8xf32> to vector<8xf32>
    %1031 = vector.shape_cast %1030 : vector<8xf32> to vector<1x8xf32>
    %1032 = vector.broadcast %1031 : vector<1x8xf32> to vector<8x8xf32>
    %1033 = arith.cmpf oeq, %1029, %1032 : vector<8x8xf32>
    %cst_229 = arith.constant 8.000000e+00 : f32
    %1034 = vector.broadcast %cst_229 : f32 to vector<8x8xf32>
    %1035 = arith.select %1033, %276, %1034 : vector<8x8xi1>, vector<8x8xf32>
    %cst_230 = arith.constant dense<0x7F800000> : vector<8xf32>
    %1036 = vector.multi_reduction <minimumf>, %1035, %cst_230 [0] : vector<8x8xf32> to vector<8xf32>
    %1037 = vector.shape_cast %1036 : vector<8xf32> to vector<1x8xf32>
    %1038 = arith.addf %1031, %989 : vector<1x8xf32>
    %1039 = vector.broadcast %1038 : vector<1x8xf32> to vector<8x8xf32>
    %1040 = arith.mulf %1039, %281 : vector<8x8xf32>
    %cst_231 = arith.constant dense<0.000000e+00> : vector<8xf32>
    %1041 = vector.multi_reduction <add>, %1040, %cst_231 [1] : vector<8x8xf32> to vector<8xf32>
    %1042 = vector.shape_cast %1041 : vector<8xf32> to vector<8x1xf32>
    %1043 = vector.broadcast %1042 : vector<8x1xf32> to vector<8x8xf32>
    %1044 = arith.addf %1043, %752 : vector<8x8xf32>
    %cst_232 = arith.constant dense<0xFF800000> : vector<8xf32>
    %1045 = vector.multi_reduction <maximumf>, %1044, %cst_232 [0] : vector<8x8xf32> to vector<8xf32>
    %1046 = vector.shape_cast %1045 : vector<8xf32> to vector<1x8xf32>
    %1047 = vector.broadcast %1046 : vector<1x8xf32> to vector<8x8xf32>
    %1048 = arith.cmpf oeq, %1044, %1047 : vector<8x8xf32>
    %cst_233 = arith.constant 8.000000e+00 : f32
    %1049 = vector.broadcast %cst_233 : f32 to vector<8x8xf32>
    %1050 = arith.select %1048, %276, %1049 : vector<8x8xi1>, vector<8x8xf32>
    %cst_234 = arith.constant dense<0x7F800000> : vector<8xf32>
    %1051 = vector.multi_reduction <minimumf>, %1050, %cst_234 [0] : vector<8x8xf32> to vector<8xf32>
    %1052 = vector.shape_cast %1051 : vector<8xf32> to vector<1x8xf32>
    %1053 = arith.addf %1046, %990 : vector<1x8xf32>
    %1054 = vector.broadcast %1053 : vector<1x8xf32> to vector<8x8xf32>
    %1055 = arith.mulf %1054, %281 : vector<8x8xf32>
    %cst_235 = arith.constant dense<0.000000e+00> : vector<8xf32>
    %1056 = vector.multi_reduction <add>, %1055, %cst_235 [1] : vector<8x8xf32> to vector<8xf32>
    %1057 = vector.shape_cast %1056 : vector<8xf32> to vector<8x1xf32>
    %1058 = vector.broadcast %1057 : vector<8x1xf32> to vector<8x8xf32>
    %1059 = arith.addf %1058, %752 : vector<8x8xf32>
    %cst_236 = arith.constant dense<0xFF800000> : vector<8xf32>
    %1060 = vector.multi_reduction <maximumf>, %1059, %cst_236 [0] : vector<8x8xf32> to vector<8xf32>
    %1061 = vector.shape_cast %1060 : vector<8xf32> to vector<1x8xf32>
    %1062 = vector.broadcast %1061 : vector<1x8xf32> to vector<8x8xf32>
    %1063 = arith.cmpf oeq, %1059, %1062 : vector<8x8xf32>
    %cst_237 = arith.constant 8.000000e+00 : f32
    %1064 = vector.broadcast %cst_237 : f32 to vector<8x8xf32>
    %1065 = arith.select %1063, %276, %1064 : vector<8x8xi1>, vector<8x8xf32>
    %cst_238 = arith.constant dense<0x7F800000> : vector<8xf32>
    %1066 = vector.multi_reduction <minimumf>, %1065, %cst_238 [0] : vector<8x8xf32> to vector<8xf32>
    %1067 = vector.shape_cast %1066 : vector<8xf32> to vector<1x8xf32>
    %1068 = arith.addf %1061, %991 : vector<1x8xf32>
    %1069 = vector.broadcast %1068 : vector<1x8xf32> to vector<8x8xf32>
    %1070 = arith.mulf %1069, %281 : vector<8x8xf32>
    %cst_239 = arith.constant dense<0.000000e+00> : vector<8xf32>
    %1071 = vector.multi_reduction <add>, %1070, %cst_239 [1] : vector<8x8xf32> to vector<8xf32>
    %1072 = vector.shape_cast %1071 : vector<8xf32> to vector<8x1xf32>
    %1073 = vector.broadcast %1072 : vector<8x1xf32> to vector<8x8xf32>
    %1074 = arith.addf %1073, %752 : vector<8x8xf32>
    %cst_240 = arith.constant dense<0xFF800000> : vector<8xf32>
    %1075 = vector.multi_reduction <maximumf>, %1074, %cst_240 [0] : vector<8x8xf32> to vector<8xf32>
    %1076 = vector.shape_cast %1075 : vector<8xf32> to vector<1x8xf32>
    %1077 = vector.broadcast %1076 : vector<1x8xf32> to vector<8x8xf32>
    %1078 = arith.cmpf oeq, %1074, %1077 : vector<8x8xf32>
    %cst_241 = arith.constant 8.000000e+00 : f32
    %1079 = vector.broadcast %cst_241 : f32 to vector<8x8xf32>
    %1080 = arith.select %1078, %276, %1079 : vector<8x8xi1>, vector<8x8xf32>
    %cst_242 = arith.constant dense<0x7F800000> : vector<8xf32>
    %1081 = vector.multi_reduction <minimumf>, %1080, %cst_242 [0] : vector<8x8xf32> to vector<8xf32>
    %1082 = vector.shape_cast %1081 : vector<8xf32> to vector<1x8xf32>
    %1083 = arith.addf %1076, %992 : vector<1x8xf32>
    %1084 = vector.broadcast %1083 : vector<1x8xf32> to vector<8x8xf32>
    %1085 = arith.mulf %1084, %281 : vector<8x8xf32>
    %cst_243 = arith.constant dense<0.000000e+00> : vector<8xf32>
    %1086 = vector.multi_reduction <add>, %1085, %cst_243 [1] : vector<8x8xf32> to vector<8xf32>
    %1087 = vector.shape_cast %1086 : vector<8xf32> to vector<8x1xf32>
    %1088 = vector.broadcast %1087 : vector<8x1xf32> to vector<8x8xf32>
    %1089 = arith.addf %1088, %752 : vector<8x8xf32>
    %cst_244 = arith.constant dense<0xFF800000> : vector<8xf32>
    %1090 = vector.multi_reduction <maximumf>, %1089, %cst_244 [0] : vector<8x8xf32> to vector<8xf32>
    %1091 = vector.shape_cast %1090 : vector<8xf32> to vector<1x8xf32>
    %1092 = vector.broadcast %1091 : vector<1x8xf32> to vector<8x8xf32>
    %1093 = arith.cmpf oeq, %1089, %1092 : vector<8x8xf32>
    %cst_245 = arith.constant 8.000000e+00 : f32
    %1094 = vector.broadcast %cst_245 : f32 to vector<8x8xf32>
    %1095 = arith.select %1093, %276, %1094 : vector<8x8xi1>, vector<8x8xf32>
    %cst_246 = arith.constant dense<0x7F800000> : vector<8xf32>
    %1096 = vector.multi_reduction <minimumf>, %1095, %cst_246 [0] : vector<8x8xf32> to vector<8xf32>
    %1097 = vector.shape_cast %1096 : vector<8xf32> to vector<1x8xf32>
    %1098 = arith.addf %1091, %993 : vector<1x8xf32>
    %cst_247 = arith.constant dense<0xFF800000> : vector<1xf32>
    %1099 = vector.multi_reduction <maximumf>, %1098, %cst_247 [1] : vector<1x8xf32> to vector<1xf32>
    %1100 = vector.shape_cast %1099 : vector<1xf32> to vector<1x1xf32>
    %1101 = vector.broadcast %1100 : vector<1x1xf32> to vector<1x8xf32>
    %1102 = arith.cmpf oeq, %1098, %1101 : vector<1x8xf32>
    %cst_248 = arith.constant 8.000000e+00 : f32
    %1103 = vector.broadcast %cst_248 : f32 to vector<1x8xf32>
    %1104 = arith.select %1102, %274, %1103 : vector<1x8xi1>, vector<1x8xf32>
    %cst_249 = arith.constant dense<0x7F800000> : vector<1xf32>
    %1105 = vector.multi_reduction <minimumf>, %1104, %cst_249 [1] : vector<1x8xf32> to vector<1xf32>
    %1106 = vector.shape_cast %1105 : vector<1xf32> to vector<1x1xf32>
    %c7_i32_250 = arith.constant 7 : i32
    %1107 = vector.broadcast %c7_i32_250 : i32 to vector<1x8xi32>
    %1108 = arith.cmpi eq, %282, %1107 : vector<1x8xi32>
    %1109 = arith.extui %1108 : vector<1x8xi1> to vector<1x8xi32>
    %1110 = arith.sitofp %1109 : vector<1x8xi32> to vector<1x8xf32>
    %1111 = vector.broadcast %1106 : vector<1x1xf32> to vector<1x8xf32>
    %1112 = arith.mulf %1110, %1111 : vector<1x8xf32>
    %1113 = vector.broadcast %1106 : vector<1x1xf32> to vector<1x8xf32>
    %1114 = arith.cmpf oeq, %274, %1113 : vector<1x8xf32>
    %1115 = arith.extui %1114 : vector<1x8xi1> to vector<1x8xi32>
    %1116 = arith.sitofp %1115 : vector<1x8xi32> to vector<1x8xf32>
    %1117 = arith.mulf %1097, %1116 : vector<1x8xf32>
    %cst_251 = arith.constant dense<0.000000e+00> : vector<1xf32>
    %1118 = vector.multi_reduction <add>, %1117, %cst_251 [1] : vector<1x8xf32> to vector<1xf32>
    %1119 = vector.shape_cast %1118 : vector<1xf32> to vector<1x1xf32>
    %c6_i32_252 = arith.constant 6 : i32
    %1120 = vector.broadcast %c6_i32_252 : i32 to vector<1x8xi32>
    %1121 = arith.cmpi eq, %282, %1120 : vector<1x8xi32>
    %1122 = arith.extui %1121 : vector<1x8xi1> to vector<1x8xi32>
    %1123 = arith.sitofp %1122 : vector<1x8xi32> to vector<1x8xf32>
    %1124 = vector.broadcast %1119 : vector<1x1xf32> to vector<1x8xf32>
    %1125 = arith.mulf %1123, %1124 : vector<1x8xf32>
    %1126 = arith.addf %1112, %1125 : vector<1x8xf32>
    %1127 = vector.broadcast %1119 : vector<1x1xf32> to vector<1x8xf32>
    %1128 = arith.cmpf oeq, %274, %1127 : vector<1x8xf32>
    %1129 = arith.extui %1128 : vector<1x8xi1> to vector<1x8xi32>
    %1130 = arith.sitofp %1129 : vector<1x8xi32> to vector<1x8xf32>
    %1131 = arith.mulf %1082, %1130 : vector<1x8xf32>
    %cst_253 = arith.constant dense<0.000000e+00> : vector<1xf32>
    %1132 = vector.multi_reduction <add>, %1131, %cst_253 [1] : vector<1x8xf32> to vector<1xf32>
    %1133 = vector.shape_cast %1132 : vector<1xf32> to vector<1x1xf32>
    %c5_i32_254 = arith.constant 5 : i32
    %1134 = vector.broadcast %c5_i32_254 : i32 to vector<1x8xi32>
    %1135 = arith.cmpi eq, %282, %1134 : vector<1x8xi32>
    %1136 = arith.extui %1135 : vector<1x8xi1> to vector<1x8xi32>
    %1137 = arith.sitofp %1136 : vector<1x8xi32> to vector<1x8xf32>
    %1138 = vector.broadcast %1133 : vector<1x1xf32> to vector<1x8xf32>
    %1139 = arith.mulf %1137, %1138 : vector<1x8xf32>
    %1140 = arith.addf %1126, %1139 : vector<1x8xf32>
    %1141 = vector.broadcast %1133 : vector<1x1xf32> to vector<1x8xf32>
    %1142 = arith.cmpf oeq, %274, %1141 : vector<1x8xf32>
    %1143 = arith.extui %1142 : vector<1x8xi1> to vector<1x8xi32>
    %1144 = arith.sitofp %1143 : vector<1x8xi32> to vector<1x8xf32>
    %1145 = arith.mulf %1067, %1144 : vector<1x8xf32>
    %cst_255 = arith.constant dense<0.000000e+00> : vector<1xf32>
    %1146 = vector.multi_reduction <add>, %1145, %cst_255 [1] : vector<1x8xf32> to vector<1xf32>
    %1147 = vector.shape_cast %1146 : vector<1xf32> to vector<1x1xf32>
    %c4_i32_256 = arith.constant 4 : i32
    %1148 = vector.broadcast %c4_i32_256 : i32 to vector<1x8xi32>
    %1149 = arith.cmpi eq, %282, %1148 : vector<1x8xi32>
    %1150 = arith.extui %1149 : vector<1x8xi1> to vector<1x8xi32>
    %1151 = arith.sitofp %1150 : vector<1x8xi32> to vector<1x8xf32>
    %1152 = vector.broadcast %1147 : vector<1x1xf32> to vector<1x8xf32>
    %1153 = arith.mulf %1151, %1152 : vector<1x8xf32>
    %1154 = arith.addf %1140, %1153 : vector<1x8xf32>
    %1155 = vector.broadcast %1147 : vector<1x1xf32> to vector<1x8xf32>
    %1156 = arith.cmpf oeq, %274, %1155 : vector<1x8xf32>
    %1157 = arith.extui %1156 : vector<1x8xi1> to vector<1x8xi32>
    %1158 = arith.sitofp %1157 : vector<1x8xi32> to vector<1x8xf32>
    %1159 = arith.mulf %1052, %1158 : vector<1x8xf32>
    %cst_257 = arith.constant dense<0.000000e+00> : vector<1xf32>
    %1160 = vector.multi_reduction <add>, %1159, %cst_257 [1] : vector<1x8xf32> to vector<1xf32>
    %1161 = vector.shape_cast %1160 : vector<1xf32> to vector<1x1xf32>
    %c3_i32_258 = arith.constant 3 : i32
    %1162 = vector.broadcast %c3_i32_258 : i32 to vector<1x8xi32>
    %1163 = arith.cmpi eq, %282, %1162 : vector<1x8xi32>
    %1164 = arith.extui %1163 : vector<1x8xi1> to vector<1x8xi32>
    %1165 = arith.sitofp %1164 : vector<1x8xi32> to vector<1x8xf32>
    %1166 = vector.broadcast %1161 : vector<1x1xf32> to vector<1x8xf32>
    %1167 = arith.mulf %1165, %1166 : vector<1x8xf32>
    %1168 = arith.addf %1154, %1167 : vector<1x8xf32>
    %1169 = vector.broadcast %1161 : vector<1x1xf32> to vector<1x8xf32>
    %1170 = arith.cmpf oeq, %274, %1169 : vector<1x8xf32>
    %1171 = arith.extui %1170 : vector<1x8xi1> to vector<1x8xi32>
    %1172 = arith.sitofp %1171 : vector<1x8xi32> to vector<1x8xf32>
    %1173 = arith.mulf %1037, %1172 : vector<1x8xf32>
    %cst_259 = arith.constant dense<0.000000e+00> : vector<1xf32>
    %1174 = vector.multi_reduction <add>, %1173, %cst_259 [1] : vector<1x8xf32> to vector<1xf32>
    %1175 = vector.shape_cast %1174 : vector<1xf32> to vector<1x1xf32>
    %c2_i32_260 = arith.constant 2 : i32
    %1176 = vector.broadcast %c2_i32_260 : i32 to vector<1x8xi32>
    %1177 = arith.cmpi eq, %282, %1176 : vector<1x8xi32>
    %1178 = arith.extui %1177 : vector<1x8xi1> to vector<1x8xi32>
    %1179 = arith.sitofp %1178 : vector<1x8xi32> to vector<1x8xf32>
    %1180 = vector.broadcast %1175 : vector<1x1xf32> to vector<1x8xf32>
    %1181 = arith.mulf %1179, %1180 : vector<1x8xf32>
    %1182 = arith.addf %1168, %1181 : vector<1x8xf32>
    %1183 = vector.broadcast %1175 : vector<1x1xf32> to vector<1x8xf32>
    %1184 = arith.cmpf oeq, %274, %1183 : vector<1x8xf32>
    %1185 = arith.extui %1184 : vector<1x8xi1> to vector<1x8xi32>
    %1186 = arith.sitofp %1185 : vector<1x8xi32> to vector<1x8xf32>
    %1187 = arith.mulf %1022, %1186 : vector<1x8xf32>
    %cst_261 = arith.constant dense<0.000000e+00> : vector<1xf32>
    %1188 = vector.multi_reduction <add>, %1187, %cst_261 [1] : vector<1x8xf32> to vector<1xf32>
    %1189 = vector.shape_cast %1188 : vector<1xf32> to vector<1x1xf32>
    %c1_i32_262 = arith.constant 1 : i32
    %1190 = vector.broadcast %c1_i32_262 : i32 to vector<1x8xi32>
    %1191 = arith.cmpi eq, %282, %1190 : vector<1x8xi32>
    %1192 = arith.extui %1191 : vector<1x8xi1> to vector<1x8xi32>
    %1193 = arith.sitofp %1192 : vector<1x8xi32> to vector<1x8xf32>
    %1194 = vector.broadcast %1189 : vector<1x1xf32> to vector<1x8xf32>
    %1195 = arith.mulf %1193, %1194 : vector<1x8xf32>
    %1196 = arith.addf %1182, %1195 : vector<1x8xf32>
    %1197 = vector.broadcast %1189 : vector<1x1xf32> to vector<1x8xf32>
    %1198 = arith.cmpf oeq, %274, %1197 : vector<1x8xf32>
    %1199 = arith.extui %1198 : vector<1x8xi1> to vector<1x8xi32>
    %1200 = arith.sitofp %1199 : vector<1x8xi32> to vector<1x8xf32>
    %1201 = arith.mulf %1007, %1200 : vector<1x8xf32>
    %cst_263 = arith.constant dense<0.000000e+00> : vector<1xf32>
    %1202 = vector.multi_reduction <add>, %1201, %cst_263 [1] : vector<1x8xf32> to vector<1xf32>
    %1203 = vector.shape_cast %1202 : vector<1xf32> to vector<1x1xf32>
    %c0_i32_264 = arith.constant 0 : i32
    %1204 = vector.broadcast %c0_i32_264 : i32 to vector<1x8xi32>
    %1205 = arith.cmpi eq, %282, %1204 : vector<1x8xi32>
    %1206 = arith.extui %1205 : vector<1x8xi1> to vector<1x8xi32>
    %1207 = arith.sitofp %1206 : vector<1x8xi32> to vector<1x8xf32>
    %1208 = vector.broadcast %1203 : vector<1x1xf32> to vector<1x8xf32>
    %1209 = arith.mulf %1207, %1208 : vector<1x8xf32>
    %1210 = arith.addf %1196, %1209 : vector<1x8xf32>
    %c3_i32_265 = arith.constant 3 : i32
    %1211 = vector.broadcast %c3_i32_265 : i32 to vector<6x1xi32>
    %1212 = arith.cmpi eq, %283, %1211 : vector<6x1xi32>
    %1213 = arith.extui %1212 : vector<6x1xi1> to vector<6x1xi32>
    %1214 = arith.sitofp %1213 : vector<6x1xi32> to vector<6x1xf32>
    %1215 = vector.broadcast %1214 : vector<6x1xf32> to vector<6x8xf32>
    %1216 = vector.broadcast %1210 : vector<1x8xf32> to vector<6x8xf32>
    %1217 = arith.mulf %1215, %1216 : vector<6x8xf32>
    %1218 = arith.addf %985, %1217 : vector<6x8xf32>
    %1219 = vector.extract_strided_slice %272 {offsets = [16, 0], sizes = [8, 8], strides = [1, 1]} : vector<24x8xf32> to vector<8x8xf32>
    %1220 = vector.extract_strided_slice %270 {offsets = [0, 16], sizes = [1, 8], strides = [1, 1]} : vector<16x24xf32> to vector<1x8xf32>
    %1221 = vector.extract_strided_slice %270 {offsets = [2, 16], sizes = [1, 8], strides = [1, 1]} : vector<16x24xf32> to vector<1x8xf32>
    %1222 = vector.extract_strided_slice %270 {offsets = [4, 16], sizes = [1, 8], strides = [1, 1]} : vector<16x24xf32> to vector<1x8xf32>
    %1223 = vector.extract_strided_slice %270 {offsets = [6, 16], sizes = [1, 8], strides = [1, 1]} : vector<16x24xf32> to vector<1x8xf32>
    %1224 = vector.extract_strided_slice %270 {offsets = [8, 16], sizes = [1, 8], strides = [1, 1]} : vector<16x24xf32> to vector<1x8xf32>
    %1225 = vector.extract_strided_slice %270 {offsets = [10, 16], sizes = [1, 8], strides = [1, 1]} : vector<16x24xf32> to vector<1x8xf32>
    %1226 = vector.extract_strided_slice %270 {offsets = [12, 16], sizes = [1, 8], strides = [1, 1]} : vector<16x24xf32> to vector<1x8xf32>
    %1227 = vector.extract_strided_slice %270 {offsets = [14, 16], sizes = [1, 8], strides = [1, 1]} : vector<16x24xf32> to vector<1x8xf32>
    %1228 = vector.broadcast %1220 : vector<1x8xf32> to vector<8x8xf32>
    %1229 = arith.mulf %1228, %281 : vector<8x8xf32>
    %cst_266 = arith.constant dense<0.000000e+00> : vector<8xf32>
    %1230 = vector.multi_reduction <add>, %1229, %cst_266 [1] : vector<8x8xf32> to vector<8xf32>
    %1231 = vector.shape_cast %1230 : vector<8xf32> to vector<8x1xf32>
    %1232 = vector.broadcast %1231 : vector<8x1xf32> to vector<8x8xf32>
    %1233 = arith.addf %1232, %1219 : vector<8x8xf32>
    %cst_267 = arith.constant dense<0xFF800000> : vector<8xf32>
    %1234 = vector.multi_reduction <maximumf>, %1233, %cst_267 [0] : vector<8x8xf32> to vector<8xf32>
    %1235 = vector.shape_cast %1234 : vector<8xf32> to vector<1x8xf32>
    %1236 = vector.broadcast %1235 : vector<1x8xf32> to vector<8x8xf32>
    %1237 = arith.cmpf oeq, %1233, %1236 : vector<8x8xf32>
    %cst_268 = arith.constant 8.000000e+00 : f32
    %1238 = vector.broadcast %cst_268 : f32 to vector<8x8xf32>
    %1239 = arith.select %1237, %276, %1238 : vector<8x8xi1>, vector<8x8xf32>
    %cst_269 = arith.constant dense<0x7F800000> : vector<8xf32>
    %1240 = vector.multi_reduction <minimumf>, %1239, %cst_269 [0] : vector<8x8xf32> to vector<8xf32>
    %1241 = vector.shape_cast %1240 : vector<8xf32> to vector<1x8xf32>
    %1242 = arith.addf %1235, %1221 : vector<1x8xf32>
    %1243 = vector.broadcast %1242 : vector<1x8xf32> to vector<8x8xf32>
    %1244 = arith.mulf %1243, %281 : vector<8x8xf32>
    %cst_270 = arith.constant dense<0.000000e+00> : vector<8xf32>
    %1245 = vector.multi_reduction <add>, %1244, %cst_270 [1] : vector<8x8xf32> to vector<8xf32>
    %1246 = vector.shape_cast %1245 : vector<8xf32> to vector<8x1xf32>
    %1247 = vector.broadcast %1246 : vector<8x1xf32> to vector<8x8xf32>
    %1248 = arith.addf %1247, %1219 : vector<8x8xf32>
    %cst_271 = arith.constant dense<0xFF800000> : vector<8xf32>
    %1249 = vector.multi_reduction <maximumf>, %1248, %cst_271 [0] : vector<8x8xf32> to vector<8xf32>
    %1250 = vector.shape_cast %1249 : vector<8xf32> to vector<1x8xf32>
    %1251 = vector.broadcast %1250 : vector<1x8xf32> to vector<8x8xf32>
    %1252 = arith.cmpf oeq, %1248, %1251 : vector<8x8xf32>
    %cst_272 = arith.constant 8.000000e+00 : f32
    %1253 = vector.broadcast %cst_272 : f32 to vector<8x8xf32>
    %1254 = arith.select %1252, %276, %1253 : vector<8x8xi1>, vector<8x8xf32>
    %cst_273 = arith.constant dense<0x7F800000> : vector<8xf32>
    %1255 = vector.multi_reduction <minimumf>, %1254, %cst_273 [0] : vector<8x8xf32> to vector<8xf32>
    %1256 = vector.shape_cast %1255 : vector<8xf32> to vector<1x8xf32>
    %1257 = arith.addf %1250, %1222 : vector<1x8xf32>
    %1258 = vector.broadcast %1257 : vector<1x8xf32> to vector<8x8xf32>
    %1259 = arith.mulf %1258, %281 : vector<8x8xf32>
    %cst_274 = arith.constant dense<0.000000e+00> : vector<8xf32>
    %1260 = vector.multi_reduction <add>, %1259, %cst_274 [1] : vector<8x8xf32> to vector<8xf32>
    %1261 = vector.shape_cast %1260 : vector<8xf32> to vector<8x1xf32>
    %1262 = vector.broadcast %1261 : vector<8x1xf32> to vector<8x8xf32>
    %1263 = arith.addf %1262, %1219 : vector<8x8xf32>
    %cst_275 = arith.constant dense<0xFF800000> : vector<8xf32>
    %1264 = vector.multi_reduction <maximumf>, %1263, %cst_275 [0] : vector<8x8xf32> to vector<8xf32>
    %1265 = vector.shape_cast %1264 : vector<8xf32> to vector<1x8xf32>
    %1266 = vector.broadcast %1265 : vector<1x8xf32> to vector<8x8xf32>
    %1267 = arith.cmpf oeq, %1263, %1266 : vector<8x8xf32>
    %cst_276 = arith.constant 8.000000e+00 : f32
    %1268 = vector.broadcast %cst_276 : f32 to vector<8x8xf32>
    %1269 = arith.select %1267, %276, %1268 : vector<8x8xi1>, vector<8x8xf32>
    %cst_277 = arith.constant dense<0x7F800000> : vector<8xf32>
    %1270 = vector.multi_reduction <minimumf>, %1269, %cst_277 [0] : vector<8x8xf32> to vector<8xf32>
    %1271 = vector.shape_cast %1270 : vector<8xf32> to vector<1x8xf32>
    %1272 = arith.addf %1265, %1223 : vector<1x8xf32>
    %1273 = vector.broadcast %1272 : vector<1x8xf32> to vector<8x8xf32>
    %1274 = arith.mulf %1273, %281 : vector<8x8xf32>
    %cst_278 = arith.constant dense<0.000000e+00> : vector<8xf32>
    %1275 = vector.multi_reduction <add>, %1274, %cst_278 [1] : vector<8x8xf32> to vector<8xf32>
    %1276 = vector.shape_cast %1275 : vector<8xf32> to vector<8x1xf32>
    %1277 = vector.broadcast %1276 : vector<8x1xf32> to vector<8x8xf32>
    %1278 = arith.addf %1277, %1219 : vector<8x8xf32>
    %cst_279 = arith.constant dense<0xFF800000> : vector<8xf32>
    %1279 = vector.multi_reduction <maximumf>, %1278, %cst_279 [0] : vector<8x8xf32> to vector<8xf32>
    %1280 = vector.shape_cast %1279 : vector<8xf32> to vector<1x8xf32>
    %1281 = vector.broadcast %1280 : vector<1x8xf32> to vector<8x8xf32>
    %1282 = arith.cmpf oeq, %1278, %1281 : vector<8x8xf32>
    %cst_280 = arith.constant 8.000000e+00 : f32
    %1283 = vector.broadcast %cst_280 : f32 to vector<8x8xf32>
    %1284 = arith.select %1282, %276, %1283 : vector<8x8xi1>, vector<8x8xf32>
    %cst_281 = arith.constant dense<0x7F800000> : vector<8xf32>
    %1285 = vector.multi_reduction <minimumf>, %1284, %cst_281 [0] : vector<8x8xf32> to vector<8xf32>
    %1286 = vector.shape_cast %1285 : vector<8xf32> to vector<1x8xf32>
    %1287 = arith.addf %1280, %1224 : vector<1x8xf32>
    %1288 = vector.broadcast %1287 : vector<1x8xf32> to vector<8x8xf32>
    %1289 = arith.mulf %1288, %281 : vector<8x8xf32>
    %cst_282 = arith.constant dense<0.000000e+00> : vector<8xf32>
    %1290 = vector.multi_reduction <add>, %1289, %cst_282 [1] : vector<8x8xf32> to vector<8xf32>
    %1291 = vector.shape_cast %1290 : vector<8xf32> to vector<8x1xf32>
    %1292 = vector.broadcast %1291 : vector<8x1xf32> to vector<8x8xf32>
    %1293 = arith.addf %1292, %1219 : vector<8x8xf32>
    %cst_283 = arith.constant dense<0xFF800000> : vector<8xf32>
    %1294 = vector.multi_reduction <maximumf>, %1293, %cst_283 [0] : vector<8x8xf32> to vector<8xf32>
    %1295 = vector.shape_cast %1294 : vector<8xf32> to vector<1x8xf32>
    %1296 = vector.broadcast %1295 : vector<1x8xf32> to vector<8x8xf32>
    %1297 = arith.cmpf oeq, %1293, %1296 : vector<8x8xf32>
    %cst_284 = arith.constant 8.000000e+00 : f32
    %1298 = vector.broadcast %cst_284 : f32 to vector<8x8xf32>
    %1299 = arith.select %1297, %276, %1298 : vector<8x8xi1>, vector<8x8xf32>
    %cst_285 = arith.constant dense<0x7F800000> : vector<8xf32>
    %1300 = vector.multi_reduction <minimumf>, %1299, %cst_285 [0] : vector<8x8xf32> to vector<8xf32>
    %1301 = vector.shape_cast %1300 : vector<8xf32> to vector<1x8xf32>
    %1302 = arith.addf %1295, %1225 : vector<1x8xf32>
    %1303 = vector.broadcast %1302 : vector<1x8xf32> to vector<8x8xf32>
    %1304 = arith.mulf %1303, %281 : vector<8x8xf32>
    %cst_286 = arith.constant dense<0.000000e+00> : vector<8xf32>
    %1305 = vector.multi_reduction <add>, %1304, %cst_286 [1] : vector<8x8xf32> to vector<8xf32>
    %1306 = vector.shape_cast %1305 : vector<8xf32> to vector<8x1xf32>
    %1307 = vector.broadcast %1306 : vector<8x1xf32> to vector<8x8xf32>
    %1308 = arith.addf %1307, %1219 : vector<8x8xf32>
    %cst_287 = arith.constant dense<0xFF800000> : vector<8xf32>
    %1309 = vector.multi_reduction <maximumf>, %1308, %cst_287 [0] : vector<8x8xf32> to vector<8xf32>
    %1310 = vector.shape_cast %1309 : vector<8xf32> to vector<1x8xf32>
    %1311 = vector.broadcast %1310 : vector<1x8xf32> to vector<8x8xf32>
    %1312 = arith.cmpf oeq, %1308, %1311 : vector<8x8xf32>
    %cst_288 = arith.constant 8.000000e+00 : f32
    %1313 = vector.broadcast %cst_288 : f32 to vector<8x8xf32>
    %1314 = arith.select %1312, %276, %1313 : vector<8x8xi1>, vector<8x8xf32>
    %cst_289 = arith.constant dense<0x7F800000> : vector<8xf32>
    %1315 = vector.multi_reduction <minimumf>, %1314, %cst_289 [0] : vector<8x8xf32> to vector<8xf32>
    %1316 = vector.shape_cast %1315 : vector<8xf32> to vector<1x8xf32>
    %1317 = arith.addf %1310, %1226 : vector<1x8xf32>
    %1318 = vector.broadcast %1317 : vector<1x8xf32> to vector<8x8xf32>
    %1319 = arith.mulf %1318, %281 : vector<8x8xf32>
    %cst_290 = arith.constant dense<0.000000e+00> : vector<8xf32>
    %1320 = vector.multi_reduction <add>, %1319, %cst_290 [1] : vector<8x8xf32> to vector<8xf32>
    %1321 = vector.shape_cast %1320 : vector<8xf32> to vector<8x1xf32>
    %1322 = vector.broadcast %1321 : vector<8x1xf32> to vector<8x8xf32>
    %1323 = arith.addf %1322, %1219 : vector<8x8xf32>
    %cst_291 = arith.constant dense<0xFF800000> : vector<8xf32>
    %1324 = vector.multi_reduction <maximumf>, %1323, %cst_291 [0] : vector<8x8xf32> to vector<8xf32>
    %1325 = vector.shape_cast %1324 : vector<8xf32> to vector<1x8xf32>
    %1326 = vector.broadcast %1325 : vector<1x8xf32> to vector<8x8xf32>
    %1327 = arith.cmpf oeq, %1323, %1326 : vector<8x8xf32>
    %cst_292 = arith.constant 8.000000e+00 : f32
    %1328 = vector.broadcast %cst_292 : f32 to vector<8x8xf32>
    %1329 = arith.select %1327, %276, %1328 : vector<8x8xi1>, vector<8x8xf32>
    %cst_293 = arith.constant dense<0x7F800000> : vector<8xf32>
    %1330 = vector.multi_reduction <minimumf>, %1329, %cst_293 [0] : vector<8x8xf32> to vector<8xf32>
    %1331 = vector.shape_cast %1330 : vector<8xf32> to vector<1x8xf32>
    %1332 = arith.addf %1325, %1227 : vector<1x8xf32>
    %cst_294 = arith.constant dense<0xFF800000> : vector<1xf32>
    %1333 = vector.multi_reduction <maximumf>, %1332, %cst_294 [1] : vector<1x8xf32> to vector<1xf32>
    %1334 = vector.shape_cast %1333 : vector<1xf32> to vector<1x1xf32>
    %1335 = vector.broadcast %1334 : vector<1x1xf32> to vector<1x8xf32>
    %1336 = arith.cmpf oeq, %1332, %1335 : vector<1x8xf32>
    %cst_295 = arith.constant 8.000000e+00 : f32
    %1337 = vector.broadcast %cst_295 : f32 to vector<1x8xf32>
    %1338 = arith.select %1336, %274, %1337 : vector<1x8xi1>, vector<1x8xf32>
    %cst_296 = arith.constant dense<0x7F800000> : vector<1xf32>
    %1339 = vector.multi_reduction <minimumf>, %1338, %cst_296 [1] : vector<1x8xf32> to vector<1xf32>
    %1340 = vector.shape_cast %1339 : vector<1xf32> to vector<1x1xf32>
    %c7_i32_297 = arith.constant 7 : i32
    %1341 = vector.broadcast %c7_i32_297 : i32 to vector<1x8xi32>
    %1342 = arith.cmpi eq, %282, %1341 : vector<1x8xi32>
    %1343 = arith.extui %1342 : vector<1x8xi1> to vector<1x8xi32>
    %1344 = arith.sitofp %1343 : vector<1x8xi32> to vector<1x8xf32>
    %1345 = vector.broadcast %1340 : vector<1x1xf32> to vector<1x8xf32>
    %1346 = arith.mulf %1344, %1345 : vector<1x8xf32>
    %1347 = vector.broadcast %1340 : vector<1x1xf32> to vector<1x8xf32>
    %1348 = arith.cmpf oeq, %274, %1347 : vector<1x8xf32>
    %1349 = arith.extui %1348 : vector<1x8xi1> to vector<1x8xi32>
    %1350 = arith.sitofp %1349 : vector<1x8xi32> to vector<1x8xf32>
    %1351 = arith.mulf %1331, %1350 : vector<1x8xf32>
    %cst_298 = arith.constant dense<0.000000e+00> : vector<1xf32>
    %1352 = vector.multi_reduction <add>, %1351, %cst_298 [1] : vector<1x8xf32> to vector<1xf32>
    %1353 = vector.shape_cast %1352 : vector<1xf32> to vector<1x1xf32>
    %c6_i32_299 = arith.constant 6 : i32
    %1354 = vector.broadcast %c6_i32_299 : i32 to vector<1x8xi32>
    %1355 = arith.cmpi eq, %282, %1354 : vector<1x8xi32>
    %1356 = arith.extui %1355 : vector<1x8xi1> to vector<1x8xi32>
    %1357 = arith.sitofp %1356 : vector<1x8xi32> to vector<1x8xf32>
    %1358 = vector.broadcast %1353 : vector<1x1xf32> to vector<1x8xf32>
    %1359 = arith.mulf %1357, %1358 : vector<1x8xf32>
    %1360 = arith.addf %1346, %1359 : vector<1x8xf32>
    %1361 = vector.broadcast %1353 : vector<1x1xf32> to vector<1x8xf32>
    %1362 = arith.cmpf oeq, %274, %1361 : vector<1x8xf32>
    %1363 = arith.extui %1362 : vector<1x8xi1> to vector<1x8xi32>
    %1364 = arith.sitofp %1363 : vector<1x8xi32> to vector<1x8xf32>
    %1365 = arith.mulf %1316, %1364 : vector<1x8xf32>
    %cst_300 = arith.constant dense<0.000000e+00> : vector<1xf32>
    %1366 = vector.multi_reduction <add>, %1365, %cst_300 [1] : vector<1x8xf32> to vector<1xf32>
    %1367 = vector.shape_cast %1366 : vector<1xf32> to vector<1x1xf32>
    %c5_i32_301 = arith.constant 5 : i32
    %1368 = vector.broadcast %c5_i32_301 : i32 to vector<1x8xi32>
    %1369 = arith.cmpi eq, %282, %1368 : vector<1x8xi32>
    %1370 = arith.extui %1369 : vector<1x8xi1> to vector<1x8xi32>
    %1371 = arith.sitofp %1370 : vector<1x8xi32> to vector<1x8xf32>
    %1372 = vector.broadcast %1367 : vector<1x1xf32> to vector<1x8xf32>
    %1373 = arith.mulf %1371, %1372 : vector<1x8xf32>
    %1374 = arith.addf %1360, %1373 : vector<1x8xf32>
    %1375 = vector.broadcast %1367 : vector<1x1xf32> to vector<1x8xf32>
    %1376 = arith.cmpf oeq, %274, %1375 : vector<1x8xf32>
    %1377 = arith.extui %1376 : vector<1x8xi1> to vector<1x8xi32>
    %1378 = arith.sitofp %1377 : vector<1x8xi32> to vector<1x8xf32>
    %1379 = arith.mulf %1301, %1378 : vector<1x8xf32>
    %cst_302 = arith.constant dense<0.000000e+00> : vector<1xf32>
    %1380 = vector.multi_reduction <add>, %1379, %cst_302 [1] : vector<1x8xf32> to vector<1xf32>
    %1381 = vector.shape_cast %1380 : vector<1xf32> to vector<1x1xf32>
    %c4_i32_303 = arith.constant 4 : i32
    %1382 = vector.broadcast %c4_i32_303 : i32 to vector<1x8xi32>
    %1383 = arith.cmpi eq, %282, %1382 : vector<1x8xi32>
    %1384 = arith.extui %1383 : vector<1x8xi1> to vector<1x8xi32>
    %1385 = arith.sitofp %1384 : vector<1x8xi32> to vector<1x8xf32>
    %1386 = vector.broadcast %1381 : vector<1x1xf32> to vector<1x8xf32>
    %1387 = arith.mulf %1385, %1386 : vector<1x8xf32>
    %1388 = arith.addf %1374, %1387 : vector<1x8xf32>
    %1389 = vector.broadcast %1381 : vector<1x1xf32> to vector<1x8xf32>
    %1390 = arith.cmpf oeq, %274, %1389 : vector<1x8xf32>
    %1391 = arith.extui %1390 : vector<1x8xi1> to vector<1x8xi32>
    %1392 = arith.sitofp %1391 : vector<1x8xi32> to vector<1x8xf32>
    %1393 = arith.mulf %1286, %1392 : vector<1x8xf32>
    %cst_304 = arith.constant dense<0.000000e+00> : vector<1xf32>
    %1394 = vector.multi_reduction <add>, %1393, %cst_304 [1] : vector<1x8xf32> to vector<1xf32>
    %1395 = vector.shape_cast %1394 : vector<1xf32> to vector<1x1xf32>
    %c3_i32_305 = arith.constant 3 : i32
    %1396 = vector.broadcast %c3_i32_305 : i32 to vector<1x8xi32>
    %1397 = arith.cmpi eq, %282, %1396 : vector<1x8xi32>
    %1398 = arith.extui %1397 : vector<1x8xi1> to vector<1x8xi32>
    %1399 = arith.sitofp %1398 : vector<1x8xi32> to vector<1x8xf32>
    %1400 = vector.broadcast %1395 : vector<1x1xf32> to vector<1x8xf32>
    %1401 = arith.mulf %1399, %1400 : vector<1x8xf32>
    %1402 = arith.addf %1388, %1401 : vector<1x8xf32>
    %1403 = vector.broadcast %1395 : vector<1x1xf32> to vector<1x8xf32>
    %1404 = arith.cmpf oeq, %274, %1403 : vector<1x8xf32>
    %1405 = arith.extui %1404 : vector<1x8xi1> to vector<1x8xi32>
    %1406 = arith.sitofp %1405 : vector<1x8xi32> to vector<1x8xf32>
    %1407 = arith.mulf %1271, %1406 : vector<1x8xf32>
    %cst_306 = arith.constant dense<0.000000e+00> : vector<1xf32>
    %1408 = vector.multi_reduction <add>, %1407, %cst_306 [1] : vector<1x8xf32> to vector<1xf32>
    %1409 = vector.shape_cast %1408 : vector<1xf32> to vector<1x1xf32>
    %c2_i32_307 = arith.constant 2 : i32
    %1410 = vector.broadcast %c2_i32_307 : i32 to vector<1x8xi32>
    %1411 = arith.cmpi eq, %282, %1410 : vector<1x8xi32>
    %1412 = arith.extui %1411 : vector<1x8xi1> to vector<1x8xi32>
    %1413 = arith.sitofp %1412 : vector<1x8xi32> to vector<1x8xf32>
    %1414 = vector.broadcast %1409 : vector<1x1xf32> to vector<1x8xf32>
    %1415 = arith.mulf %1413, %1414 : vector<1x8xf32>
    %1416 = arith.addf %1402, %1415 : vector<1x8xf32>
    %1417 = vector.broadcast %1409 : vector<1x1xf32> to vector<1x8xf32>
    %1418 = arith.cmpf oeq, %274, %1417 : vector<1x8xf32>
    %1419 = arith.extui %1418 : vector<1x8xi1> to vector<1x8xi32>
    %1420 = arith.sitofp %1419 : vector<1x8xi32> to vector<1x8xf32>
    %1421 = arith.mulf %1256, %1420 : vector<1x8xf32>
    %cst_308 = arith.constant dense<0.000000e+00> : vector<1xf32>
    %1422 = vector.multi_reduction <add>, %1421, %cst_308 [1] : vector<1x8xf32> to vector<1xf32>
    %1423 = vector.shape_cast %1422 : vector<1xf32> to vector<1x1xf32>
    %c1_i32_309 = arith.constant 1 : i32
    %1424 = vector.broadcast %c1_i32_309 : i32 to vector<1x8xi32>
    %1425 = arith.cmpi eq, %282, %1424 : vector<1x8xi32>
    %1426 = arith.extui %1425 : vector<1x8xi1> to vector<1x8xi32>
    %1427 = arith.sitofp %1426 : vector<1x8xi32> to vector<1x8xf32>
    %1428 = vector.broadcast %1423 : vector<1x1xf32> to vector<1x8xf32>
    %1429 = arith.mulf %1427, %1428 : vector<1x8xf32>
    %1430 = arith.addf %1416, %1429 : vector<1x8xf32>
    %1431 = vector.broadcast %1423 : vector<1x1xf32> to vector<1x8xf32>
    %1432 = arith.cmpf oeq, %274, %1431 : vector<1x8xf32>
    %1433 = arith.extui %1432 : vector<1x8xi1> to vector<1x8xi32>
    %1434 = arith.sitofp %1433 : vector<1x8xi32> to vector<1x8xf32>
    %1435 = arith.mulf %1241, %1434 : vector<1x8xf32>
    %cst_310 = arith.constant dense<0.000000e+00> : vector<1xf32>
    %1436 = vector.multi_reduction <add>, %1435, %cst_310 [1] : vector<1x8xf32> to vector<1xf32>
    %1437 = vector.shape_cast %1436 : vector<1xf32> to vector<1x1xf32>
    %c0_i32_311 = arith.constant 0 : i32
    %1438 = vector.broadcast %c0_i32_311 : i32 to vector<1x8xi32>
    %1439 = arith.cmpi eq, %282, %1438 : vector<1x8xi32>
    %1440 = arith.extui %1439 : vector<1x8xi1> to vector<1x8xi32>
    %1441 = arith.sitofp %1440 : vector<1x8xi32> to vector<1x8xf32>
    %1442 = vector.broadcast %1437 : vector<1x1xf32> to vector<1x8xf32>
    %1443 = arith.mulf %1441, %1442 : vector<1x8xf32>
    %1444 = arith.addf %1430, %1443 : vector<1x8xf32>
    %c4_i32_312 = arith.constant 4 : i32
    %1445 = vector.broadcast %c4_i32_312 : i32 to vector<6x1xi32>
    %1446 = arith.cmpi eq, %283, %1445 : vector<6x1xi32>
    %1447 = arith.extui %1446 : vector<6x1xi1> to vector<6x1xi32>
    %1448 = arith.sitofp %1447 : vector<6x1xi32> to vector<6x1xf32>
    %1449 = vector.broadcast %1448 : vector<6x1xf32> to vector<6x8xf32>
    %1450 = vector.broadcast %1444 : vector<1x8xf32> to vector<6x8xf32>
    %1451 = arith.mulf %1449, %1450 : vector<6x8xf32>
    %1452 = arith.addf %1218, %1451 : vector<6x8xf32>
    %1453 = vector.extract_strided_slice %270 {offsets = [1, 16], sizes = [1, 8], strides = [1, 1]} : vector<16x24xf32> to vector<1x8xf32>
    %1454 = vector.extract_strided_slice %270 {offsets = [3, 16], sizes = [1, 8], strides = [1, 1]} : vector<16x24xf32> to vector<1x8xf32>
    %1455 = vector.extract_strided_slice %270 {offsets = [5, 16], sizes = [1, 8], strides = [1, 1]} : vector<16x24xf32> to vector<1x8xf32>
    %1456 = vector.extract_strided_slice %270 {offsets = [7, 16], sizes = [1, 8], strides = [1, 1]} : vector<16x24xf32> to vector<1x8xf32>
    %1457 = vector.extract_strided_slice %270 {offsets = [9, 16], sizes = [1, 8], strides = [1, 1]} : vector<16x24xf32> to vector<1x8xf32>
    %1458 = vector.extract_strided_slice %270 {offsets = [11, 16], sizes = [1, 8], strides = [1, 1]} : vector<16x24xf32> to vector<1x8xf32>
    %1459 = vector.extract_strided_slice %270 {offsets = [13, 16], sizes = [1, 8], strides = [1, 1]} : vector<16x24xf32> to vector<1x8xf32>
    %1460 = vector.extract_strided_slice %270 {offsets = [15, 16], sizes = [1, 8], strides = [1, 1]} : vector<16x24xf32> to vector<1x8xf32>
    %1461 = vector.broadcast %1453 : vector<1x8xf32> to vector<8x8xf32>
    %1462 = arith.mulf %1461, %281 : vector<8x8xf32>
    %cst_313 = arith.constant dense<0.000000e+00> : vector<8xf32>
    %1463 = vector.multi_reduction <add>, %1462, %cst_313 [1] : vector<8x8xf32> to vector<8xf32>
    %1464 = vector.shape_cast %1463 : vector<8xf32> to vector<8x1xf32>
    %1465 = vector.broadcast %1464 : vector<8x1xf32> to vector<8x8xf32>
    %1466 = arith.addf %1465, %1219 : vector<8x8xf32>
    %cst_314 = arith.constant dense<0xFF800000> : vector<8xf32>
    %1467 = vector.multi_reduction <maximumf>, %1466, %cst_314 [0] : vector<8x8xf32> to vector<8xf32>
    %1468 = vector.shape_cast %1467 : vector<8xf32> to vector<1x8xf32>
    %1469 = vector.broadcast %1468 : vector<1x8xf32> to vector<8x8xf32>
    %1470 = arith.cmpf oeq, %1466, %1469 : vector<8x8xf32>
    %cst_315 = arith.constant 8.000000e+00 : f32
    %1471 = vector.broadcast %cst_315 : f32 to vector<8x8xf32>
    %1472 = arith.select %1470, %276, %1471 : vector<8x8xi1>, vector<8x8xf32>
    %cst_316 = arith.constant dense<0x7F800000> : vector<8xf32>
    %1473 = vector.multi_reduction <minimumf>, %1472, %cst_316 [0] : vector<8x8xf32> to vector<8xf32>
    %1474 = vector.shape_cast %1473 : vector<8xf32> to vector<1x8xf32>
    %1475 = arith.addf %1468, %1454 : vector<1x8xf32>
    %1476 = vector.broadcast %1475 : vector<1x8xf32> to vector<8x8xf32>
    %1477 = arith.mulf %1476, %281 : vector<8x8xf32>
    %cst_317 = arith.constant dense<0.000000e+00> : vector<8xf32>
    %1478 = vector.multi_reduction <add>, %1477, %cst_317 [1] : vector<8x8xf32> to vector<8xf32>
    %1479 = vector.shape_cast %1478 : vector<8xf32> to vector<8x1xf32>
    %1480 = vector.broadcast %1479 : vector<8x1xf32> to vector<8x8xf32>
    %1481 = arith.addf %1480, %1219 : vector<8x8xf32>
    %cst_318 = arith.constant dense<0xFF800000> : vector<8xf32>
    %1482 = vector.multi_reduction <maximumf>, %1481, %cst_318 [0] : vector<8x8xf32> to vector<8xf32>
    %1483 = vector.shape_cast %1482 : vector<8xf32> to vector<1x8xf32>
    %1484 = vector.broadcast %1483 : vector<1x8xf32> to vector<8x8xf32>
    %1485 = arith.cmpf oeq, %1481, %1484 : vector<8x8xf32>
    %cst_319 = arith.constant 8.000000e+00 : f32
    %1486 = vector.broadcast %cst_319 : f32 to vector<8x8xf32>
    %1487 = arith.select %1485, %276, %1486 : vector<8x8xi1>, vector<8x8xf32>
    %cst_320 = arith.constant dense<0x7F800000> : vector<8xf32>
    %1488 = vector.multi_reduction <minimumf>, %1487, %cst_320 [0] : vector<8x8xf32> to vector<8xf32>
    %1489 = vector.shape_cast %1488 : vector<8xf32> to vector<1x8xf32>
    %1490 = arith.addf %1483, %1455 : vector<1x8xf32>
    %1491 = vector.broadcast %1490 : vector<1x8xf32> to vector<8x8xf32>
    %1492 = arith.mulf %1491, %281 : vector<8x8xf32>
    %cst_321 = arith.constant dense<0.000000e+00> : vector<8xf32>
    %1493 = vector.multi_reduction <add>, %1492, %cst_321 [1] : vector<8x8xf32> to vector<8xf32>
    %1494 = vector.shape_cast %1493 : vector<8xf32> to vector<8x1xf32>
    %1495 = vector.broadcast %1494 : vector<8x1xf32> to vector<8x8xf32>
    %1496 = arith.addf %1495, %1219 : vector<8x8xf32>
    %cst_322 = arith.constant dense<0xFF800000> : vector<8xf32>
    %1497 = vector.multi_reduction <maximumf>, %1496, %cst_322 [0] : vector<8x8xf32> to vector<8xf32>
    %1498 = vector.shape_cast %1497 : vector<8xf32> to vector<1x8xf32>
    %1499 = vector.broadcast %1498 : vector<1x8xf32> to vector<8x8xf32>
    %1500 = arith.cmpf oeq, %1496, %1499 : vector<8x8xf32>
    %cst_323 = arith.constant 8.000000e+00 : f32
    %1501 = vector.broadcast %cst_323 : f32 to vector<8x8xf32>
    %1502 = arith.select %1500, %276, %1501 : vector<8x8xi1>, vector<8x8xf32>
    %cst_324 = arith.constant dense<0x7F800000> : vector<8xf32>
    %1503 = vector.multi_reduction <minimumf>, %1502, %cst_324 [0] : vector<8x8xf32> to vector<8xf32>
    %1504 = vector.shape_cast %1503 : vector<8xf32> to vector<1x8xf32>
    %1505 = arith.addf %1498, %1456 : vector<1x8xf32>
    %1506 = vector.broadcast %1505 : vector<1x8xf32> to vector<8x8xf32>
    %1507 = arith.mulf %1506, %281 : vector<8x8xf32>
    %cst_325 = arith.constant dense<0.000000e+00> : vector<8xf32>
    %1508 = vector.multi_reduction <add>, %1507, %cst_325 [1] : vector<8x8xf32> to vector<8xf32>
    %1509 = vector.shape_cast %1508 : vector<8xf32> to vector<8x1xf32>
    %1510 = vector.broadcast %1509 : vector<8x1xf32> to vector<8x8xf32>
    %1511 = arith.addf %1510, %1219 : vector<8x8xf32>
    %cst_326 = arith.constant dense<0xFF800000> : vector<8xf32>
    %1512 = vector.multi_reduction <maximumf>, %1511, %cst_326 [0] : vector<8x8xf32> to vector<8xf32>
    %1513 = vector.shape_cast %1512 : vector<8xf32> to vector<1x8xf32>
    %1514 = vector.broadcast %1513 : vector<1x8xf32> to vector<8x8xf32>
    %1515 = arith.cmpf oeq, %1511, %1514 : vector<8x8xf32>
    %cst_327 = arith.constant 8.000000e+00 : f32
    %1516 = vector.broadcast %cst_327 : f32 to vector<8x8xf32>
    %1517 = arith.select %1515, %276, %1516 : vector<8x8xi1>, vector<8x8xf32>
    %cst_328 = arith.constant dense<0x7F800000> : vector<8xf32>
    %1518 = vector.multi_reduction <minimumf>, %1517, %cst_328 [0] : vector<8x8xf32> to vector<8xf32>
    %1519 = vector.shape_cast %1518 : vector<8xf32> to vector<1x8xf32>
    %1520 = arith.addf %1513, %1457 : vector<1x8xf32>
    %1521 = vector.broadcast %1520 : vector<1x8xf32> to vector<8x8xf32>
    %1522 = arith.mulf %1521, %281 : vector<8x8xf32>
    %cst_329 = arith.constant dense<0.000000e+00> : vector<8xf32>
    %1523 = vector.multi_reduction <add>, %1522, %cst_329 [1] : vector<8x8xf32> to vector<8xf32>
    %1524 = vector.shape_cast %1523 : vector<8xf32> to vector<8x1xf32>
    %1525 = vector.broadcast %1524 : vector<8x1xf32> to vector<8x8xf32>
    %1526 = arith.addf %1525, %1219 : vector<8x8xf32>
    %cst_330 = arith.constant dense<0xFF800000> : vector<8xf32>
    %1527 = vector.multi_reduction <maximumf>, %1526, %cst_330 [0] : vector<8x8xf32> to vector<8xf32>
    %1528 = vector.shape_cast %1527 : vector<8xf32> to vector<1x8xf32>
    %1529 = vector.broadcast %1528 : vector<1x8xf32> to vector<8x8xf32>
    %1530 = arith.cmpf oeq, %1526, %1529 : vector<8x8xf32>
    %cst_331 = arith.constant 8.000000e+00 : f32
    %1531 = vector.broadcast %cst_331 : f32 to vector<8x8xf32>
    %1532 = arith.select %1530, %276, %1531 : vector<8x8xi1>, vector<8x8xf32>
    %cst_332 = arith.constant dense<0x7F800000> : vector<8xf32>
    %1533 = vector.multi_reduction <minimumf>, %1532, %cst_332 [0] : vector<8x8xf32> to vector<8xf32>
    %1534 = vector.shape_cast %1533 : vector<8xf32> to vector<1x8xf32>
    %1535 = arith.addf %1528, %1458 : vector<1x8xf32>
    %1536 = vector.broadcast %1535 : vector<1x8xf32> to vector<8x8xf32>
    %1537 = arith.mulf %1536, %281 : vector<8x8xf32>
    %cst_333 = arith.constant dense<0.000000e+00> : vector<8xf32>
    %1538 = vector.multi_reduction <add>, %1537, %cst_333 [1] : vector<8x8xf32> to vector<8xf32>
    %1539 = vector.shape_cast %1538 : vector<8xf32> to vector<8x1xf32>
    %1540 = vector.broadcast %1539 : vector<8x1xf32> to vector<8x8xf32>
    %1541 = arith.addf %1540, %1219 : vector<8x8xf32>
    %cst_334 = arith.constant dense<0xFF800000> : vector<8xf32>
    %1542 = vector.multi_reduction <maximumf>, %1541, %cst_334 [0] : vector<8x8xf32> to vector<8xf32>
    %1543 = vector.shape_cast %1542 : vector<8xf32> to vector<1x8xf32>
    %1544 = vector.broadcast %1543 : vector<1x8xf32> to vector<8x8xf32>
    %1545 = arith.cmpf oeq, %1541, %1544 : vector<8x8xf32>
    %cst_335 = arith.constant 8.000000e+00 : f32
    %1546 = vector.broadcast %cst_335 : f32 to vector<8x8xf32>
    %1547 = arith.select %1545, %276, %1546 : vector<8x8xi1>, vector<8x8xf32>
    %cst_336 = arith.constant dense<0x7F800000> : vector<8xf32>
    %1548 = vector.multi_reduction <minimumf>, %1547, %cst_336 [0] : vector<8x8xf32> to vector<8xf32>
    %1549 = vector.shape_cast %1548 : vector<8xf32> to vector<1x8xf32>
    %1550 = arith.addf %1543, %1459 : vector<1x8xf32>
    %1551 = vector.broadcast %1550 : vector<1x8xf32> to vector<8x8xf32>
    %1552 = arith.mulf %1551, %281 : vector<8x8xf32>
    %cst_337 = arith.constant dense<0.000000e+00> : vector<8xf32>
    %1553 = vector.multi_reduction <add>, %1552, %cst_337 [1] : vector<8x8xf32> to vector<8xf32>
    %1554 = vector.shape_cast %1553 : vector<8xf32> to vector<8x1xf32>
    %1555 = vector.broadcast %1554 : vector<8x1xf32> to vector<8x8xf32>
    %1556 = arith.addf %1555, %1219 : vector<8x8xf32>
    %cst_338 = arith.constant dense<0xFF800000> : vector<8xf32>
    %1557 = vector.multi_reduction <maximumf>, %1556, %cst_338 [0] : vector<8x8xf32> to vector<8xf32>
    %1558 = vector.shape_cast %1557 : vector<8xf32> to vector<1x8xf32>
    %1559 = vector.broadcast %1558 : vector<1x8xf32> to vector<8x8xf32>
    %1560 = arith.cmpf oeq, %1556, %1559 : vector<8x8xf32>
    %cst_339 = arith.constant 8.000000e+00 : f32
    %1561 = vector.broadcast %cst_339 : f32 to vector<8x8xf32>
    %1562 = arith.select %1560, %276, %1561 : vector<8x8xi1>, vector<8x8xf32>
    %cst_340 = arith.constant dense<0x7F800000> : vector<8xf32>
    %1563 = vector.multi_reduction <minimumf>, %1562, %cst_340 [0] : vector<8x8xf32> to vector<8xf32>
    %1564 = vector.shape_cast %1563 : vector<8xf32> to vector<1x8xf32>
    %1565 = arith.addf %1558, %1460 : vector<1x8xf32>
    %cst_341 = arith.constant dense<0xFF800000> : vector<1xf32>
    %1566 = vector.multi_reduction <maximumf>, %1565, %cst_341 [1] : vector<1x8xf32> to vector<1xf32>
    %1567 = vector.shape_cast %1566 : vector<1xf32> to vector<1x1xf32>
    %1568 = vector.broadcast %1567 : vector<1x1xf32> to vector<1x8xf32>
    %1569 = arith.cmpf oeq, %1565, %1568 : vector<1x8xf32>
    %cst_342 = arith.constant 8.000000e+00 : f32
    %1570 = vector.broadcast %cst_342 : f32 to vector<1x8xf32>
    %1571 = arith.select %1569, %274, %1570 : vector<1x8xi1>, vector<1x8xf32>
    %cst_343 = arith.constant dense<0x7F800000> : vector<1xf32>
    %1572 = vector.multi_reduction <minimumf>, %1571, %cst_343 [1] : vector<1x8xf32> to vector<1xf32>
    %1573 = vector.shape_cast %1572 : vector<1xf32> to vector<1x1xf32>
    %c7_i32_344 = arith.constant 7 : i32
    %1574 = vector.broadcast %c7_i32_344 : i32 to vector<1x8xi32>
    %1575 = arith.cmpi eq, %282, %1574 : vector<1x8xi32>
    %1576 = arith.extui %1575 : vector<1x8xi1> to vector<1x8xi32>
    %1577 = arith.sitofp %1576 : vector<1x8xi32> to vector<1x8xf32>
    %1578 = vector.broadcast %1573 : vector<1x1xf32> to vector<1x8xf32>
    %1579 = arith.mulf %1577, %1578 : vector<1x8xf32>
    %1580 = vector.broadcast %1573 : vector<1x1xf32> to vector<1x8xf32>
    %1581 = arith.cmpf oeq, %274, %1580 : vector<1x8xf32>
    %1582 = arith.extui %1581 : vector<1x8xi1> to vector<1x8xi32>
    %1583 = arith.sitofp %1582 : vector<1x8xi32> to vector<1x8xf32>
    %1584 = arith.mulf %1564, %1583 : vector<1x8xf32>
    %cst_345 = arith.constant dense<0.000000e+00> : vector<1xf32>
    %1585 = vector.multi_reduction <add>, %1584, %cst_345 [1] : vector<1x8xf32> to vector<1xf32>
    %1586 = vector.shape_cast %1585 : vector<1xf32> to vector<1x1xf32>
    %c6_i32_346 = arith.constant 6 : i32
    %1587 = vector.broadcast %c6_i32_346 : i32 to vector<1x8xi32>
    %1588 = arith.cmpi eq, %282, %1587 : vector<1x8xi32>
    %1589 = arith.extui %1588 : vector<1x8xi1> to vector<1x8xi32>
    %1590 = arith.sitofp %1589 : vector<1x8xi32> to vector<1x8xf32>
    %1591 = vector.broadcast %1586 : vector<1x1xf32> to vector<1x8xf32>
    %1592 = arith.mulf %1590, %1591 : vector<1x8xf32>
    %1593 = arith.addf %1579, %1592 : vector<1x8xf32>
    %1594 = vector.broadcast %1586 : vector<1x1xf32> to vector<1x8xf32>
    %1595 = arith.cmpf oeq, %274, %1594 : vector<1x8xf32>
    %1596 = arith.extui %1595 : vector<1x8xi1> to vector<1x8xi32>
    %1597 = arith.sitofp %1596 : vector<1x8xi32> to vector<1x8xf32>
    %1598 = arith.mulf %1549, %1597 : vector<1x8xf32>
    %cst_347 = arith.constant dense<0.000000e+00> : vector<1xf32>
    %1599 = vector.multi_reduction <add>, %1598, %cst_347 [1] : vector<1x8xf32> to vector<1xf32>
    %1600 = vector.shape_cast %1599 : vector<1xf32> to vector<1x1xf32>
    %c5_i32_348 = arith.constant 5 : i32
    %1601 = vector.broadcast %c5_i32_348 : i32 to vector<1x8xi32>
    %1602 = arith.cmpi eq, %282, %1601 : vector<1x8xi32>
    %1603 = arith.extui %1602 : vector<1x8xi1> to vector<1x8xi32>
    %1604 = arith.sitofp %1603 : vector<1x8xi32> to vector<1x8xf32>
    %1605 = vector.broadcast %1600 : vector<1x1xf32> to vector<1x8xf32>
    %1606 = arith.mulf %1604, %1605 : vector<1x8xf32>
    %1607 = arith.addf %1593, %1606 : vector<1x8xf32>
    %1608 = vector.broadcast %1600 : vector<1x1xf32> to vector<1x8xf32>
    %1609 = arith.cmpf oeq, %274, %1608 : vector<1x8xf32>
    %1610 = arith.extui %1609 : vector<1x8xi1> to vector<1x8xi32>
    %1611 = arith.sitofp %1610 : vector<1x8xi32> to vector<1x8xf32>
    %1612 = arith.mulf %1534, %1611 : vector<1x8xf32>
    %cst_349 = arith.constant dense<0.000000e+00> : vector<1xf32>
    %1613 = vector.multi_reduction <add>, %1612, %cst_349 [1] : vector<1x8xf32> to vector<1xf32>
    %1614 = vector.shape_cast %1613 : vector<1xf32> to vector<1x1xf32>
    %c4_i32_350 = arith.constant 4 : i32
    %1615 = vector.broadcast %c4_i32_350 : i32 to vector<1x8xi32>
    %1616 = arith.cmpi eq, %282, %1615 : vector<1x8xi32>
    %1617 = arith.extui %1616 : vector<1x8xi1> to vector<1x8xi32>
    %1618 = arith.sitofp %1617 : vector<1x8xi32> to vector<1x8xf32>
    %1619 = vector.broadcast %1614 : vector<1x1xf32> to vector<1x8xf32>
    %1620 = arith.mulf %1618, %1619 : vector<1x8xf32>
    %1621 = arith.addf %1607, %1620 : vector<1x8xf32>
    %1622 = vector.broadcast %1614 : vector<1x1xf32> to vector<1x8xf32>
    %1623 = arith.cmpf oeq, %274, %1622 : vector<1x8xf32>
    %1624 = arith.extui %1623 : vector<1x8xi1> to vector<1x8xi32>
    %1625 = arith.sitofp %1624 : vector<1x8xi32> to vector<1x8xf32>
    %1626 = arith.mulf %1519, %1625 : vector<1x8xf32>
    %cst_351 = arith.constant dense<0.000000e+00> : vector<1xf32>
    %1627 = vector.multi_reduction <add>, %1626, %cst_351 [1] : vector<1x8xf32> to vector<1xf32>
    %1628 = vector.shape_cast %1627 : vector<1xf32> to vector<1x1xf32>
    %c3_i32_352 = arith.constant 3 : i32
    %1629 = vector.broadcast %c3_i32_352 : i32 to vector<1x8xi32>
    %1630 = arith.cmpi eq, %282, %1629 : vector<1x8xi32>
    %1631 = arith.extui %1630 : vector<1x8xi1> to vector<1x8xi32>
    %1632 = arith.sitofp %1631 : vector<1x8xi32> to vector<1x8xf32>
    %1633 = vector.broadcast %1628 : vector<1x1xf32> to vector<1x8xf32>
    %1634 = arith.mulf %1632, %1633 : vector<1x8xf32>
    %1635 = arith.addf %1621, %1634 : vector<1x8xf32>
    %1636 = vector.broadcast %1628 : vector<1x1xf32> to vector<1x8xf32>
    %1637 = arith.cmpf oeq, %274, %1636 : vector<1x8xf32>
    %1638 = arith.extui %1637 : vector<1x8xi1> to vector<1x8xi32>
    %1639 = arith.sitofp %1638 : vector<1x8xi32> to vector<1x8xf32>
    %1640 = arith.mulf %1504, %1639 : vector<1x8xf32>
    %cst_353 = arith.constant dense<0.000000e+00> : vector<1xf32>
    %1641 = vector.multi_reduction <add>, %1640, %cst_353 [1] : vector<1x8xf32> to vector<1xf32>
    %1642 = vector.shape_cast %1641 : vector<1xf32> to vector<1x1xf32>
    %c2_i32_354 = arith.constant 2 : i32
    %1643 = vector.broadcast %c2_i32_354 : i32 to vector<1x8xi32>
    %1644 = arith.cmpi eq, %282, %1643 : vector<1x8xi32>
    %1645 = arith.extui %1644 : vector<1x8xi1> to vector<1x8xi32>
    %1646 = arith.sitofp %1645 : vector<1x8xi32> to vector<1x8xf32>
    %1647 = vector.broadcast %1642 : vector<1x1xf32> to vector<1x8xf32>
    %1648 = arith.mulf %1646, %1647 : vector<1x8xf32>
    %1649 = arith.addf %1635, %1648 : vector<1x8xf32>
    %1650 = vector.broadcast %1642 : vector<1x1xf32> to vector<1x8xf32>
    %1651 = arith.cmpf oeq, %274, %1650 : vector<1x8xf32>
    %1652 = arith.extui %1651 : vector<1x8xi1> to vector<1x8xi32>
    %1653 = arith.sitofp %1652 : vector<1x8xi32> to vector<1x8xf32>
    %1654 = arith.mulf %1489, %1653 : vector<1x8xf32>
    %cst_355 = arith.constant dense<0.000000e+00> : vector<1xf32>
    %1655 = vector.multi_reduction <add>, %1654, %cst_355 [1] : vector<1x8xf32> to vector<1xf32>
    %1656 = vector.shape_cast %1655 : vector<1xf32> to vector<1x1xf32>
    %c1_i32_356 = arith.constant 1 : i32
    %1657 = vector.broadcast %c1_i32_356 : i32 to vector<1x8xi32>
    %1658 = arith.cmpi eq, %282, %1657 : vector<1x8xi32>
    %1659 = arith.extui %1658 : vector<1x8xi1> to vector<1x8xi32>
    %1660 = arith.sitofp %1659 : vector<1x8xi32> to vector<1x8xf32>
    %1661 = vector.broadcast %1656 : vector<1x1xf32> to vector<1x8xf32>
    %1662 = arith.mulf %1660, %1661 : vector<1x8xf32>
    %1663 = arith.addf %1649, %1662 : vector<1x8xf32>
    %1664 = vector.broadcast %1656 : vector<1x1xf32> to vector<1x8xf32>
    %1665 = arith.cmpf oeq, %274, %1664 : vector<1x8xf32>
    %1666 = arith.extui %1665 : vector<1x8xi1> to vector<1x8xi32>
    %1667 = arith.sitofp %1666 : vector<1x8xi32> to vector<1x8xf32>
    %1668 = arith.mulf %1474, %1667 : vector<1x8xf32>
    %cst_357 = arith.constant dense<0.000000e+00> : vector<1xf32>
    %1669 = vector.multi_reduction <add>, %1668, %cst_357 [1] : vector<1x8xf32> to vector<1xf32>
    %1670 = vector.shape_cast %1669 : vector<1xf32> to vector<1x1xf32>
    %c0_i32_358 = arith.constant 0 : i32
    %1671 = vector.broadcast %c0_i32_358 : i32 to vector<1x8xi32>
    %1672 = arith.cmpi eq, %282, %1671 : vector<1x8xi32>
    %1673 = arith.extui %1672 : vector<1x8xi1> to vector<1x8xi32>
    %1674 = arith.sitofp %1673 : vector<1x8xi32> to vector<1x8xf32>
    %1675 = vector.broadcast %1670 : vector<1x1xf32> to vector<1x8xf32>
    %1676 = arith.mulf %1674, %1675 : vector<1x8xf32>
    %1677 = arith.addf %1663, %1676 : vector<1x8xf32>
    %c5_i32_359 = arith.constant 5 : i32
    %1678 = vector.broadcast %c5_i32_359 : i32 to vector<6x1xi32>
    %1679 = arith.cmpi eq, %283, %1678 : vector<6x1xi32>
    %1680 = arith.extui %1679 : vector<6x1xi1> to vector<6x1xi32>
    %1681 = arith.sitofp %1680 : vector<6x1xi32> to vector<6x1xf32>
    %1682 = vector.broadcast %1681 : vector<6x1xf32> to vector<6x8xf32>
    %1683 = vector.broadcast %1677 : vector<1x8xf32> to vector<6x8xf32>
    %1684 = arith.mulf %1682, %1683 : vector<6x8xf32>
    %1685 = arith.addf %1452, %1684 : vector<6x8xf32>
    %1686 = arith.fptosi %1685 : vector<6x8xf32> to vector<6x8xi32>
    %c0_360 = arith.constant 0 : index
    %c0_361 = arith.constant 0 : index
    %1687 = vector.load %arg8[%c0_360, %c0_361] : memref<6x8xi32, #tpu.memory_space<vmem>>, vector<6x8xi32>
    tpu.vector_store %arg8[%c0_360, %c0_361], %1686 {strides = array<i32>} : memref<6x8xi32, #tpu.memory_space<vmem>>, vector<6x8xi32>,
    return
  }
}

</mosaic_0001>

<bundles_post_ra>
// kernel: science_ie_tagger_forward.1
= control target key start
LH: loop header
LB: loop body
LE: loop exit
PB: predicated region body
PF: predicated region fallthrough
CT: control target
= control target key end

     0   :  { %vm39_vm0 = vcmask 130048   ;;  %v3189_v0 = vmov 0.0|0.0   ;;  %vm3190_vm1 = vmmov 0   ;;  %v4807_v4 = vmov 0.0   ;;  %s3192_s20 = smov 64   ;;  %s3195_s29 = smov 16   ;;  %s4796_s1 = inlined_call_operand.vmem [shape: f32[16,128], index: 1, kind: input, shape index: {}]   ;;  %s4797_s2 = inlined_call_operand.vmem [shape: f32[32,128], index: 2, kind: input, shape index: {}]   ;;  %s4798_s0 = inlined_call_operand.vmem [shape: f32[16,16], index: 0, kind: input, shape index: {}]   ;;  %s4799_s3 = inlined_call_operand.vmem [shape: f32[1,128], index: 3, kind: input, shape index: {}]   ;;  %s4800_s4 = inlined_call_operand.vmem [shape: f32[32,24], index: 4, kind: input, shape index: {}]   ;;  %s4801_s5 = inlined_call_operand.vmem [shape: f32[1,24], index: 5, kind: input, shape index: {}]   ;;  %s4802_s7 = inlined_call_operand.vmem [shape: f32[16,24], index: 7, kind: output, shape index: {0}]   ;;  %s4803_s6 = inlined_call_operand.vmem [shape: f32[24,8], index: 6, kind: input, shape index: {}]   ;;  %s4804_s8 = inlined_call_operand.vmem [shape: s32[6,8], index: 8, kind: output, shape index: {1}]  }
   0x1   :  { %3055 = vmatprep.subr.bf16.mxu1 %v3189_v0  ;;  %v30_v1 = vld [vmem:[%s4796_s1] sm:$0xff]  ;;  %v31_v2 = vld [vmem:[%s4796_s1 + $0x8] sm:$0xff]  ;;  %2960 = vmatprep.mubr.msk.f32.mxu1 %vm3190_vm1, %v4807_v4  ;;  %v123_v9 = vld [vmem:[%s4797_s2 + $0x10] sm:$0xff]  ;;  %vm227_vm2 = vcmask 254976   ;;  %vm125_vm3 = vcmask 261120   ;;  %vm335_vm4 = vcmask 257026  }
   0x2   :  { %v121_v3 = vld [vmem:[%s4797_s2] sm:$0xff]  ;;  %v3051_v5 = vpack.c.bf16 %v31_v2, %v30_v1  ;;  %v122_v6 = vld [vmem:[%s4797_s2 + $0x8] sm:$0xff]  ;;  %v124_v10 = vld [vmem:[%s4797_s2 + $0x18] sm:$0xff]  ;;  %vm557_vm5 = vcmask 261126   ;;  %vm446_vm6 = vcmask 259076   ;;  %vm1087_vm8 = vcmask 195584  }
   0x3   :  { %v28_v7 = vld [vmem:[%s4798_s0] sm:$0xff]  ;;  %v3261_v8 = vpack.c.bf16 %v122_v6, %v121_v3  ;;  %v29_v11 = vld [vmem:[%s4798_s0 + $0x8] sm:$0xff]  ;;  %v3274_v12 = vpack.c.bf16 %v124_v10, %v123_v9  ;;  %s3196_s13 = smov 120   ;;  %s3197_s14 = smov 112   ;;  %vm1107_vm9 = vcmask 64512   ;;  %vm1573_vm14 = vcmask 64519  }
   0x4   :  { %2949 = vmatprep.mubr.msk.f32.mxu0 %vm39_vm0, %v28_v7  ;;  %3052 = vmatprep.subr.bf16.mxu0 %v3051_v5  ;;  %v2825_v13 = vld [vmem:[%s4799_s3] ss:$0 sm:$0xff]  ;;  %s3193_s3 = smov 32   ;;  %vm1285_vm13 = vcmask 63494   ;;  %vm1870_vm11 = vcmask 57344  }
   0x5   :  { %3057 = vmatpush3.bf16.msra.mxu1 %v3261_v8  ;;  %3054 = vmatpush3.bf16.msra.mxu0 %v3051_v5 }
   0x6   :  { %3058 = vmatprep.subr.bf16.mxu1 %v3189_v0  ;;  %3061 = vmatprep.subr.bf16.mxu0 %v3189_v0 }
   0x8   :  { %2950 = vmatmul.mubr.msk.f32.vlgmr.msra.gmra.mrb[0].mxu0 %vm39_vm0, %v29_v11 }
   0x9   :  { %3060 = vmatpush3.bf16.msra.mxu1 %v3274_v12  ;;  %3063 = vmatpush3.bf16.msra.mxu0 %v3261_v8 }
   0xa   :  { %3064 = vmatprep.subr.bf16.mxu0 %v3189_v0  ;;  %2971 = vmatprep.mubr.msk.f32.mxu0 %vm3190_vm1, %v4807_v4 }
   0xb   :  { %3067 = vmatprep.subr.bf16.mxu1 %v3189_v0 }
   0xc   :  { %2961 = vmatmul.mubr.f32.vlgmr.msra.gmra.mrb[0].mxu1 %v4807_v4 }
   0xd   :  { %3066 = vmatpush3.bf16.msra.mxu0 %v3274_v12  ;;  %3069 = vmatpush3.bf16.msra.mxu1 %v3261_v8 }
   0xe   :  { %3070 = vmatprep.subr.bf16.mxu1 %v3189_v0  ;;  %2982 = vmatprep.mubr.msk.f32.mxu1 %vm3190_vm1, %v4807_v4 }
   0xf   :  { %3073 = vmatprep.subr.bf16.mxu0 %v3189_v0 }
  0x11   :  { %3072 = vmatpush3.bf16.msra.mxu1 %v3274_v12 }
  0x12   :  { %3079 = vmatprep.subr.bf16.mxu1 %v3189_v0 }
  0xdb   :  { %v2951_v14 = vpop.f32.mrb[0].mxu0 }
  0xdc   :  { %v3297_v15 = vadd.f32 %v2951_v14, %v2825_v13  ;;  %v112_v16 = vpop.f32.mrb[1].mxu0 }
  0xdd   :  { %v3299_v17 = vadd.f32 %v2825_v13, %v112_v16 }
  0xdf   :  { %v195_v18 = vpop.f32.mrb[0].mxu1 }
  0xe0   :  { %v199_v19 = vadd.f32 %v195_v18, %v3299_v17  ;;  %v2962_v20 = vpop.f32.mrb[1].mxu1 }
  0xe2   :  { %3122 = vtanh.f32 %v199_v19  ;;  %v200_v22 = vsub.f32 0.0, %v199_v19 }
  0xe4   :  { %v201_v23 = vmul.f32 1.442695, %v200_v22 }
  0xe6   :  { %3124 = vpow2.f32 %v201_v23 }
  0xec   :  { %v3123_v21 = vpop.eup %3122 }
  0xed   :  { %208 = vrot.lane.b32.xlu0 %v3123_v21, %s3192_s20 }
  0xf0   :  { %v3125_v24 = vpop.eup %3124 }
  0xf1   :  { %v203_v25 = vadd.f32 1.0, %v3125_v24 }
  0xf3   :  { %3126 = vrcp.f32 %v203_v25 }
  0xfd   :  { %v3127_v26 = vpop.eup %3126 }
  0xfe   :  { %v206_v29 = vmul.f32 0.0, %v3127_v26 }
 0x15f   :  { %v209_v27 = vpop.permute.xlu0 %208 }
 0x160   :  { %v211_v28 = vmul.f32 %v3127_v26, %v209_v27 }
 0x162   :  { %213 = vrot.lane.b32.xlu0 %v211_v28, %s3193_s3 }
 0x1d4   :  { %v214_v30 = vpop.permute.xlu0 %213 }
 0x1d5   :  { %v216_v31 = vadd.f32 %v214_v30, %v206_v29 }
 0x1d7   :  { %3128 = vtanh.f32 %v216_v31  ;;  %v312_v48 = vrot.slane %v216_v31, 6 }
 0x1e1   :  { %v3129_v32 = vpop.eup %3128 }
 0x1e2   :  { %219 = vrot.lane.b32.xlu1 %v3129_v32, %s3192_s20 }
 0x254   :  { %v220_v33 = vpop.permute.xlu1 %219 }
 0x255   :  { %v222_v34 = vmul.f32 %v3127_v26, %v220_v33 }
 0x257   :  { %224 = vrot.lane.b32.xlu1 %v222_v34, %s3193_s3 }
 0x2c9   :  { %v225_v35 = vpop.permute.xlu1 %224 }
 0x2ca   :  { %228 = vst.msk [vmem:[#allocation2] sm:$0x3] %vm227_vm2, %v225_v35  ;;  %2972 = vmatmul.mubr.msk.f32.vlgmr.msra.gmra.mrb[2].mxu0 %vm125_vm3, %v225_v35 }
 0x2cb   :  { %3075 = vmatpush3.bf16.msra.mxu0 %v3261_v8  ;;  %2993 = vmatprep.mubr.msk.f32.mxu0 %vm3190_vm1, %v4807_v4 }
 0x2cc   :  { %3076 = vmatprep.subr.bf16.mxu0 %v3189_v0 }
 0x2cf   :  { %3078 = vmatpush3.bf16.msra.mxu0 %v3274_v12 }
 0x2d0   :  { %3085 = vmatprep.subr.bf16.mxu0 %v3189_v0 }
 0x39d   :  { %v297_v36 = vpop.f32.mrb[2].mxu0 }
 0x39e   :  { %v302_v37 = vrot.slane %v297_v36, 6  ;;  %v2973_v38 = vpop.f32.mrb[3].mxu0 }
 0x3a0   :  { %v304_v39 = vadd.f32 %v302_v37, %v3299_v17 }
 0x3a2   :  { %3130 = vtanh.f32 %v304_v39  ;;  %v305_v41 = vsub.f32 0.0, %v304_v39 }
 0x3a4   :  { %v306_v42 = vmul.f32 1.442695, %v305_v41 }
 0x3a6   :  { %3132 = vpow2.f32 %v306_v42 }
 0x3ac   :  { %v3131_v40 = vpop.eup %3130 }
 0x3ad   :  { %316 = vrot.lane.b32.xlu0 %v3131_v40, %s3192_s20 }
 0x3b0   :  { %v3133_v43 = vpop.eup %3132 }
 0x3b1   :  { %v308_v44 = vadd.f32 1.0, %v3133_v43 }
 0x3b3   :  { %3134 = vrcp.f32 %v308_v44 }
 0x3bd   :  { %v3135_v45 = vpop.eup %3134 }
 0x3be   :  { %v314_v49 = vmul.f32 %v3135_v45, %v312_v48 }
 0x41f   :  { %v317_v46 = vpop.permute.xlu0 %316 }
 0x420   :  { %v319_v47 = vmul.f32 %v3135_v45, %v317_v46 }
 0x422   :  { %321 = vrot.lane.b32.xlu1 %v319_v47, %s3193_s3 }
 0x494   :  { %v322_v50 = vpop.permute.xlu1 %321 }
 0x495   :  { %v324_v51 = vadd.f32 %v322_v50, %v314_v49 }
 0x497   :  { %3136 = vtanh.f32 %v324_v51  ;;  %v423_v7 = vrot.slane %v324_v51, 6 }
 0x4a1   :  { %v3137_v52 = vpop.eup %3136 }
 0x4a2   :  { %327 = vrot.lane.b32.xlu0 %v3137_v52, %s3192_s20 }
 0x514   :  { %v328_v53 = vpop.permute.xlu0 %327 }
 0x515   :  { %v3318_v54 = vmul.f32 %v3135_v45, %v328_v53 }
 0x517   :  { %v337_v55 = vrot.slane %v3318_v54, 2 }
 0x519   :  { %338 = vrot.lane.b32.xlu1 %v337_v55, %s3193_s3 }
 0x58b   :  { %v339_v56 = vpop.permute.xlu1 %338 }
 0x58c   :  { %2983 = vmatmul.mubr.msk.f32.vlgmr.msra.gmra.mrb[2].mxu1 %vm125_vm3, %v339_v56 }
 0x58d   :  { %3081 = vmatpush3.bf16.msra.mxu1 %v3261_v8  ;;  %3004 = vmatprep.mubr.msk.f32.mxu1 %vm3190_vm1, %v4807_v4 }
 0x58e   :  { %3082 = vmatprep.subr.bf16.mxu1 %v3189_v0 }
 0x591   :  { %3084 = vmatpush3.bf16.msra.mxu1 %v3274_v12 }
 0x592   :  { %3091 = vmatprep.subr.bf16.mxu1 %v3189_v0 }
 0x65f   :  { %v408_v57 = vpop.f32.mrb[2].mxu1 }
 0x660   :  { %v413_v58 = vrot.slane %v408_v57, 4  ;;  %v2984_v59 = vpop.f32.mrb[3].mxu1 }
 0x662   :  { %v415_v60 = vadd.f32 %v413_v58, %v3299_v17 }
 0x664   :  { %3138 = vtanh.f32 %v415_v60  ;;  %v416_v62 = vsub.f32 0.0, %v415_v60 }
 0x666   :  { %v417_v63 = vmul.f32 1.442695, %v416_v62 }
 0x668   :  { %3140 = vpow2.f32 %v417_v63 }
 0x66e   :  { %v3139_v61 = vpop.eup %3138 }
 0x66f   :  { %427 = vrot.lane.b32.xlu0 %v3139_v61, %s3192_s20 }
 0x672   :  { %v3141_v1 = vpop.eup %3140 }
 0x673   :  { %v419_v2 = vadd.f32 1.0, %v3141_v1 }
 0x675   :  { %3142 = vrcp.f32 %v419_v2 }
 0x67f   :  { %v3143_v3 = vpop.eup %3142 }
 0x680   :  { %v425_v9 = vmul.f32 %v3143_v3, %v423_v7 }
 0x6e1   :  { %v428_v5 = vpop.permute.xlu0 %427 }
 0x6e2   :  { %v430_v6 = vmul.f32 %v3143_v3, %v428_v5 }
 0x6e4   :  { %432 = vrot.lane.b32.xlu1 %v430_v6, %s3193_s3 }
 0x756   :  { %v433_v10 = vpop.permute.xlu1 %432 }
 0x757   :  { %v435_v11 = vadd.f32 %v433_v10, %v425_v9 }
 0x759   :  { %3144 = vtanh.f32 %v435_v11  ;;  %v534_v32 = vrot.slane %v435_v11, 6 }
 0x763   :  { %v3145_v13 = vpop.eup %3144 }
 0x764   :  { %438 = vrot.lane.b32.xlu0 %v3145_v13, %s3192_s20 }
 0x7d6   :  { %v439_v14 = vpop.permute.xlu0 %438 }
 0x7d7   :  { %v3333_v16 = vmul.f32 %v3143_v3, %v439_v14 }
 0x7d9   :  { %v448_v18 = vrot.slane %v3333_v16, 4 }
 0x7db   :  { %449 = vrot.lane.b32.xlu1 %v448_v18, %s3193_s3 }
 0x84d   :  { %v450_v19 = vpop.permute.xlu1 %449 }
 0x84e   :  { %2994 = vmatmul.mubr.msk.f32.vlgmr.msra.gmra.mrb[4].mxu0 %vm125_vm3, %v450_v19 }
 0x84f   :  { %3087 = vmatpush3.bf16.msra.mxu0 %v3261_v8  ;;  %3015 = vmatprep.mubr.msk.f32.mxu0 %vm3190_vm1, %v4807_v4 }
 0x850   :  { %3088 = vmatprep.subr.bf16.mxu0 %v3189_v0 }
 0x853   :  { %3090 = vmatpush3.bf16.msra.mxu0 %v3274_v12 }
 0x854   :  { %3097 = vmatprep.subr.bf16.mxu0 %v3189_v0 }
 0x921   :  { %v519_v20 = vpop.f32.mrb[4].mxu0 }
 0x922   :  { %v524_v21 = vrot.slane %v519_v20, 2  ;;  %v2995_v22 = vpop.f32.mrb[5].mxu0 }
 0x924   :  { %v526_v23 = vadd.f32 %v524_v21, %v3299_v17 }
 0x926   :  { %3146 = vtanh.f32 %v526_v23  ;;  %v527_v25 = vsub.f32 0.0, %v526_v23 }
 0x928   :  { %v528_v26 = vmul.f32 1.442695, %v527_v25 }
 0x92a   :  { %3148 = vpow2.f32 %v528_v26 }
 0x930   :  { %v3147_v24 = vpop.eup %3146 }
 0x931   :  { %538 = vrot.lane.b32.xlu0 %v3147_v24, %s3192_s20 }
 0x934   :  { %v3149_v27 = vpop.eup %3148 }
 0x935   :  { %v530_v28 = vadd.f32 1.0, %v3149_v27 }
 0x937   :  { %3150 = vrcp.f32 %v530_v28 }
 0x941   :  { %v3151_v29 = vpop.eup %3150 }
 0x942   :  { %v536_v33 = vmul.f32 %v3151_v29, %v534_v32 }
 0x9a3   :  { %v539_v30 = vpop.permute.xlu0 %538 }
 0x9a4   :  { %v541_v31 = vmul.f32 %v3151_v29, %v539_v30 }
 0x9a6   :  { %543 = vrot.lane.b32.xlu1 %v541_v31, %s3193_s3 }
 0xa18   :  { %v544_v34 = vpop.permute.xlu1 %543 }
 0xa19   :  { %v546_v35 = vadd.f32 %v544_v34, %v536_v33 }
 0xa1b   :  { %3152 = vtanh.f32 %v546_v35  ;;  %v642_v51 = vrot.slane %v546_v35, 6 }
 0xa25   :  { %v3153_v17 = vpop.eup %3152 }
 0xa26   :  { %549 = vrot.lane.b32.xlu0 %v3153_v17, %s3192_s20 }
 0xa98   :  { %v550_v36 = vpop.permute.xlu0 %549 }
 0xa99   :  { %v3348_v37 = vmul.f32 %v3151_v29, %v550_v36 }
 0xa9b   :  { %v559_v38 = vrot.slane %v3348_v37, 6 }
 0xa9d   :  { %560 = vrot.lane.b32.xlu1 %v559_v38, %s3193_s3 }
 0xb0f   :  { %v561_v39 = vpop.permute.xlu1 %560 }
 0xb10   :  { %3005 = vmatmul.mubr.msk.f32.vlgmr.msra.gmra.mrb[4].mxu1 %vm125_vm3, %v561_v39 }
 0xb11   :  { %3093 = vmatpush3.bf16.msra.mxu1 %v3261_v8  ;;  %3026 = vmatprep.mubr.msk.f32.mxu1 %vm3190_vm1, %v4807_v4 }
 0xb12   :  { %3094 = vmatprep.subr.bf16.mxu1 %v3189_v0 }
 0xb15   :  { %3096 = vmatpush3.bf16.msra.mxu1 %v3274_v12 }
 0xbe3   :  { %v630_v40 = vpop.f32.mrb[4].mxu1 }
 0xbe4   :  { %v634_v41 = vadd.f32 %v630_v40, %v3297_v15  ;;  %v3006_v42 = vpop.f32.mrb[5].mxu1 }
 0xbe6   :  { %3154 = vtanh.f32 %v634_v41  ;;  %v635_v44 = vsub.f32 0.0, %v634_v41 }
 0xbe8   :  { %v636_v45 = vmul.f32 1.442695, %v635_v44 }
 0xbea   :  { %3156 = vpow2.f32 %v636_v45 }
 0xbf0   :  { %v3155_v43 = vpop.eup %3154 }
 0xbf1   :  { %646 = vrot.lane.b32.xlu0 %v3155_v43, %s3192_s20 }
 0xbf4   :  { %v3157_v46 = vpop.eup %3156 }
 0xbf5   :  { %v638_v47 = vadd.f32 1.0, %v3157_v46 }
 0xbf7   :  { %3158 = vrcp.f32 %v638_v47 }
 0xc01   :  { %v3159_v48 = vpop.eup %3158 }
 0xc02   :  { %v644_v52 = vmul.f32 %v3159_v48, %v642_v51 }
 0xc63   :  { %v647_v49 = vpop.permute.xlu0 %646 }
 0xc64   :  { %v649_v50 = vmul.f32 %v3159_v48, %v647_v49 }
 0xc66   :  { %651 = vrot.lane.b32.xlu1 %v649_v50, %s3193_s3 }
 0xcd8   :  { %v652_v53 = vpop.permute.xlu1 %651 }
 0xcd9   :  { %v654_v55 = vadd.f32 %v652_v53, %v644_v52 }
 0xcdb   :  { %3160 = vtanh.f32 %v654_v55 }
 0xce5   :  { %v3161_v56 = vpop.eup %3160 }
 0xce6   :  { %657 = vrot.lane.b32.xlu0 %v3161_v56, %s3192_s20 }
 0xd58   :  { %v658_v57 = vpop.permute.xlu0 %657 }
 0xd59   :  { %v660_v58 = vmul.f32 %v3159_v48, %v658_v57 }
 0xd5b   :  { %662 = vrot.lane.b32.xlu1 %v660_v58, %s3193_s3 }
 0xdcd   :  { %v663_v59 = vpop.permute.xlu1 %662 }
 0xdce   :  { %665 = vst.msk [vmem:[#allocation2 + $0x8] sm:$0x3] %vm227_vm2, %v663_v59  ;;  %3016 = vmatmul.mubr.msk.f32.vlgmr.msra.gmra.mrb[6].mxu0 %vm125_vm3, %v663_v59 }
 0xdcf   :  { %3099 = vmatpush3.bf16.msra.mxu0 %v3261_v8  ;;  %3037 = vmatprep.mubr.msk.f32.mxu0 %vm3190_vm1, %v4807_v4 }
 0xdd0   :  { %3100 = vmatprep.subr.bf16.mxu0 %v3189_v0 }
 0xdd3   :  { %3102 = vmatpush3.bf16.msra.mxu0 %v3274_v12  ;;  %v749_v12 = vrot.slane %v654_v55, 6 }
 0xea1   :  { %v734_v60 = vpop.f32.mrb[6].mxu0 }
 0xea2   :  { %v739_v61 = vrot.slane %v734_v60, 6  ;;  %v3017_v62 = vpop.f32.mrb[7].mxu0 }
 0xea4   :  { %v741_v63 = vadd.f32 %v739_v61, %v3297_v15  ;;  %v996_v61 = vld [vmem:[%s4800_s4 + $0x8] sm:$0xff] }
 0xea6   :  { %3162 = vtanh.f32 %v741_v63  ;;  %v742_v2 = vsub.f32 0.0, %v741_v63  ;;  %v997_v63 = vld [vmem:[%s4800_s4 + $0x10] sm:$0xff] }
 0xea8   :  { %v743_v3 = vmul.f32 1.442695, %v742_v2  ;;  %v1093_v2 = vlaneseq }
 0xeaa   :  { %3164 = vpow2.f32 %v743_v3 }
 0xeb0   :  { %v3163_v1 = vpop.eup %3162 }
 0xeb1   :  { %753 = vrot.lane.b32.xlu0 %v3163_v1, %s3192_s20 }
 0xeb4   :  { %v3165_v8 = vpop.eup %3164 }
 0xeb5   :  { %v745_v5 = vadd.f32 1.0, %v3165_v8  ;;  %v3413_v8 = vand.u32 127, %v1093_v2 }
 0xeb7   :  { %3166 = vrcp.f32 %v745_v5  ;;  %v3415_v5 = vshrl.u32 %v1093_v2, 7 }
 0xeb9   :  { %4867 = vst [vmem:[#allocation3_spill] sm:$0xff] %v3415_v5 }
 0xec1   :  { %v3167_v6 = vpop.eup %3166 }
 0xec2   :  { %v751_v9 = vmul.f32 %v3167_v6, %v749_v12 }
 0xf23   :  { %v754_v7 = vpop.permute.xlu0 %753 }
 0xf24   :  { %v756_v0 = vmul.f32 %v3167_v6, %v754_v7  ;;  %v3418_v7 = vcvt.s32.f32 %v3413_v8 }
 0xf26   :  { %758 = vrot.lane.b32.xlu1 %v756_v0, %s3193_s3  ;;  %v3421_v0 = vcvt.s32.f32 %v3415_v5 }
 0xf28   :  { %vm1099_vm7 = vcmp.eq.f32.partialorder %v3421_v0, %v3418_v7 }
 0xf98   :  { %v759_v10 = vpop.permute.xlu1 %758 }
 0xf99   :  { %v761_v11 = vadd.f32 %v759_v10, %v751_v9  ;;  %v3428_v9 = vsel %vm1099_vm7, 1.0, %v4807_v4 }
 0xf9b   :  { %3168 = vtanh.f32 %v761_v11  ;;  %v859_v33 = vrot.slane %v761_v11, 6 }
 0xfa5   :  { %v3169_v13 = vpop.eup %3168 }
 0xfa6   :  { %764 = vrot.lane.b32.xlu0 %v3169_v13, %s3192_s20 }
0x1018   :  { %v765_v14 = vpop.permute.xlu0 %764 }
0x1019   :  { %v3374_v18 = vmul.f32 %v3167_v6, %v765_v14 }
0x101b   :  { %v773_v19 = vrot.slane %v3374_v18, 2 }
0x101d   :  { %774 = vrot.lane.b32.xlu1 %v773_v19, %s3193_s3 }
0x108f   :  { %v775_v20 = vpop.permute.xlu1 %774 }
0x1090   :  { %3027 = vmatmul.mubr.msk.f32.vlgmr.msra.gmra.mrb[6].mxu1 %vm125_vm3, %v775_v20  ;;  %v3440_v20 = vsub.s32 0, %v3415_v5 }
0x1092   :  { %4868 = vst [vmem:[#allocation4_spill] sm:$0xff] %v3440_v20 }
0x1163   :  { %v844_v21 = vpop.f32.mrb[6].mxu1 }
0x1164   :  { %v849_v22 = vrot.slane %v844_v21, 4  ;;  %v3028_v23 = vpop.f32.mrb[7].mxu1  ;;  %v4813_v21 = vsub.s32 1, %v3415_v5 }
0x1166   :  { %v851_v24 = vadd.f32 %v849_v22, %v3297_v15 }
0x1168   :  { %3170 = vtanh.f32 %v851_v24  ;;  %v852_v26 = vsub.f32 0.0, %v851_v24 }
0x116a   :  { %v853_v27 = vmul.f32 1.442695, %v852_v26 }
0x116c   :  { %3172 = vpow2.f32 %v853_v27 }
0x1172   :  { %v3171_v25 = vpop.eup %3170 }
0x1173   :  { %863 = vrot.lane.b32.xlu0 %v3171_v25, %s3192_s20 }
0x1176   :  { %v3173_v28 = vpop.eup %3172 }
0x1177   :  { %v855_v29 = vadd.f32 1.0, %v3173_v28 }
0x1179   :  { %3174 = vrcp.f32 %v855_v29 }
0x1183   :  { %v3175_v30 = vpop.eup %3174 }
0x1184   :  { %v861_v34 = vmul.f32 %v3175_v30, %v859_v33 }
0x11e5   :  { %v864_v31 = vpop.permute.xlu0 %863 }
0x11e6   :  { %v866_v32 = vmul.f32 %v3175_v30, %v864_v31 }
0x11e8   :  { %868 = vrot.lane.b32.xlu1 %v866_v32, %s3193_s3 }
0x125a   :  { %v869_v35 = vpop.permute.xlu1 %868 }
0x125b   :  { %v871_v17 = vadd.f32 %v869_v35, %v861_v34 }
0x125d   :  { %3176 = vtanh.f32 %v871_v17 }
0x1267   :  { %v3177_v36 = vpop.eup %3176 }
0x1268   :  { %874 = vrot.lane.b32.xlu0 %v3177_v36, %s3192_s20 }
0x12da   :  { %v875_v38 = vpop.permute.xlu0 %874 }
0x12db   :  { %v877_v39 = vmul.f32 %v3175_v30, %v875_v38 }
0x12dd   :  { %v883_v40 = vrot.slane %v877_v39, 4 }
0x12df   :  { %884 = vrot.lane.b32.xlu1 %v883_v40, %s3193_s3 }
0x1351   :  { %v885_v41 = vpop.permute.xlu1 %884 }
0x1352   :  { %3038 = vmatmul.mubr.msk.f32.vlgmr.msra.gmra.mrb[8].mxu0 %vm125_vm3, %v885_v41 }
0x1425   :  { %v954_v42 = vpop.f32.mrb[8].mxu0 }
0x1426   :  { %v959_v43 = vrot.slane %v954_v42, 2  ;;  %v3039_v44 = vpop.f32.mrb[9].mxu0 }
0x1428   :  { %v961_v45 = vadd.f32 %v959_v43, %v3297_v15  ;;  %v969_v15 = vrot.slane %v871_v17, 6 }
0x142a   :  { %3178 = vtanh.f32 %v961_v45  ;;  %v962_v47 = vsub.f32 0.0, %v961_v45 }
0x142c   :  { %v963_v48 = vmul.f32 1.442695, %v962_v47 }
0x142e   :  { %3180 = vpow2.f32 %v963_v48 }
0x1434   :  { %v3179_v46 = vpop.eup %3178 }
0x1435   :  { %973 = vrot.lane.b32.xlu0 %v3179_v46, %s3192_s20 }
0x1438   :  { %v3181_v49 = vpop.eup %3180 }
0x1439   :  { %v965_v50 = vadd.f32 1.0, %v3181_v49 }
0x143b   :  { %3182 = vrcp.f32 %v965_v50  ;;  %v3491_v50 = vld [vmem:[%s4803_s6] sm:$0xff] }
0x1445   :  { %v3183_v51 = vpop.eup %3182 }
0x1446   :  { %v971_v55 = vmul.f32 %v3183_v51, %v969_v15 }
0x14a7   :  { %v974_v52 = vpop.permute.xlu0 %973 }
0x14a8   :  { %v976_v53 = vmul.f32 %v3183_v51, %v974_v52 }
0x14aa   :  { %978 = vrot.lane.b32.xlu1 %v976_v53, %s3193_s3 }
0x14ae   :  { %332 = vrot.lane.b32.xlu1 %v3318_v54, %s3193_s3 }
0x14b2   :  { %554 = vrot.lane.b32.xlu1 %v3348_v37, %s3193_s3  ;;  %v995_v37 = vld [vmem:[%s4800_s4] sm:$0xff] }
0x14b3   :  { %v3103_v62 = vpack.c.bf16 %v996_v61, %v995_v37 }
0x14b5   :  { %3104 = vmatprep.subr.bf16.mxu1 %v3103_v62 }
0x14b6   :  { %879 = vrot.lane.b32.xlu1 %v877_v39, %s3193_s3  ;;  %3106 = vmatpush3.bf16.msra.mxu1 %v3103_v62 }
0x151c   :  { %v979_v56 = vpop.permute.xlu1 %978 }
0x151d   :  { %v981_v57 = vadd.f32 %v979_v56, %v971_v55 }
0x151f   :  { %3184 = vtanh.f32 %v981_v57 }
0x1520   :  { %v333_v58 = vpop.permute.xlu1 %332 }
0x1521   :  { %336 = vst.msk [vmem:[#allocation2] sm:$0xc] %vm335_vm4, %v333_v58 }
0x1524   :  { %v555_v59 = vpop.permute.xlu1 %554 }
0x1525   :  { %558 = vst.msk [vmem:[#allocation2] sm:$0xc0] %vm557_vm5, %v555_v59 }
0x1528   :  { %v880_v54 = vpop.permute.xlu1 %879 }
0x1529   :  { %v3185_v60 = vpop.eup %3184  ;;  %882 = vst.msk [vmem:[#allocation2 + $0x8] sm:$0x30] %vm446_vm6, %v880_v54 }
0x152a   :  { %984 = vrot.lane.b32.xlu0 %v3185_v60, %s3192_s20 }
0x152e   :  { %443 = vrot.lane.b32.xlu0 %v3333_v16, %s3193_s3  ;;  %v998_v16 = vld [vmem:[%s4800_s4 + $0x18] sm:$0xff]  ;;  %s3194_s4 = smov 8  }
0x152f   :  { %v3107_v1 = vpack.c.bf16 %v998_v16, %v997_v63  ;;  %1656 = vrot.lane.b32.xlu1 %v3428_v9, %s3194_s4 }
0x1531   :  { %3108 = vmatprep.subr.bf16.mxu1 %v3107_v1 }
0x1532   :  { %769 = vrot.lane.b32.xlu0 %v3374_v18, %s3193_s3  ;;  %3110 = vmatpush3.bf16.msra.mxu1 %v3107_v1  ;;  %v2835_v18 = vld [vmem:[%s4801_s5] ss:$0 sm:$0xff]  ;;  %v4812_v1 = vsub.s32 3, %v3415_v5 }
0x159c   :  { %v985_v3 = vpop.permute.xlu0 %984 }
0x159d   :  { %v987_v6 = vmul.f32 %v3183_v51, %v985_v3 }
0x159f   :  { %989 = vrot.lane.b32.xlu0 %v987_v6, %s3193_s3 }
0x15a0   :  { %v444_v12 = vpop.permute.xlu0 %443 }
0x15a1   :  { %447 = vst.msk [vmem:[#allocation2] sm:$0x30] %vm446_vm6, %v444_v12  ;;  %v1657_v25 = vpop.permute.xlu1 %1656 }
0x15a3   :  { %2243 = vrot.lane.b32.xlu0 %v3428_v9, %s3195_s29 }
0x15a4   :  { %v770_v10 = vpop.permute.xlu0 %769 }
0x15a5   :  { %772 = vst.msk [vmem:[#allocation2 + $0x8] sm:$0xc] %vm335_vm4, %v770_v10 }
0x15a8   :  { %v993_v11 = vld [vmem:[#allocation2] sm:$0xff] }
0x15a9   :  { %3048 = vmatprep.mubr.msk.f32.mxu1 %vm125_vm3, %v993_v11  ;;  %v4811_v11 = vsub.s32 2, %v3415_v5 }
0x1611   :  { %v990_v13 = vpop.permute.xlu0 %989 }
0x1612   :  { %992 = vst.msk [vmem:[#allocation2 + $0x8] sm:$0xc0] %vm557_vm5, %v990_v13 }
0x1615   :  { %v2244_v30 = vpop.permute.xlu0 %2243 }
0x1619   :  { %v994_v14 = vld [vmem:[#allocation2 + $0x8] sm:$0xff] }
0x161a   :  { %3049 = vmatmul.mubr.msk.f32.vlgmr.msra.gmra.mrb[8].mxu1 %vm125_vm3, %v994_v14 }
0x16ed   :  { %v3050_v19 = vpop.f32.mrb[8].mxu1 }
0x16ee   :  { %v3443_v22 = vadd.f32 %v3050_v19, %v2835_v18  ;;  %v1078_v23 = vpop.f32.mrb[9].mxu1 }
0x16ef   :  { %v3445_v24 = vadd.f32 %v2835_v18, %v1078_v23 }
0x16f0   :  { %1089 = vst.msk [vmem:[%s4802_s7 + $0x8] sm:$0xff] %vm1087_vm8, %v3443_v22 }
0x16f1   :  { %1088 = vst.msk [vmem:[%s4802_s7] sm:$0xff] %vm1087_vm8, %v3445_v24  ;;  %v1105_v26 = vrot.slane %v3445_v24, %v3440_v20  ;;  %v1394_v27 = vrot.slane %v3445_v24, %v4813_v21  ;;  %v1685_v33 = vrot.slane %v3445_v24, 2  ;;  %v1977_v34 = vrot.slane %v3445_v24, 3 }
0x16f2   :  { %v2007_v47 = vrot.slane %v3445_v24, 5  ;;  %v1715_v48 = vrot.slane %v3445_v24, 4 }
0x16f3   :  { %v1659_v28 = vmul.f32 %v1657_v25, %v1105_v26  ;;  %v1952_v29 = vmul.f32 %v1657_v25, %v1394_v27  ;;  %v2246_v31 = vmul.f32 %v2244_v30, %v1105_v26  ;;  %v2530_v32 = vmul.f32 %v2244_v30, %v1394_v27 }
0x16f4   :  { %v1395_v35 = vmul.f32 %v3428_v9, %v1394_v27  ;;  %v1106_v36 = vmul.f32 %v3428_v9, %v1105_v26  ;;  %v3530_v26 = vld [vmem:[%s4803_s6 + $0x8] sm:$0xff] }
0x16f5   :  { %1954 = vrot.lane.b32.xlu0 %v1952_v29, %s3196_s13  ;;  %1661 = vrot.lane.b32.xlu1 %v1659_v28, %s3196_s13 }
0x16f6   :  { %v1396_v17 = vsel %vm1107_vm9, %v1395_v35, 0.0  ;;  %v1108_v38 = vsel %vm1107_vm9, %v1106_v36, 0.0 }
0x16f9   :  { %2532 = vrot.lane.b32.xlu0 %v2530_v32, %s3197_s14  ;;  %2248 = vrot.lane.b32.xlu1 %v2246_v31, %s3197_s14  ;;  %v3541_v31 = vld [vmem:[%s4803_s6 + $0x10] sm:$0xff] }
0x16fd   :  { %1686 = vrot.lane.b32.xlu0 %v1685_v33, %s3196_s13  ;;  %1978 = vrot.lane.b32.xlu1 %v1977_v34, %s3196_s13 }
0x171c   :  { %1397 = vadd.xlane.f32.xlu0 %v1396_v17 }
0x1721   :  { %1109 = vadd.xlane.f32.xlu1 %v1108_v38 }
0x1767   :  { %v1955_v39 = vpop.permute.xlu0 %1954  ;;  %v1662_v40 = vpop.permute.xlu1 %1661 }
0x1768   :  { %v1664_v41 = vsel %vm1107_vm9, %v1662_v40, 0.0  ;;  %v1957_v42 = vsel %vm1107_vm9, %v1955_v39, 0.0 }
0x1769   :  { %1665 = vadd.xlane.f32.xlu0 %v1664_v41  ;;  %1958 = vadd.xlane.f32.xlu1 %v1957_v42 }
0x176b   :  { %v2533_v43 = vpop.permute.xlu0 %2532  ;;  %v2249_v44 = vpop.permute.xlu1 %2248 }
0x176c   :  { %v2251_v45 = vsel %vm1107_vm9, %v2249_v44, 0.0  ;;  %v2535_v46 = vsel %vm1107_vm9, %v2533_v43, 0.0 }
0x176d   :  { %2252 = vadd.xlane.f32.xlu0 %v2251_v45  ;;  %2536 = vadd.xlane.f32.xlu1 %v2535_v46 }
0x176f   :  { %v3486_v49 = vpop.permute.xlu0 %1686  ;;  %v3493_v52 = vpop.permute.xlu1 %1978 }
0x177e   :  { %2271 = vrot.lane.b32.xlu1 %v1685_v33, %s3197_s14 }
0x1782   :  { %2008 = vrot.lane.b32.xlu1 %v2007_v47, %s3196_s13 }
0x1783   :  { %2555 = vrot.lane.b32.xlu0 %v1977_v34, %s3197_s14 }
0x1787   :  { %1716 = vrot.lane.b32.xlu0 %v1715_v48, %s3196_s13 }
0x17a9   :  { %v1398_v51 = vpop.xlane.xlu0 %1397 }
0x17aa   :  { %v3496_v53 = vadd.f32 %v1398_v51, %v3491_v50 }
0x17ac   :  { %4869 = vst [vmem:[#allocation5_spill] sm:$0xff] %v3496_v53  ;;  %v1400_v15 = vsel %vm1107_vm9, %v3496_v53, -inf }
0x17ad   :  { %v1401_v55 = vrot.slane %v1400_v15, 4 }
0x17ae   :  { %v1110_v56 = vpop.xlane.xlu1 %1109 }
0x17af   :  { %v1402_v57 = vmax.f32 %v1400_v15, %v1401_v55  ;;  %v3501_v58 = vadd.f32 %v1110_v56, %v3491_v50 }
0x17b1   :  { %4870 = vst [vmem:[#allocation6_spill] sm:$0xff] %v3501_v58  ;;  %v1403_v59 = vrot.slane %v1402_v57, 2  ;;  %v1112_v54 = vsel %vm1107_vm9, %v3501_v58, -inf }
0x17b2   :  { %v1113_v60 = vrot.slane %v1112_v54, 4 }
0x17b3   :  { %v1404_v37 = vmax.f32 %v1402_v57, %v1403_v59 }
0x17b4   :  { %v1114_v61 = vmax.f32 %v1112_v54, %v1113_v60 }
0x17b5   :  { %v1405_v62 = vrot.slane %v1404_v37, 1 }
0x17b6   :  { %v1115_v63 = vrot.slane %v1114_v61, 2 }
0x17b7   :  { %v3505_v16 = vmax.f32 %v1404_v37, %v1405_v62 }
0x17b8   :  { %v1116_v2 = vmax.f32 %v1114_v61, %v1115_v63 }
0x17b9   :  { %4871 = vst [vmem:[#allocation7_spill] sm:$0xff] %v3505_v16  ;;  %v1416_v3 = vadd.f32 %v3505_v16, %v3445_v24 }
0x17ba   :  { %v1117_v6 = vrot.slane %v1116_v2, 1 }
0x17bb   :  { %v1420_v12 = vrot.slane %v1416_v3, %v4812_v1 }
0x17bc   :  { %v3514_v10 = vmax.f32 %v1116_v2, %v1117_v6 }
0x17bd   :  { %v1421_v13 = vmul.f32 %v3428_v9, %v1420_v12 }
0x17be   :  { %4872 = vst [vmem:[#allocation8_spill] sm:$0xff] %v3514_v10  ;;  %v1128_v14 = vadd.f32 %v3514_v10, %v3445_v24 }
0x17bf   :  { %v1422_v18 = vsel %vm1107_vm9, %v1421_v13, 0.0 }
0x17c0   :  { %1423 = vadd.xlane.f32.xlu0 %v1422_v18  ;;  %v1132_v19 = vrot.slane %v1128_v14, %v4811_v11 }
0x17c2   :  { %v1133_v23 = vmul.f32 %v3428_v9, %v1132_v19 }
0x17c4   :  { %v1134_v25 = vsel %vm1107_vm9, %v1133_v23, 0.0 }
0x17c5   :  { %1135 = vadd.xlane.f32.xlu1 %v1134_v25 }
0x17f6   :  { %v1666_v27 = vpop.xlane.xlu0 %1665  ;;  %v1959_v28 = vpop.xlane.xlu1 %1958 }
0x17f7   :  { %v3533_v29 = vadd.f32 %v1666_v27, %v3530_v26  ;;  %v3536_v30 = vadd.f32 %v1959_v28, %v3530_v26 }
0x17f9   :  { %4873 = vst [vmem:[#allocation9_spill] sm:$0xff] %v3533_v29  ;;  %4874 = vst [vmem:[#allocation10_spill] sm:$0xff] %v3536_v30  ;;  %v1668_v32 = vsel %vm1107_vm9, %v3533_v29, -inf  ;;  %v1961_v33 = vsel %vm1107_vm9, %v3536_v30, -inf }
0x17fa   :  { %v1669_v34 = vrot.slane %v1668_v32, 4  ;;  %v1962_v35 = vrot.slane %v1961_v33, 4  ;;  %v2253_v17 = vpop.xlane.xlu0 %2252  ;;  %v2537_v36 = vpop.xlane.xlu1 %2536 }
0x17fb   :  { %v3548_v38 = vadd.f32 %v2253_v17, %v3541_v31  ;;  %v3551_v39 = vadd.f32 %v2537_v36, %v3541_v31 }
0x17fc   :  { %v1670_v40 = vmax.f32 %v1668_v32, %v1669_v34  ;;  %v1963_v41 = vmax.f32 %v1961_v33, %v1962_v35 }
0x17fd   :  { %4875 = vst [vmem:[#allocation11_spill] sm:$0xff] %v3548_v38  ;;  %4876 = vst [vmem:[#allocation12_spill] sm:$0xff] %v3551_v39  ;;  %v2255_v42 = vsel %vm1107_vm9, %v3548_v38, -inf  ;;  %v2539_v43 = vsel %vm1107_vm9, %v3551_v39, -inf }
0x17fe   :  { %v1671_v44 = vrot.slane %v1670_v40, 2  ;;  %v1964_v45 = vrot.slane %v1963_v41, 2  ;;  %v2256_v46 = vrot.slane %v2255_v42, 4  ;;  %v2540_v51 = vrot.slane %v2539_v43, 4  ;;  %v2556_v19 = vpop.permute.xlu0 %2555  ;;  %v2272_v23 = vpop.permute.xlu1 %2271 }
0x1800   :  { %v1672_v15 = vmax.f32 %v1670_v40, %v1671_v44  ;;  %v1965_v55 = vmax.f32 %v1963_v41, %v1964_v45  ;;  %v2257_v56 = vmax.f32 %v2255_v42, %v2256_v46  ;;  %v2541_v57 = vmax.f32 %v2539_v43, %v2540_v51 }
0x1801   :  { %v2037_v43 = vrot.slane %v3445_v24, 7  ;;  %v1745_v44 = vrot.slane %v3445_v24, 6 }
0x1802   :  { %v1673_v59 = vrot.slane %v1672_v15, 1  ;;  %v1966_v54 = vrot.slane %v1965_v55, 1  ;;  %v2258_v60 = vrot.slane %v2257_v56, 2  ;;  %v2542_v37 = vrot.slane %v2541_v57, 2  ;;  %v3605_v45 = vpop.permute.xlu0 %1716 }
0x1804   :  { %v3557_v61 = vmax.f32 %v1672_v15, %v1673_v59  ;;  %v3559_v62 = vmax.f32 %v1965_v55, %v1966_v54  ;;  %v2259_v63 = vmax.f32 %v2257_v56, %v2258_v60  ;;  %v2543_v2 = vmax.f32 %v2541_v57, %v2542_v37 }
0x1806   :  { %4877 = vst [vmem:[#allocation13_spill] sm:$0xff] %v3557_v61  ;;  %4878 = vst [vmem:[#allocation14_spill] sm:$0xff] %v3559_v62  ;;  %v2260_v3 = vrot.slane %v2259_v63, 1  ;;  %v2544_v6 = vrot.slane %v2543_v2, 1  ;;  %v1689_v12 = vadd.f32 %v3486_v49, %v3557_v61  ;;  %v1981_v13 = vadd.f32 %v3493_v52, %v3559_v62 }
0x1808   :  { %v3569_v14 = vmax.f32 %v2259_v63, %v2260_v3  ;;  %v3571_v18 = vmax.f32 %v2543_v2, %v2544_v6  ;;  %v1693_v25 = vrot.slane %v1689_v12, %v3440_v20  ;;  %v1985_v27 = vrot.slane %v1981_v13, %v3440_v20 }
0x1809   :  { %v4810_v12 = vsub.s32 5, %v3415_v5 }
0x180a   :  { %4879 = vst [vmem:[#allocation15_spill] sm:$0xff] %v3569_v14  ;;  %4880 = vst [vmem:[#allocation16_spill] sm:$0xff] %v3571_v18  ;;  %v2558_v49 = vadd.f32 %v2556_v19, %v3571_v18  ;;  %v2274_v52 = vadd.f32 %v2272_v23, %v3569_v14  ;;  %v1694_v33 = vmul.f32 %v3428_v9, %v1693_v25 }
0x180b   :  { %v1986_v34 = vmul.f32 %v3428_v9, %v1985_v27 }
0x180c   :  { %v2562_v28 = vrot.slane %v2558_v49, %v3440_v20  ;;  %v2278_v32 = vrot.slane %v2274_v52, %v3440_v20  ;;  %v1695_v36 = vsel %vm1107_vm9, %v1694_v33, 0.0  ;;  %v4809_v49 = vsub.s32 4, %v3415_v5 }
0x180d   :  { %v1987_v40 = vsel %vm1107_vm9, %v1986_v34, 0.0  ;;  %1696 = vadd.xlane.f32.xlu0 %v1695_v36 }
0x180e   :  { %v2563_v35 = vmul.f32 %v3428_v9, %v2562_v28  ;;  %v2279_v17 = vmul.f32 %v3428_v9, %v2278_v32  ;;  %1988 = vadd.xlane.f32.xlu1 %v1987_v40 }
0x1810   :  { %v2564_v41 = vsel %vm1107_vm9, %v2563_v35, 0.0  ;;  %v2280_v42 = vsel %vm1107_vm9, %v2279_v17, 0.0 }
0x1811   :  { %2281 = vadd.xlane.f32.xlu0 %v2280_v42 }
0x1812   :  { %2565 = vadd.xlane.f32.xlu1 %v2564_v41 }
0x1823   :  { %2300 = vrot.lane.b32.xlu1 %v1715_v48, %s3197_s14  ;;  %v3607_v48 = vpop.permute.xlu1 %2008 }
0x1827   :  { %2038 = vrot.lane.b32.xlu1 %v2037_v43, %s3196_s13  ;;  %2584 = vrot.lane.b32.xlu0 %v2007_v47, %s3197_s14 }
0x182b   :  { %1746 = vrot.lane.b32.xlu0 %v1745_v44, %s3196_s13 }
0x184d   :  { %v1424_v46 = vpop.xlane.xlu0 %1423 }
0x184e   :  { %v3610_v51 = vadd.f32 %v1424_v46, %v3491_v50 }
0x1850   :  { %4881 = vst [vmem:[#allocation17_spill] sm:$0xff] %v3610_v51  ;;  %v1426_v15 = vsel %vm1107_vm9, %v3610_v51, -inf }
0x1851   :  { %v1427_v55 = vrot.slane %v1426_v15, 4 }
0x1852   :  { %v1136_v56 = vpop.xlane.xlu1 %1135 }
0x1853   :  { %v1428_v47 = vmax.f32 %v1426_v15, %v1427_v55  ;;  %v3615_v57 = vadd.f32 %v1136_v56, %v3491_v50 }
0x1855   :  { %4882 = vst [vmem:[#allocation18_spill] sm:$0xff] %v3615_v57  ;;  %v1429_v59 = vrot.slane %v1428_v47, 2  ;;  %v1138_v54 = vsel %vm1107_vm9, %v3615_v57, -inf }
0x1856   :  { %v1139_v60 = vrot.slane %v1138_v54, 4 }
0x1857   :  { %v1430_v37 = vmax.f32 %v1428_v47, %v1429_v59 }
0x1858   :  { %v1140_v63 = vmax.f32 %v1138_v54, %v1139_v60 }
0x1859   :  { %v1431_v2 = vrot.slane %v1430_v37, 1 }
0x185a   :  { %v1141_v3 = vrot.slane %v1140_v63, 2 }
0x185b   :  { %v3619_v6 = vmax.f32 %v1430_v37, %v1431_v2 }
0x185c   :  { %v1142_v13 = vmax.f32 %v1140_v63, %v1141_v3 }
0x185d   :  { %4883 = vst [vmem:[#allocation19_spill] sm:$0xff] %v3619_v6  ;;  %v1442_v19 = vadd.f32 %v3619_v6, %v3445_v24 }
0x185e   :  { %v1143_v23 = vrot.slane %v1142_v13, 1 }
0x185f   :  { %v1446_v25 = vrot.slane %v1442_v19, %v4810_v12 }
0x1860   :  { %v3628_v27 = vmax.f32 %v1142_v13, %v1143_v23 }
0x1861   :  { %v1447_v52 = vmul.f32 %v3428_v9, %v1446_v25 }
0x1862   :  { %4884 = vst [vmem:[#allocation20_spill] sm:$0xff] %v3628_v27  ;;  %v1154_v28 = vadd.f32 %v3628_v27, %v3445_v24 }
0x1863   :  { %v1448_v32 = vsel %vm1107_vm9, %v1447_v52, 0.0 }
0x1864   :  { %1449 = vadd.xlane.f32.xlu0 %v1448_v32  ;;  %v1158_v33 = vrot.slane %v1154_v28, %v4809_v49 }
0x1866   :  { %v1159_v34 = vmul.f32 %v3428_v9, %v1158_v33 }
0x1868   :  { %v1160_v35 = vsel %vm1107_vm9, %v1159_v34, 0.0 }
0x1869   :  { %1161 = vadd.xlane.f32.xlu1 %v1160_v35 }
0x189a   :  { %v1697_v17 = vpop.xlane.xlu0 %1696 }
0x189b   :  { %v1989_v36 = vpop.xlane.xlu1 %1988  ;;  %v3642_v40 = vadd.f32 %v1697_v17, %v3530_v26 }
0x189c   :  { %v3645_v41 = vadd.f32 %v1989_v36, %v3530_v26 }
0x189d   :  { %4885 = vst [vmem:[#allocation21_spill] sm:$0xff] %v3642_v40  ;;  %v1699_v42 = vsel %vm1107_vm9, %v3642_v40, -inf }
0x189e   :  { %4886 = vst [vmem:[#allocation22_spill] sm:$0xff] %v3645_v41  ;;  %v1991_v46 = vsel %vm1107_vm9, %v3645_v41, -inf  ;;  %v1700_v15 = vrot.slane %v1699_v42, 4  ;;  %v2282_v56 = vpop.xlane.xlu0 %2281 }
0x189f   :  { %v1992_v55 = vrot.slane %v1991_v46, 4  ;;  %v2566_v47 = vpop.xlane.xlu1 %2565  ;;  %v3652_v59 = vadd.f32 %v2282_v56, %v3541_v31 }
0x18a0   :  { %v3655_v54 = vadd.f32 %v2566_v47, %v3541_v31  ;;  %v1701_v60 = vmax.f32 %v1699_v42, %v1700_v15 }
0x18a1   :  { %4887 = vst [vmem:[#allocation23_spill] sm:$0xff] %v3652_v59  ;;  %v1993_v37 = vmax.f32 %v1991_v46, %v1992_v55  ;;  %v2284_v63 = vsel %vm1107_vm9, %v3652_v59, -inf }
0x18a2   :  { %4888 = vst [vmem:[#allocation24_spill] sm:$0xff] %v3655_v54  ;;  %v2568_v2 = vsel %vm1107_vm9, %v3655_v54, -inf  ;;  %v1702_v3 = vrot.slane %v1701_v60, 2  ;;  %v2285_v19 = vrot.slane %v2284_v63, 4 }
0x18a3   :  { %v1994_v13 = vrot.slane %v1993_v37, 2  ;;  %v2569_v23 = vrot.slane %v2568_v2, 4 }
0x18a4   :  { %v1703_v25 = vmax.f32 %v1701_v60, %v1702_v3  ;;  %v2286_v28 = vmax.f32 %v2284_v63, %v2285_v19  ;;  %v2301_v3 = vpop.permute.xlu1 %2300 }
0x18a5   :  { %v1995_v52 = vmax.f32 %v1993_v37, %v1994_v13  ;;  %v2570_v32 = vmax.f32 %v2568_v2, %v2569_v23  ;;  %v2585_v2 = vpop.permute.xlu0 %2584 }
0x18a6   :  { %v1704_v33 = vrot.slane %v1703_v25, 1  ;;  %v2287_v35 = vrot.slane %v2286_v28, 2 }
0x18a7   :  { %v1996_v34 = vrot.slane %v1995_v52, 1  ;;  %v2571_v17 = vrot.slane %v2570_v32, 2 }
0x18a8   :  { %v3661_v36 = vmax.f32 %v1703_v25, %v1704_v33  ;;  %v2288_v46 = vmax.f32 %v2286_v28, %v2287_v35 }
0x18a9   :  { %v3663_v42 = vmax.f32 %v1995_v52, %v1996_v34  ;;  %v2572_v15 = vmax.f32 %v2570_v32, %v2571_v17 }
0x18aa   :  { %4889 = vst [vmem:[#allocation25_spill] sm:$0xff] %v3661_v36  ;;  %v2289_v55 = vrot.slane %v2288_v46, 1  ;;  %v1719_v47 = vadd.f32 %v3605_v45, %v3661_v36 }
0x18ab   :  { %4890 = vst [vmem:[#allocation26_spill] sm:$0xff] %v3663_v42  ;;  %v2573_v56 = vrot.slane %v2572_v15, 1  ;;  %v2011_v60 = vadd.f32 %v3607_v48, %v3663_v42 }
0x18ac   :  { %v3673_v37 = vmax.f32 %v2288_v46, %v2289_v55  ;;  %v1723_v13 = vrot.slane %v1719_v47, %v3440_v20  ;;  %v3707_v55 = vpop.permute.xlu0 %1746  ;;  %v3709_v47 = vpop.permute.xlu1 %2038 }
0x18ad   :  { %v3675_v63 = vmax.f32 %v2572_v15, %v2573_v56  ;;  %v2015_v19 = vrot.slane %v2011_v60, %v3440_v20  ;;  %v4814_v15 = vrot.slane %v3443_v22, 1 }
0x18ae   :  { %4891 = vst [vmem:[#allocation27_spill] sm:$0xff] %v3673_v37  ;;  %v2303_v48 = vadd.f32 %v2301_v3, %v3673_v37  ;;  %v1724_v52 = vmul.f32 %v3428_v9, %v1723_v13 }
0x18af   :  { %4892 = vst [vmem:[#allocation28_spill] sm:$0xff] %v3675_v63  ;;  %v2587_v45 = vadd.f32 %v2585_v2, %v3675_v63  ;;  %v2016_v28 = vmul.f32 %v3428_v9, %v2015_v19 }
0x18b0   :  { %v2307_v25 = vrot.slane %v2303_v48, %v3440_v20  ;;  %v1725_v34 = vsel %vm1107_vm9, %v1724_v52, 0.0 }
0x18b1   :  { %v2591_v23 = vrot.slane %v2587_v45, %v3440_v20  ;;  %v2017_v35 = vsel %vm1107_vm9, %v2016_v28, 0.0  ;;  %1726 = vadd.xlane.f32.xlu0 %v1725_v34 }
0x18b2   :  { %v2308_v33 = vmul.f32 %v3428_v9, %v2307_v25  ;;  %2018 = vadd.xlane.f32.xlu1 %v2017_v35 }
0x18b3   :  { %v2592_v32 = vmul.f32 %v3428_v9, %v2591_v23 }
0x18b4   :  { %v2309_v46 = vsel %vm1107_vm9, %v2308_v33, 0.0  ;;  %v4806_v33 = vsub.s32 7, %v3415_v5 }
0x18b5   :  { %v2593_v17 = vsel %vm1107_vm9, %v2592_v32, 0.0  ;;  %2310 = vadd.xlane.f32.xlu0 %v2309_v46 }
0x18b6   :  { %2594 = vadd.xlane.f32.xlu1 %v2593_v17 }
0x18c7   :  { %2329 = vrot.lane.b32.xlu1 %v1745_v44, %s3197_s14 }
0x18cb   :  { %2068 = vrot.lane.b32.xlu1 %v4814_v15, %s3196_s13  ;;  %2613 = vrot.lane.b32.xlu0 %v2037_v43, %s3197_s14 }
0x18cf   :  { %1776 = vrot.lane.b32.xlu0 %v3443_v22, %s3196_s13 }
0x18f1   :  { %v1450_v56 = vpop.xlane.xlu0 %1449 }
0x18f2   :  { %v3712_v44 = vadd.f32 %v1450_v56, %v3491_v50 }
0x18f4   :  { %4893 = vst [vmem:[#allocation29_spill] sm:$0xff] %v3712_v44  ;;  %v1452_v60 = vsel %vm1107_vm9, %v3712_v44, -inf }
0x18f5   :  { %v1453_v2 = vrot.slane %v1452_v60, 4 }
0x18f6   :  { %v1162_v3 = vpop.xlane.xlu1 %1161 }
0x18f7   :  { %v1454_v13 = vmax.f32 %v1452_v60, %v1453_v2  ;;  %v3717_v19 = vadd.f32 %v1162_v3, %v3491_v50  ;;  %v4805_v60 = vsub.s32 6, %v3415_v5 }
0x18f9   :  { %4894 = vst [vmem:[#allocation30_spill] sm:$0xff] %v3717_v19  ;;  %v1455_v43 = vrot.slane %v1454_v13, 2  ;;  %v1164_v45 = vsel %vm1107_vm9, %v3717_v19, -inf }
0x18fa   :  { %v1165_v48 = vrot.slane %v1164_v45, 4 }
0x18fb   :  { %v1456_v23 = vmax.f32 %v1454_v13, %v1455_v43 }
0x18fc   :  { %v1166_v25 = vmax.f32 %v1164_v45, %v1165_v48 }
0x18fd   :  { %v1457_v52 = vrot.slane %v1456_v23, 1 }
0x18fe   :  { %v1167_v28 = vrot.slane %v1166_v25, 2 }
0x18ff   :  { %v3721_v32 = vmax.f32 %v1456_v23, %v1457_v52 }
0x1900   :  { %v1168_v34 = vmax.f32 %v1166_v25, %v1167_v28 }
0x1901   :  { %4895 = vst [vmem:[#allocation31_spill] sm:$0xff] %v3721_v32  ;;  %v1468_v35 = vadd.f32 %v3721_v32, %v3445_v24 }
0x1902   :  { %v1169_v17 = vrot.slane %v1168_v34, 1 }
0x1903   :  { %v1472_v46 = vrot.slane %v1468_v35, %v4806_v33 }
0x1904   :  { %v3730_v56 = vmax.f32 %v1168_v34, %v1169_v17 }
0x1905   :  { %v1473_v2 = vmul.f32 %v3428_v9, %v1472_v46 }
0x1906   :  { %4896 = vst [vmem:[#allocation32_spill] sm:$0xff] %v3730_v56  ;;  %v1180_v3 = vadd.f32 %v3730_v56, %v3445_v24 }
0x1907   :  { %v1474_v13 = vsel %vm1107_vm9, %v1473_v2, 0.0 }
0x1908   :  { %1475 = vadd.xlane.f32.xlu0 %v1474_v13  ;;  %v1184_v43 = vrot.slane %v1180_v3, %v4805_v60 }
0x190a   :  { %v1185_v45 = vmul.f32 %v3428_v9, %v1184_v43 }
0x190c   :  { %v1186_v48 = vsel %vm1107_vm9, %v1185_v45, 0.0 }
0x190d   :  { %1187 = vadd.xlane.f32.xlu1 %v1186_v48 }
0x193e   :  { %v1727_v23 = vpop.xlane.xlu0 %1726 }
0x193f   :  { %v2019_v25 = vpop.xlane.xlu1 %2018  ;;  %v3744_v52 = vadd.f32 %v1727_v23, %v3530_v26 }
0x1940   :  { %v3747_v28 = vadd.f32 %v2019_v25, %v3530_v26 }
0x1941   :  { %4897 = vst [vmem:[#allocation33_spill] sm:$0xff] %v3744_v52  ;;  %v1729_v24 = vsel %vm1107_vm9, %v3744_v52, -inf }
0x1942   :  { %4898 = vst [vmem:[#allocation34_spill] sm:$0xff] %v3747_v28  ;;  %v2021_v34 = vsel %vm1107_vm9, %v3747_v28, -inf  ;;  %v1730_v35 = vrot.slane %v1729_v24, 4  ;;  %v2311_v46 = vpop.xlane.xlu0 %2310 }
0x1943   :  { %v2022_v17 = vrot.slane %v2021_v34, 4  ;;  %v2595_v2 = vpop.xlane.xlu1 %2594  ;;  %v3754_v3 = vadd.f32 %v2311_v46, %v3541_v31 }
0x1944   :  { %v3757_v13 = vadd.f32 %v2595_v2, %v3541_v31  ;;  %v1731_v43 = vmax.f32 %v1729_v24, %v1730_v35 }
0x1945   :  { %4899 = vst [vmem:[#allocation35_spill] sm:$0xff] %v3754_v3  ;;  %v2023_v45 = vmax.f32 %v2021_v34, %v2022_v17  ;;  %v2313_v48 = vsel %vm1107_vm9, %v3754_v3, -inf }
0x1946   :  { %4900 = vst [vmem:[#allocation36_spill] sm:$0xff] %v3757_v13  ;;  %v2597_v23 = vsel %vm1107_vm9, %v3757_v13, -inf  ;;  %v1732_v25 = vrot.slane %v1731_v43, 2  ;;  %v2314_v33 = vrot.slane %v2313_v48, 4 }
0x1947   :  { %v2024_v60 = vrot.slane %v2023_v45, 2  ;;  %v2598_v4 = vrot.slane %v2597_v23, 4 }
0x1948   :  { %v1733_v49 = vmax.f32 %v1731_v43, %v1732_v25  ;;  %v2315_v11 = vmax.f32 %v2313_v48, %v2314_v33 }
0x1949   :  { %v2025_v12 = vmax.f32 %v2023_v45, %v2024_v60  ;;  %v2599_v46 = vmax.f32 %v2597_v23, %v2598_v4 }
0x194a   :  { %v1734_v1 = vrot.slane %v1733_v49, 1  ;;  %v2316_v2 = vrot.slane %v2315_v11, 2 }
0x194b   :  { %v2026_v21 = vrot.slane %v2025_v12, 1  ;;  %v2600_v15 = vrot.slane %v2599_v46, 2 }
0x194c   :  { %v3763_v24 = vmax.f32 %v1733_v49, %v1734_v1  ;;  %v2317_v35 = vmax.f32 %v2315_v11, %v2316_v2  ;;  %v2614_v11 = vpop.permute.xlu0 %2613 }
0x194d   :  { %v3765_v34 = vmax.f32 %v2025_v12, %v2026_v21  ;;  %v2601_v17 = vmax.f32 %v2599_v46, %v2600_v15  ;;  %v2330_v12 = vpop.permute.xlu1 %2329 }
0x194e   :  { %4901 = vst [vmem:[#allocation37_spill] sm:$0xff] %v3763_v24  ;;  %v2318_v43 = vrot.slane %v2317_v35, 1  ;;  %v1749_v4 = vadd.f32 %v3707_v55, %v3763_v24 }
0x194f   :  { %4902 = vst [vmem:[#allocation38_spill] sm:$0xff] %v3765_v34  ;;  %v2602_v60 = vrot.slane %v2601_v17, 1  ;;  %v2041_v33 = vadd.f32 %v3709_v47, %v3765_v34 }
0x1950   :  { %v3775_v1 = vmax.f32 %v2317_v35, %v2318_v43  ;;  %v1753_v49 = vrot.slane %v1749_v4, %v3440_v20  ;;  %v4815_v4 = vrot.slane %v3443_v22, 3 }
0x1951   :  { %v3777_v21 = vmax.f32 %v2601_v17, %v2602_v60  ;;  %v2045_v15 = vrot.slane %v2041_v33, %v3440_v20  ;;  %v4905_v33 = vrot.slane %v3443_v22, 1 }
0x1952   :  { %4903 = vst [vmem:[#allocation39_spill] sm:$0xff] %v3775_v1  ;;  %v2332_v47 = vadd.f32 %v2330_v12, %v3775_v1  ;;  %v1754_v23 = vmul.f32 %v3428_v9, %v1753_v49  ;;  %v3810_v12 = vpop.permute.xlu0 %1776 }
0x1953   :  { %4904 = vst [vmem:[#allocation40_spill] sm:$0xff] %v3777_v21  ;;  %v2616_v55 = vadd.f32 %v2614_v11, %v3777_v21  ;;  %v2046_v25 = vmul.f32 %v3428_v9, %v2045_v15  ;;  %v4816_v11 = vrot.slane %v3443_v22, 2  ;;  %v3812_v15 = vpop.permute.xlu1 %2068 }
0x1954   :  { %v2336_v48 = vrot.slane %v2332_v47, %v3440_v20  ;;  %v1755_v35 = vsel %vm1107_vm9, %v1754_v23, 0.0 }
0x1955   :  { %v2620_v45 = vrot.slane %v2616_v55, %v3440_v20  ;;  %v2047_v17 = vsel %vm1107_vm9, %v2046_v25, 0.0  ;;  %1756 = vadd.xlane.f32.xlu0 %v1755_v35 }
0x1956   :  { %v2337_v2 = vmul.f32 %v3428_v9, %v2336_v48  ;;  %2048 = vadd.xlane.f32.xlu1 %v2047_v17 }
0x1957   :  { %v2621_v46 = vmul.f32 %v3428_v9, %v2620_v45 }
0x1958   :  { %v2338_v60 = vsel %vm1107_vm9, %v2337_v2, 0.0 }
0x1959   :  { %v2622_v43 = vsel %vm1107_vm9, %v2621_v46, 0.0  ;;  %2339 = vadd.xlane.f32.xlu0 %v2338_v60 }
0x195a   :  { %2623 = vadd.xlane.f32.xlu1 %v2622_v43 }
0x196b   :  { %2358 = vrot.lane.b32.xlu1 %v3443_v22, %s3197_s14 }
0x196f   :  { %2098 = vrot.lane.b32.xlu1 %v4815_v4, %s3196_s13  ;;  %2642 = vrot.lane.b32.xlu0 %v4905_v33, %s3197_s14 }
0x1973   :  { %1806 = vrot.lane.b32.xlu0 %v4816_v11, %s3196_s13 }
0x1995   :  { %v1476_v49 = vpop.xlane.xlu0 %1475 }
0x1996   :  { %v3815_v55 = vadd.f32 %v1476_v49, %v3491_v50 }
0x1998   :  { %v1478_v47 = vsel %vm1107_vm9, %v3815_v55, -inf }
0x1999   :  { %v1479_v45 = vrot.slane %v1478_v47, 4 }
0x199a   :  { %v1188_v48 = vpop.xlane.xlu1 %1187 }
0x199b   :  { %v1480_v23 = vmax.f32 %v1478_v47, %v1479_v45  ;;  %v3820_v25 = vadd.f32 %v1188_v48, %v3491_v50  ;;  %v4906_v48 = vsub.s32 1, %v3415_v5 }
0x199d   :  { %v1481_v46 = vrot.slane %v1480_v23, 2  ;;  %v1190_v2 = vsel %vm1107_vm9, %v3820_v25, -inf }
0x199e   :  { %v1191_v35 = vrot.slane %v1190_v2, 4 }
0x199f   :  { %v1482_v17 = vmax.f32 %v1480_v23, %v1481_v46 }
0x19a0   :  { %v1192_v43 = vmax.f32 %v1190_v2, %v1191_v35 }
0x19a1   :  { %v1483_v60 = vrot.slane %v1482_v17, 1 }
0x19a2   :  { %v1193_v33 = vrot.slane %v1192_v43, 2 }
0x19a3   :  { %v3824_v49 = vmax.f32 %v1482_v17, %v1483_v60 }
0x19a4   :  { %v1194_v4 = vmax.f32 %v1192_v43, %v1193_v33 }
0x19a5   :  { %v1494_v47 = vadd.f32 %v3824_v49, %v3443_v22 }
0x19a6   :  { %v1195_v45 = vrot.slane %v1194_v4, 1 }
0x19a7   :  { %v1498_v11 = vrot.slane %v1494_v47, %v4906_v48 }
0x19a8   :  { %v3832_v18 = vmax.f32 %v1194_v4, %v1195_v45 }
0x19a9   :  { %v1499_v23 = vmul.f32 %v3428_v9, %v1498_v11 }
0x19aa   :  { %v1206_v46 = vadd.f32 %v3832_v18, %v3443_v22 }
0x19ab   :  { %v1500_v2 = vsel %vm1107_vm9, %v1499_v23, 0.0 }
0x19ac   :  { %1501 = vadd.xlane.f32.xlu0 %v1500_v2  ;;  %v1210_v35 = vrot.slane %v1206_v46, %v3440_v20 }
0x19ae   :  { %v1211_v17 = vmul.f32 %v3428_v9, %v1210_v35 }
0x19b0   :  { %v1212_v43 = vsel %vm1107_vm9, %v1211_v17, 0.0 }
0x19b1   :  { %1213 = vadd.xlane.f32.xlu1 %v1212_v43 }
0x19e2   :  { %v1757_v4 = vpop.xlane.xlu0 %1756 }
0x19e3   :  { %v2049_v60 = vpop.xlane.xlu1 %2048  ;;  %v3844_v11 = vadd.f32 %v1757_v4, %v3530_v26 }
0x19e4   :  { %v3847_v33 = vadd.f32 %v2049_v60, %v3530_v26 }
0x19e5   :  { %v1759_v47 = vsel %vm1107_vm9, %v3844_v11, -inf }
0x19e6   :  { %4907 = vst [vmem:[#allocation41_spill] sm:$0xff] %v3847_v33  ;;  %v2051_v45 = vsel %vm1107_vm9, %v3847_v33, -inf  ;;  %v1760_v48 = vrot.slane %v1759_v47, 4  ;;  %v2340_v46 = vpop.xlane.xlu0 %2339 }
0x19e7   :  { %v2052_v23 = vrot.slane %v2051_v45, 4  ;;  %v2624_v2 = vpop.xlane.xlu1 %2623  ;;  %v3854_v35 = vadd.f32 %v2340_v46, %v3541_v31 }
0x19e8   :  { %v3857_v17 = vadd.f32 %v2624_v2, %v3541_v31  ;;  %v1761_v43 = vmax.f32 %v1759_v47, %v1760_v48 }
0x19e9   :  { %v2053_v4 = vmax.f32 %v2051_v45, %v2052_v23  ;;  %v2342_v60 = vsel %vm1107_vm9, %v3854_v35, -inf }
0x19ea   :  { %4908 = vst [vmem:[#allocation42_spill] sm:$0xff] %v3857_v17  ;;  %v2626_v39 = vsel %vm1107_vm9, %v3857_v17, -inf  ;;  %v1762_v63 = vrot.slane %v1761_v43, 2  ;;  %v2343_v14 = vrot.slane %v2342_v60, 4 }
0x19eb   :  { %v2054_v54 = vrot.slane %v2053_v4, 2  ;;  %v2627_v38 = vrot.slane %v2626_v39, 4 }
0x19ec   :  { %v1763_v62 = vmax.f32 %v1761_v43, %v1762_v63  ;;  %v2344_v61 = vmax.f32 %v2342_v60, %v2343_v14 }
0x19ed   :  { %v2055_v30 = vmax.f32 %v2053_v4, %v2054_v54  ;;  %v2628_v46 = vmax.f32 %v2626_v39, %v2627_v38 }
0x19ee   :  { %v1764_v29 = vrot.slane %v1763_v62, 1  ;;  %v2345_v2 = vrot.slane %v2344_v61, 2 }
0x19ef   :  { %v2056_v16 = vrot.slane %v2055_v30, 1  ;;  %v2629_v53 = vrot.slane %v2628_v46, 2 }
0x19f0   :  { %v3863_v47 = vmax.f32 %v1763_v62, %v1764_v29  ;;  %v2346_v48 = vmax.f32 %v2344_v61, %v2345_v2 }
0x19f1   :  { %v3865_v45 = vmax.f32 %v2055_v30, %v2056_v16  ;;  %v2630_v23 = vmax.f32 %v2628_v46, %v2629_v53  ;;  %v2643_v30 = vpop.permute.xlu0 %2642  ;;  %v2359_v53 = vpop.permute.xlu1 %2358 }
0x19f2   :  { %v2347_v63 = vrot.slane %v2346_v48, 1  ;;  %v1779_v38 = vadd.f32 %v3810_v12, %v3863_v47 }
0x19f3   :  { %4909 = vst [vmem:[#allocation43_spill] sm:$0xff] %v3865_v45  ;;  %v2631_v54 = vrot.slane %v2630_v23, 1  ;;  %v2071_v39 = vadd.f32 %v3812_v15, %v3865_v45 }
0x19f4   :  { %v3875_v29 = vmax.f32 %v2346_v48, %v2347_v63  ;;  %v1783_v61 = vrot.slane %v1779_v38, %v3440_v20  ;;  %v4911_v38 = vrot.slane %v3443_v22, 2 }
0x19f5   :  { %v3877_v16 = vmax.f32 %v2630_v23, %v2631_v54  ;;  %v2075_v62 = vrot.slane %v2071_v39, %v3440_v20  ;;  %v4829_v39 = vrot.slane %v3443_v22, 5 }
0x19f6   :  { %v2361_v12 = vadd.f32 %v2359_v53, %v3875_v29  ;;  %v1784_v4 = vmul.f32 %v3428_v9, %v1783_v61  ;;  %v4830_v53 = vrot.slane %v3443_v22, 4  ;;  %v3911_v61 = vpop.permute.xlu0 %1806 }
0x19f7   :  { %4910 = vst [vmem:[#allocation44_spill] sm:$0xff] %v3877_v16  ;;  %v2645_v14 = vadd.f32 %v2643_v30, %v3877_v16  ;;  %v2076_v60 = vmul.f32 %v3428_v9, %v2075_v62  ;;  %v4912_v30 = vrot.slane %v3443_v22, 3 }
0x19f8   :  { %v2365_v43 = vrot.slane %v2361_v12, %v3440_v20  ;;  %v1785_v48 = vsel %vm1107_vm9, %v1784_v4, 0.0 }
0x19f9   :  { %v2649_v15 = vrot.slane %v2645_v14, %v3440_v20  ;;  %v2077_v23 = vsel %vm1107_vm9, %v2076_v60, 0.0  ;;  %1786 = vadd.xlane.f32.xlu0 %v1785_v48  ;;  %v3913_v14 = vpop.permute.xlu1 %2098 }
0x19fa   :  { %v2366_v2 = vmul.f32 %v3428_v9, %v2365_v43  ;;  %2078 = vadd.xlane.f32.xlu1 %v2077_v23 }
0x19fb   :  { %v2650_v46 = vmul.f32 %v3428_v9, %v2649_v15 }
0x19fc   :  { %v2367_v54 = vsel %vm1107_vm9, %v2366_v2, 0.0 }
0x19fd   :  { %v2651_v63 = vsel %vm1107_vm9, %v2650_v46, 0.0  ;;  %2368 = vadd.xlane.f32.xlu0 %v2367_v54 }
0x19fe   :  { %2652 = vadd.xlane.f32.xlu1 %v2651_v63 }
0x1a0f   :  { %2387 = vrot.lane.b32.xlu1 %v4911_v38, %s3197_s14 }
0x1a13   :  { %2128 = vrot.lane.b32.xlu1 %v4829_v39, %s3196_s13  ;;  %2671 = vrot.lane.b32.xlu0 %v4912_v30, %s3197_s14 }
0x1a17   :  { %1836 = vrot.lane.b32.xlu0 %v4830_v53, %s3196_s13 }
0x1a39   :  { %v1502_v62 = vpop.xlane.xlu0 %1501 }
0x1a3a   :  { %v3916_v12 = vadd.f32 %v1502_v62, %v3491_v50 }
0x1a3c   :  { %v1504_v15 = vsel %vm1107_vm9, %v3916_v12, -inf }
0x1a3d   :  { %v1505_v43 = vrot.slane %v1504_v15, 4 }
0x1a3e   :  { %v1214_v4 = vpop.xlane.xlu1 %1213 }
0x1a3f   :  { %v1506_v60 = vmax.f32 %v1504_v15, %v1505_v43  ;;  %v3921_v46 = vadd.f32 %v1214_v4, %v3491_v50  ;;  %v4913_v4 = vsub.s32 3, %v3415_v5 }
0x1a41   :  { %v1507_v2 = vrot.slane %v1506_v60, 2  ;;  %v1216_v48 = vsel %vm1107_vm9, %v3921_v46, -inf }
0x1a42   :  { %v1217_v23 = vrot.slane %v1216_v48, 4 }
0x1a43   :  { %v1508_v63 = vmax.f32 %v1506_v60, %v1507_v2 }
0x1a44   :  { %v1218_v54 = vmax.f32 %v1216_v48, %v1217_v23  ;;  %v4914_v23 = vsub.s32 2, %v3415_v5 }
0x1a45   :  { %v1509_v38 = vrot.slane %v1508_v63, 1 }
0x1a46   :  { %v1219_v30 = vrot.slane %v1218_v54, 2 }
0x1a47   :  { %v3925_v62 = vmax.f32 %v1508_v63, %v1509_v38 }
0x1a48   :  { %v1220_v39 = vmax.f32 %v1218_v54, %v1219_v30 }
0x1a49   :  { %v1520_v15 = vadd.f32 %v3925_v62, %v3443_v22 }
0x1a4a   :  { %v1221_v43 = vrot.slane %v1220_v39, 1 }
0x1a4b   :  { %v1524_v53 = vrot.slane %v1520_v15, %v4913_v4 }
0x1a4c   :  { %v3933_v10 = vmax.f32 %v1220_v39, %v1221_v43 }
0x1a4d   :  { %v1525_v60 = vmul.f32 %v3428_v9, %v1524_v53 }
0x1a4e   :  { %v1232_v2 = vadd.f32 %v3933_v10, %v3443_v22 }
0x1a4f   :  { %v1526_v48 = vsel %vm1107_vm9, %v1525_v60, 0.0 }
0x1a50   :  { %1527 = vadd.xlane.f32.xlu0 %v1526_v48  ;;  %v1236_v63 = vrot.slane %v1232_v2, %v4914_v23 }
0x1a52   :  { %v1237_v54 = vmul.f32 %v3428_v9, %v1236_v63 }
0x1a54   :  { %v1238_v38 = vsel %vm1107_vm9, %v1237_v54, 0.0 }
0x1a55   :  { %1239 = vadd.xlane.f32.xlu1 %v1238_v38 }
0x1a86   :  { %v1787_v39 = vpop.xlane.xlu0 %1786 }
0x1a87   :  { %v2079_v30 = vpop.xlane.xlu1 %2078  ;;  %v3946_v53 = vadd.f32 %v1787_v39, %v3530_v26 }
0x1a88   :  { %v3949_v15 = vadd.f32 %v2079_v30, %v3530_v26 }
0x1a89   :  { %v1789_v43 = vsel %vm1107_vm9, %v3946_v53, -inf }
0x1a8a   :  { %v2081_v4 = vsel %vm1107_vm9, %v3949_v15, -inf  ;;  %v1790_v60 = vrot.slane %v1789_v43, 4  ;;  %v2369_v48 = vpop.xlane.xlu0 %2368 }
0x1a8b   :  { %v2082_v2 = vrot.slane %v2081_v4, 4  ;;  %v2653_v23 = vpop.xlane.xlu1 %2652  ;;  %v3956_v63 = vadd.f32 %v2369_v48, %v3541_v31 }
0x1a8c   :  { %v3959_v54 = vadd.f32 %v2653_v23, %v3541_v31  ;;  %v1791_v38 = vmax.f32 %v1789_v43, %v1790_v60 }
0x1a8d   :  { %v2083_v39 = vmax.f32 %v2081_v4, %v2082_v2  ;;  %v2371_v30 = vsel %vm1107_vm9, %v3956_v63, -inf }
0x1a8e   :  { %4915 = vst [vmem:[#allocation45_spill] sm:$0xff] %v3959_v54  ;;  %v2655_v58 = vsel %vm1107_vm9, %v3959_v54, -inf  ;;  %v1792_v21 = vrot.slane %v1791_v38, 2  ;;  %v2372_v37 = vrot.slane %v2371_v30, 4 }
0x1a8f   :  { %v2084_v13 = vrot.slane %v2083_v39, 2  ;;  %v2656_v59 = vrot.slane %v2655_v58, 4 }
0x1a90   :  { %v1793_v42 = vmax.f32 %v1791_v38, %v1792_v21  ;;  %v2373_v36 = vmax.f32 %v2371_v30, %v2372_v37  ;;  %v2672_v21 = vpop.permute.xlu0 %2671 }
0x1a91   :  { %v2085_v41 = vmax.f32 %v2083_v39, %v2084_v13  ;;  %v2657_v48 = vmax.f32 %v2655_v58, %v2656_v59 }
0x1a92   :  { %v1794_v40 = vrot.slane %v1793_v42, 1  ;;  %v2374_v23 = vrot.slane %v2373_v36, 2 }
0x1a93   :  { %v2086_v6 = vrot.slane %v2085_v41, 1  ;;  %v2658_v51 = vrot.slane %v2657_v48, 2 }
0x1a94   :  { %v3965_v43 = vmax.f32 %v1793_v42, %v1794_v40  ;;  %v2375_v60 = vmax.f32 %v2373_v36, %v2374_v23 }
0x1a95   :  { %v3967_v4 = vmax.f32 %v2085_v41, %v2086_v6  ;;  %v2659_v2 = vmax.f32 %v2657_v48, %v2658_v51  ;;  %v2388_v51 = vpop.permute.xlu1 %2387 }
0x1a96   :  { %v1809_v27 = vadd.f32 %v3911_v61, %v3965_v43  ;;  %v2376_v58 = vrot.slane %v2375_v60, 1 }
0x1a97   :  { %v2660_v59 = vrot.slane %v2659_v2, 1  ;;  %v2101_v37 = vadd.f32 %v3913_v14, %v3967_v4 }
0x1a98   :  { %v3977_v40 = vmax.f32 %v2375_v60, %v2376_v58  ;;  %v1813_v6 = vrot.slane %v1809_v27, %v3440_v20  ;;  %v4917_v58 = vrot.slane %v3443_v22, 4 }
0x1a99   :  { %v3980_v41 = vmax.f32 %v2659_v2, %v2660_v59  ;;  %v2105_v13 = vrot.slane %v2101_v37, %v3440_v20  ;;  %v4844_v59 = vrot.slane %v3443_v22, 7  ;;  %v4918_v37 = vrot.slane %v3443_v22, 5 }
0x1a9a   :  { %v2390_v36 = vadd.f32 %v2388_v51, %v3977_v40  ;;  %v1814_v42 = vmul.f32 %v3428_v9, %v1813_v6  ;;  %v4845_v6 = vrot.slane %v3443_v22, 6  ;;  %v4013_v51 = vpop.permute.xlu0 %1836 }
0x1a9b   :  { %4916 = vst [vmem:[#allocation46_spill] sm:$0xff] %v3980_v41  ;;  %v2674_v61 = vadd.f32 %v2672_v21, %v3980_v41  ;;  %v2106_v39 = vmul.f32 %v3428_v9, %v2105_v13 }
0x1a9c   :  { %v2394_v27 = vrot.slane %v2390_v36, %v3440_v20  ;;  %v1815_v38 = vsel %vm1107_vm9, %v1814_v42, 0.0  ;;  %v4015_v42 = vpop.permute.xlu1 %2128 }
0x1a9d   :  { %v2678_v14 = vrot.slane %v2674_v61, %v3440_v20  ;;  %1816 = vadd.xlane.f32.xlu0 %v1815_v38  ;;  %v2107_v48 = vsel %vm1107_vm9, %v2106_v39, 0.0  ;;  %v4025_v38 = vld [vmem:[%s4803_s6] sm:$0xff] }
0x1a9e   :  { %v2395_v30 = vmul.f32 %v3428_v9, %v2394_v27  ;;  %2108 = vadd.xlane.f32.xlu1 %v2107_v48 }
0x1a9f   :  { %v2679_v23 = vmul.f32 %v3428_v9, %v2678_v14 }
0x1aa0   :  { %v2396_v60 = vsel %vm1107_vm9, %v2395_v30, 0.0 }
0x1aa1   :  { %v2680_v2 = vsel %vm1107_vm9, %v2679_v23, 0.0  ;;  %2397 = vadd.xlane.f32.xlu0 %v2396_v60 }
0x1aa2   :  { %2681 = vadd.xlane.f32.xlu1 %v2680_v2 }
0x1ab3   :  { %2416 = vrot.lane.b32.xlu1 %v4917_v58, %s3197_s14 }
0x1ab7   :  { %2700 = vrot.lane.b32.xlu0 %v4918_v37, %s3197_s14  ;;  %2158 = vrot.lane.b32.xlu1 %v4844_v59, %s3196_s13 }
0x1abb   :  { %1866 = vrot.lane.b32.xlu0 %v4845_v6, %s3196_s13 }
0x1add   :  { %v1528_v36 = vpop.xlane.xlu0 %1527 }
0x1ade   :  { %v4018_v13 = vadd.f32 %v1528_v36, %v3491_v50 }
0x1ae0   :  { %v1530_v21 = vsel %vm1107_vm9, %v4018_v13, -inf }
0x1ae1   :  { %v1531_v61 = vrot.slane %v1530_v21, 4 }
0x1ae2   :  { %v1240_v27 = vpop.xlane.xlu1 %1239 }
0x1ae3   :  { %v1532_v14 = vmax.f32 %v1530_v21, %v1531_v61  ;;  %v4028_v39 = vadd.f32 %v4025_v38, %v1240_v27  ;;  %v4919_v27 = vsub.s32 5, %v3415_v5 }
0x1ae5   :  { %v1533_v30 = vrot.slane %v1532_v14, 2  ;;  %v1242_v48 = vsel %vm1107_vm9, %v4028_v39, -inf }
0x1ae6   :  { %v1243_v50 = vrot.slane %v1242_v48, 4 }
0x1ae7   :  { %v1534_v23 = vmax.f32 %v1532_v14, %v1533_v30 }
0x1ae8   :  { %v1244_v60 = vmax.f32 %v1242_v48, %v1243_v50  ;;  %v4920_v50 = vsub.s32 4, %v3415_v5 }
0x1ae9   :  { %v1535_v2 = vrot.slane %v1534_v23, 1 }
0x1aea   :  { %v1245_v58 = vrot.slane %v1244_v60, 2 }
0x1aeb   :  { %v4032_v37 = vmax.f32 %v1534_v23, %v1535_v2 }
0x1aec   :  { %v1246_v36 = vmax.f32 %v1244_v60, %v1245_v58 }
0x1aed   :  { %vm1537_vm5 = vcmp.eq.f32.partialorder %v4018_v13, %v4032_v37  ;;  %v1546_v21 = vadd.f32 %v4032_v37, %v3443_v22 }
0x1aee   :  { %v1247_v61 = vrot.slane %v1246_v36, 1 }
0x1aef   :  { %v1550_v59 = vrot.slane %v1546_v21, %v4919_v27 }
0x1af0   :  { %v4040_v6 = vmax.f32 %v1246_v36, %v1247_v61 }
0x1af1   :  { %v1551_v14 = vmul.f32 %v3428_v9, %v1550_v59 }
0x1af2   :  { %vm1249_vm8 = vcmp.eq.f32.partialorder %v4028_v39, %v4040_v6  ;;  %v1258_v30 = vadd.f32 %v4040_v6, %v3443_v22 }
0x1af3   :  { %v1552_v48 = vsel %vm1107_vm9, %v1551_v14, 0.0 }
0x1af4   :  { %1553 = vadd.xlane.f32.xlu0 %v1552_v48  ;;  %v1262_v23 = vrot.slane %v1258_v30, %v4920_v50 }
0x1af6   :  { %v1263_v60 = vmul.f32 %v3428_v9, %v1262_v23 }
0x1af8   :  { %v1264_v2 = vsel %vm1107_vm9, %v1263_v60, 0.0 }
0x1af9   :  { %1265 = vadd.xlane.f32.xlu1 %v1264_v2 }
0x1b2a   :  { %v1817_v58 = vpop.xlane.xlu0 %1816 }
0x1b2b   :  { %v4053_v59 = vadd.f32 %v1817_v58, %v3530_v26  ;;  %v2109_v36 = vpop.xlane.xlu1 %2108  ;;  %v4070_v58 = vld [vmem:[%s4803_s6 + $0x10] sm:$0xff] }
0x1b2c   :  { %v4058_v61 = vadd.f32 %v2109_v36, %v3530_v26 }
0x1b2d   :  { %v1819_v21 = vsel %vm1107_vm9, %v4053_v59, -inf }
0x1b2e   :  { %v1820_v27 = vrot.slane %v1819_v21, 4  ;;  %v2398_v14 = vpop.xlane.xlu0 %2397  ;;  %v2111_v30 = vsel %vm1107_vm9, %v4058_v61, -inf }
0x1b2f   :  { %v4063_v48 = vadd.f32 %v2398_v14, %v3541_v31  ;;  %v2112_v23 = vrot.slane %v2111_v30, 4  ;;  %v2682_v60 = vpop.xlane.xlu1 %2681 }
0x1b30   :  { %v1821_v50 = vmax.f32 %v1819_v21, %v1820_v27  ;;  %v4073_v26 = vadd.f32 %v4070_v58, %v2682_v60 }
0x1b31   :  { %v2400_v2 = vsel %vm1107_vm9, %v4063_v48, -inf  ;;  %v2113_v5 = vmax.f32 %v2111_v30, %v2112_v23 }
0x1b32   :  { %v1822_v36 = vrot.slane %v1821_v50, 2  ;;  %v2401_v57 = vrot.slane %v2400_v2, 4  ;;  %v2684_v31 = vsel %vm1107_vm9, %v4073_v26, -inf }
0x1b33   :  { %v2114_v27 = vrot.slane %v2113_v5, 2  ;;  %v2685_v16 = vrot.slane %v2684_v31, 4 }
0x1b34   :  { %v1823_v21 = vmax.f32 %v1821_v50, %v1822_v36  ;;  %v2402_v14 = vmax.f32 %v2400_v2, %v2401_v57 }
0x1b35   :  { %v2115_v34 = vmax.f32 %v2113_v5, %v2114_v27  ;;  %v2686_v1 = vmax.f32 %v2684_v31, %v2685_v16  ;;  %v2417_v16 = vpop.permute.xlu1 %2416 }
0x1b36   :  { %v1824_v17 = vrot.slane %v1823_v21, 1  ;;  %v2403_v28 = vrot.slane %v2402_v14, 2 }
0x1b37   :  { %v2116_v24 = vrot.slane %v2115_v34, 1  ;;  %v2687_v60 = vrot.slane %v2686_v1, 2 }
0x1b38   :  { %v4077_v3 = vmax.f32 %v1823_v21, %v1824_v17  ;;  %v2404_v52 = vmax.f32 %v2402_v14, %v2403_v28 }
0x1b39   :  { %v4083_v23 = vmax.f32 %v2115_v34, %v2116_v24  ;;  %v2688_v57 = vmax.f32 %v2686_v1, %v2687_v60 }
0x1b3a   :  { %v1839_v30 = vadd.f32 %v4013_v51, %v4077_v3  ;;  %v2405_v50 = vrot.slane %v2404_v52, 1 }
0x1b3b   :  { %v2131_v5 = vadd.f32 %v4015_v42, %v4083_v23  ;;  %v2689_v28 = vrot.slane %v2688_v57, 1  ;;  %v2701_v42 = vpop.permute.xlu0 %2700 }
0x1b3c   :  { %v4089_v17 = vmax.f32 %v2404_v52, %v2405_v50  ;;  %v1843_v2 = vrot.slane %v1839_v30, %v3440_v20 }
0x1b3d   :  { %v2135_v34 = vrot.slane %v2131_v5, %v3440_v20  ;;  %v4096_v1 = vmax.f32 %v2688_v57, %v2689_v28  ;;  %v4921_v5 = vrot.slane %v3443_v22, 6  ;;  %v4922_v28 = vrot.slane %v3443_v22, 7 }
0x1b3e   :  { %v2419_v24 = vadd.f32 %v2417_v16, %v4089_v17  ;;  %v1844_v36 = vmul.f32 %v3428_v9, %v1843_v2 }
0x1b3f   :  { %v2136_v52 = vmul.f32 %v3428_v9, %v2135_v34  ;;  %v2703_v31 = vadd.f32 %v2701_v42, %v4096_v1  ;;  %v4117_v16 = vpop.permute.xlu0 %1866 }
0x1b40   :  { %v2423_v51 = vrot.slane %v2419_v24, %v3440_v20  ;;  %v1845_v21 = vsel %vm1107_vm9, %v1844_v36, 0.0  ;;  %v4119_v24 = vpop.permute.xlu1 %2158 }
0x1b41   :  { %v2137_v27 = vsel %vm1107_vm9, %v2136_v52, 0.0  ;;  %1846 = vadd.xlane.f32.xlu0 %v1845_v21  ;;  %v2707_v14 = vrot.slane %v2703_v31, %v3440_v20 }
0x1b42   :  { %2138 = vadd.xlane.f32.xlu1 %v2137_v27  ;;  %v2424_v60 = vmul.f32 %v3428_v9, %v2423_v51 }
0x1b43   :  { %v2708_v30 = vmul.f32 %v3428_v9, %v2707_v14 }
0x1b44   :  { %v2425_v50 = vsel %vm1107_vm9, %v2424_v60, 0.0 }
0x1b45   :  { %2426 = vadd.xlane.f32.xlu0 %v2425_v50  ;;  %v2709_v57 = vsel %vm1107_vm9, %v2708_v30, 0.0 }
0x1b46   :  { %2710 = vadd.xlane.f32.xlu1 %v2709_v57 }
0x1b57   :  { %2445 = vrot.lane.b32.xlu1 %v4921_v5, %s3197_s14 }
0x1b5b   :  { %2729 = vrot.lane.b32.xlu0 %v4922_v28, %s3197_s14 }
0x1b81   :  { %v1554_v2 = vpop.xlane.xlu0 %1553 }
0x1b82   :  { %v4122_v9 = vadd.f32 %v4025_v38, %v1554_v2 }
0x1b84   :  { %v1556_v34 = vsel %vm1107_vm9, %v4122_v9, -inf }
0x1b85   :  { %v1557_v51 = vrot.slane %v1556_v34, 4 }
0x1b86   :  { %v1266_v36 = vpop.xlane.xlu1 %1265 }
0x1b87   :  { %v1558_v52 = vmax.f32 %v1556_v34, %v1557_v51  ;;  %v4127_v42 = vadd.f32 %v4025_v38, %v1266_v36 }
0x1b89   :  { %v1559_v31 = vrot.slane %v1558_v52, 2  ;;  %v1268_v21 = vsel %vm1107_vm9, %v4127_v42, -inf }
0x1b8a   :  { %v1269_v27 = vrot.slane %v1268_v21, 4 }
0x1b8b   :  { %v1560_v14 = vmax.f32 %v1558_v52, %v1559_v31 }
0x1b8c   :  { %v1270_v60 = vmax.f32 %v1268_v21, %v1269_v27  ;;  %v3188_v21 = vld [vmem:[%s4803_s6 + $0x8] sm:$0xff] }
0x1b8d   :  { %v1561_v30 = vrot.slane %v1560_v14, 1 }
0x1b8e   :  { %v1271_v50 = vrot.slane %v1270_v60, 2 }
0x1b8f   :  { %v4131_v57 = vmax.f32 %v1560_v14, %v1561_v30 }
0x1b90   :  { %v1272_v5 = vmax.f32 %v1270_v60, %v1271_v50 }
0x1b91   :  { %vm1563_vm10 = vcmp.eq.f32.partialorder %v4122_v9, %v4131_v57  ;;  %v4137_v38 = vadd.f32 %v4131_v57, %v3443_v22  ;;  %v4923_v9 = vmov 0.0  }
0x1b92   :  { %v1273_v28 = vrot.slane %v1272_v5, 1 }
0x1b93   :  { %v1574_v2 = vsel %vm1573_vm14, %v4137_v38, -inf }
0x1b94   :  { %v4141_v34 = vmax.f32 %v1272_v5, %v1273_v28  ;;  %1575 = vmax.xlane.f32.xlu0 %v1574_v2 }
0x1b96   :  { %vm1275_vm12 = vcmp.eq.f32.partialorder %v4127_v42, %v4141_v34  ;;  %v4147_v51 = vadd.f32 %v4141_v34, %v3443_v22 }
0x1b98   :  { %v1286_v36 = vsel %vm1285_vm13, %v4147_v51, -inf }
0x1b99   :  { %1287 = vmax.xlane.f32.xlu1 %v1286_v36 }
0x1bce   :  { %v1847_v52 = vpop.xlane.xlu0 %1846 }
0x1bcf   :  { %v2139_v31 = vpop.xlane.xlu1 %2138  ;;  %v4154_v27 = vadd.f32 %v3188_v21, %v1847_v52 }
0x1bd0   :  { %v4156_v14 = vadd.f32 %v3188_v21, %v2139_v31 }
0x1bd1   :  { %v1849_v60 = vsel %vm1107_vm9, %v4154_v27, -inf }
0x1bd2   :  { %v2141_v22 = vsel %vm1107_vm9, %v4156_v14, -inf  ;;  %v1850_v30 = vrot.slane %v1849_v60, 4  ;;  %v2427_v5 = vpop.xlane.xlu0 %2426 }
0x1bd3   :  { %v2142_v50 = vrot.slane %v2141_v22, 4  ;;  %v4163_v28 = vadd.f32 %v4070_v58, %v2427_v5  ;;  %v2711_v20 = vpop.xlane.xlu1 %2710 }
0x1bd4   :  { %v1851_v2 = vmax.f32 %v1849_v60, %v1850_v30  ;;  %v4168_v31 = vadd.f32 %v4070_v58, %v2711_v20 }
0x1bd5   :  { %v2143_v36 = vmax.f32 %v2141_v22, %v2142_v50  ;;  %v2429_v52 = vsel %vm1107_vm9, %v4163_v28, -inf }
0x1bd6   :  { %v1852_v21 = vrot.slane %v1851_v2, 2  ;;  %v2430_v44 = vrot.slane %v2429_v52, 4  ;;  %v2713_v56 = vsel %vm1107_vm9, %v4168_v31, -inf }
0x1bd7   :  { %v2144_v32 = vrot.slane %v2143_v36, 2  ;;  %v2714_v5 = vrot.slane %v2713_v56, 4 }
0x1bd8   :  { %v1853_v19 = vmax.f32 %v1851_v2, %v1852_v21  ;;  %v2431_v54 = vmax.f32 %v2429_v52, %v2430_v44 }
0x1bd9   :  { %v2145_v41 = vmax.f32 %v2143_v36, %v2144_v32  ;;  %v2715_v30 = vmax.f32 %v2713_v56, %v2714_v5 }
0x1bda   :  { %v1854_v45 = vrot.slane %v1853_v19, 1  ;;  %v2432_v22 = vrot.slane %v2431_v54, 2 }
0x1bdb   :  { %v2146_v60 = vrot.slane %v2145_v41, 1  ;;  %v2716_v58 = vrot.slane %v2715_v30, 2 }
0x1bdc   :  { %v4172_v50 = vmax.f32 %v1853_v19, %v1854_v45  ;;  %v2433_v20 = vmax.f32 %v2431_v54, %v2432_v22  ;;  %v2446_v54 = vpop.permute.xlu1 %2445 }
0x1bdd   :  { %v4174_v33 = vmax.f32 %v2145_v41, %v2146_v60  ;;  %v2717_v44 = vmax.f32 %v2715_v30, %v2716_v58 }
0x1bde   :  { %vm1856_vm1 = vcmp.eq.f32.partialorder %v4154_v27, %v4172_v50  ;;  %v2434_v32 = vrot.slane %v2433_v20, 1  ;;  %v1869_v2 = vadd.f32 %v4117_v16, %v4172_v50  ;;  %v2730_v16 = vpop.permute.xlu0 %2729 }
0x1bdf   :  { %vm2148_vm4 = vcmp.eq.f32.partialorder %v4156_v14, %v4174_v33  ;;  %v2161_v19 = vadd.f32 %v4119_v24, %v4174_v33  ;;  %v2718_v45 = vrot.slane %v2717_v44, 1 }
0x1be0   :  { %v4184_v56 = vmax.f32 %v2433_v20, %v2434_v32  ;;  %v1871_v41 = vsel %vm1870_vm11, %v1869_v2, -inf }
0x1be1   :  { %v2162_v36 = vsel %vm1870_vm11, %v2161_v19, -inf  ;;  %v4190_v52 = vmax.f32 %v2717_v44, %v2718_v45  ;;  %1872 = vmax.xlane.f32.xlu0 %v1871_v41 }
0x1be2   :  { %vm2436_vm0 = vcmp.eq.f32.partialorder %v4163_v28, %v4184_v56  ;;  %v2448_v21 = vadd.f32 %v2446_v54, %v4184_v56  ;;  %2163 = vmax.xlane.f32.xlu1 %v2162_v36 }
0x1be3   :  { %vm2720_vm3 = vcmp.eq.f32.partialorder %v4168_v31, %v4190_v52  ;;  %v2732_v24 = vadd.f32 %v2730_v16, %v4190_v52 }
0x1be4   :  { %v2449_v5 = vsel %vm1870_vm11, %v2448_v21, -inf  ;;  %v2721_v27 = vsel %vm2720_vm3, %v3421_v0, 8.0 }
0x1be5   :  { %v2733_v60 = vsel %vm1870_vm11, %v2732_v24, -inf  ;;  %2450 = vmax.xlane.f32.xlu0 %v2449_v5  ;;  %v2722_v33 = vsel %vm1107_vm9, %v2721_v27, inf }
0x1be6   :  { %2734 = vmax.xlane.f32.xlu1 %v2733_v60 }
0x1c21   :  { %v1576_v22 = vpop.xlane.xlu0 %1575 }
0x1c22   :  { %vm1577_vm2 = vcmp.eq.f32.partialorder %v4137_v38, %v1576_v22 }
0x1c23   :  { %v1578_v32 = vsel %vm1577_vm2, %v3418_v7, 8.0 }
0x1c24   :  { %v1579_v44 = vsel %vm1573_vm14, %v1578_v32, inf }
0x1c26   :  { %v1288_v30 = vpop.xlane.xlu1 %1287 }
0x1c27   :  { %vm1289_vm15 = vcmp.eq.f32.partialorder %v4147_v51, %v1288_v30  ;;  %v1276_v30 = vsel %vm1275_vm12, %v3421_v0, 8.0 }
0x1c28   :  { %v1290_v20 = vsel %vm1289_vm15, %v3418_v7, 8.0 }
0x1c29   :  { %v1291_v58 = vsel %vm1285_vm13, %v1290_v20, inf  ;;  %v1277_v20 = vsel %vm1107_vm9, %v1276_v30, inf }
0x1c2a   :  { %1292 = vmin.xlane.f32.xlu0 %v1291_v58 }
0x1c2e   :  { %1580 = vmin.xlane.f32.xlu0 %v1579_v44 }
0x1c6e   :  { %v1873_v45 = vpop.xlane.xlu0 %1872 }
0x1c6f   :  { %v2164_v54 = vpop.xlane.xlu1 %2163  ;;  %vm1874_vm7 = vcmp.eq.f32.partialorder %v1869_v2, %v1873_v45 }
0x1c70   :  { %vm2165_vm6 = vcmp.eq.f32.partialorder %v2161_v19, %v2164_v54  ;;  %v1875_v41 = vsel %vm1874_vm7, %v3418_v7, 8.0  ;;  %vm1305_vm7 = vcmp.eq.s32.totalorder %v3413_v8, 6 }
0x1c71   :  { %v2166_v38 = vsel %vm2165_vm6, %v3418_v7, 8.0  ;;  %v1876_v51 = vsel %vm1870_vm11, %v1875_v41, inf  ;;  %vm1294_vm6 = vcmp.eq.s32.totalorder %v3413_v8, 7  ;;  %v4295_v37 = vsel %vm1305_vm7, 1.0, %v4923_v9 }
0x1c72   :  { %v2167_v36 = vsel %vm1870_vm11, %v2166_v38, inf  ;;  %v2451_v16 = vpop.xlane.xlu0 %2450  ;;  %1877 = vmin.xlane.f32.xlu0 %v1876_v51  ;;  %v4292_v13 = vsel %vm1294_vm6, 1.0, %v4923_v9  ;;  %vm1317_vm6 = vcmp.eq.s32.totalorder %v3413_v8, 5 }
0x1c73   :  { %2168 = vmin.xlane.f32.xlu1 %v2167_v36  ;;  %vm2452_vm15 = vcmp.eq.f32.partialorder %v2448_v21, %v2451_v16  ;;  %v2735_v5 = vpop.xlane.xlu1 %2734  ;;  %v1564_v21 = vsel %vm1563_vm10, %v3421_v0, 8.0 }
0x1c74   :  { %v2453_v60 = vsel %vm2452_vm15, %v3418_v7, 8.0  ;;  %vm2736_vm2 = vcmp.eq.f32.partialorder %v2732_v24, %v2735_v5  ;;  %v1278_v24 = vrot.slane %v1277_v20, 4  ;;  %v1565_v58 = vsel %vm1107_vm9, %v1564_v21, inf }
0x1c75   :  { %v2737_v22 = vsel %vm2736_vm2, %v3418_v7, 8.0  ;;  %v2454_v2 = vsel %vm1870_vm11, %v2453_v60, inf  ;;  %v1566_v32 = vrot.slane %v1565_v58, 4  ;;  %v1857_v21 = vsel %vm1856_vm1, %v3421_v0, 8.0 }
0x1c76   :  { %2455 = vmin.xlane.f32.xlu0 %v2454_v2  ;;  %v2738_v19 = vsel %vm1870_vm11, %v2737_v22, inf  ;;  %v1279_v44 = vmin.f32 %v1277_v20, %v1278_v24  ;;  %v2149_v24 = vsel %vm2148_vm4, %v3421_v0, 8.0  ;;  %vm4924_vm15 = vcmp.eq.f32.partialorder %v4053_v59, %v4077_v3 }
0x1c77   :  { %2739 = vmin.xlane.f32.xlu1 %v2738_v19  ;;  %v1567_v45 = vmin.f32 %v1565_v58, %v1566_v32  ;;  %v1858_v58 = vsel %vm1107_vm9, %v1857_v21, inf  ;;  %v2437_v32 = vsel %vm2436_vm0, %v3421_v0, 8.0  ;;  %vm4925_vm2 = vcmp.eq.f32.partialorder %v4058_v61, %v4083_v23 }
0x1c78   :  { %v1280_v54 = vrot.slane %v1279_v44, 2  ;;  %v1859_v50 = vrot.slane %v1858_v58, 4 }
0x1c79   :  { %v1568_v41 = vrot.slane %v1567_v45, 2 }
0x1c7a   :  { %v1281_v38 = vmin.f32 %v1279_v44, %v1280_v54  ;;  %v2150_v44 = vsel %vm1107_vm9, %v2149_v24, inf  ;;  %v1860_v14 = vmin.f32 %v1858_v58, %v1859_v50 }
0x1c7b   :  { %v1569_v51 = vmin.f32 %v1567_v45, %v1568_v41  ;;  %v2438_v45 = vsel %vm1107_vm9, %v2437_v32, inf  ;;  %v2151_v54 = vrot.slane %v2150_v44, 4 }
0x1c7c   :  { %v1282_v36 = vrot.slane %v1281_v38, 1  ;;  %v2439_v41 = vrot.slane %v2438_v45, 4 }
0x1c7d   :  { %v1570_v16 = vrot.slane %v1569_v51, 1 }
0x1c7e   :  { %v1283_v34 = vmin.f32 %v1281_v38, %v1282_v36  ;;  %v2723_v38 = vrot.slane %v2722_v33, 4  ;;  %v1861_v36 = vrot.slane %v1860_v14, 2  ;;  %v2440_v28 = vmin.f32 %v2438_v45, %v2439_v41 }
0x1c7f   :  { %v1571_v2 = vmin.f32 %v1569_v51, %v1570_v16  ;;  %v2152_v51 = vmin.f32 %v2150_v44, %v2151_v54 }
0x1c80   :  { %v2724_v56 = vmin.f32 %v2722_v33, %v2723_v38  ;;  %v1862_v16 = vmin.f32 %v1860_v14, %v1861_v36 }
0x1c82   :  { %v1863_v52 = vrot.slane %v1862_v16, 1 }
0x1c84   :  { %v1864_v21 = vmin.f32 %v1862_v16, %v1863_v52 }
0x1cb7   :  { %v4222_v42 = vpop.xlane.xlu0 %1292 }
0x1cb8   :  { %vm1298_vm12 = vcmp.eq.f32.partialorder %v3418_v7, %v4222_v42 }
0x1cb9   :  { %v2840_v57 = vsel %vm1298_vm12, 1.0, %v4923_v9  ;;  %vm4926_vm12 = vcmp.eq.f32.partialorder %v4063_v48, %v4089_v17 }
0x1cba   :  { %v1301_v5 = vmul.f32 %v2840_v57, %v1283_v34  ;;  %v2153_v34 = vrot.slane %v2152_v51, 2  ;;  %v2441_v57 = vrot.slane %v2440_v28, 2 }
0x1cbb   :  { %v4227_v60 = vpop.xlane.xlu0 %1580 }
0x1cbc   :  { %vm1583_vm10 = vcmp.eq.f32.partialorder %v3418_v7, %v4227_v60  ;;  %v1302_v22 = vsel %vm1285_vm13, %v1301_v5, 0.0  ;;  %v2725_v5 = vrot.slane %v2724_v56, 2  ;;  %v2442_v31 = vmin.f32 %v2440_v28, %v2441_v57 }
0x1cbd   :  { %v2855_v19 = vsel %vm1583_vm10, 1.0, %v4923_v9  ;;  %1303 = vadd.xlane.f32.xlu1 %v1302_v22  ;;  %v2154_v22 = vmin.f32 %v2152_v51, %v2153_v34  ;;  %v1250_v57 = vsel %vm1249_vm8, %v3421_v0, 8.0 }
0x1cbe   :  { %v1586_v30 = vmul.f32 %v2855_v19, %v1571_v2  ;;  %v2726_v2 = vmin.f32 %v2724_v56, %v2725_v5  ;;  %v2443_v24 = vrot.slane %v2442_v31, 1  ;;  %v1538_v5 = vsel %vm1537_vm5, %v3421_v0, 8.0 }
0x1cbf   :  { %v2155_v19 = vrot.slane %v2154_v22, 1 }
0x1cc0   :  { %v1587_v20 = vsel %vm1573_vm14, %v1586_v30, 0.0  ;;  %v2727_v44 = vrot.slane %v2726_v2, 1  ;;  %v2444_v14 = vmin.f32 %v2442_v31, %v2443_v24  ;;  %v1539_v31 = vsel %vm1107_vm9, %v1538_v5, inf }
0x1cc1   :  { %1588 = vadd.xlane.f32.xlu1 %v1587_v20  ;;  %v2156_v50 = vmin.f32 %v2154_v22, %v2155_v19  ;;  %v1251_v22 = vsel %vm1107_vm9, %v1250_v57, inf  ;;  %v1827_v5 = vsel %vm4924_vm15, %v3421_v0, 8.0  ;;  %vm4930_vm15 = vcmp.eq.f32.partialorder %v3956_v63, %v3977_v40 }
0x1cc2   :  { %v2728_v51 = vmin.f32 %v2726_v2, %v2727_v44  ;;  %v1252_v52 = vrot.slane %v1251_v22, 4  ;;  %v1540_v2 = vrot.slane %v1539_v31, 4 }
0x1cc4   :  { %v1253_v19 = vmin.f32 %v1251_v22, %v1252_v52  ;;  %v1828_v22 = vsel %vm1107_vm9, %v1827_v5, inf  ;;  %v2408_v52 = vsel %vm4926_vm12, %v3421_v0, 8.0  ;;  %vm4932_vm12 = vcmp.eq.f32.partialorder %v4073_v26, %v4096_v1 }
0x1cc6   :  { %v1254_v24 = vrot.slane %v1253_v19, 2 }
0x1cff   :  { %v4254_v30 = vpop.xlane.xlu0 %1877 }
0x1d00   :  { %v4256_v20 = vpop.xlane.xlu1 %2168  ;;  %vm1880_vm0 = vcmp.eq.f32.partialorder %v3418_v7, %v4254_v30 }
0x1d01   :  { %vm2171_vm1 = vcmp.eq.f32.partialorder %v3418_v7, %v4256_v20  ;;  %v2863_v58 = vsel %vm1880_vm0, 1.0, %v4923_v9 }
0x1d02   :  { %v2871_v32 = vsel %vm2171_vm1, 1.0, %v4923_v9  ;;  %v1883_v27 = vmul.f32 %v2863_v58, %v1864_v21  ;;  %v1541_v21 = vmin.f32 %v1539_v31, %v1540_v2  ;;  %v2119_v31 = vsel %vm4925_vm2, %v3421_v0, 8.0 }
0x1d03   :  { %v4264_v45 = vpop.xlane.xlu0 %2455  ;;  %v2174_v41 = vmul.f32 %v2871_v32, %v2156_v50  ;;  %v1255_v32 = vmin.f32 %v1253_v19, %v1254_v24  ;;  %v1297_v50 = vmul.f32 %v4292_v13, %v4222_v42  ;;  %v1829_v2 = vrot.slane %v1828_v22, 4 }
0x1d04   :  { %vm2458_vm3 = vcmp.eq.f32.partialorder %v3418_v7, %v4264_v45  ;;  %v4268_v54 = vpop.xlane.xlu1 %2739  ;;  %v1884_v33 = vsel %vm1870_vm11, %v1883_v27, 0.0  ;;  %v1542_v58 = vrot.slane %v1541_v21, 2  ;;  %v2120_v19 = vsel %vm1107_vm9, %v2119_v31, inf }
0x1d05   :  { %v2879_v38 = vsel %vm2458_vm3, 1.0, %v4923_v9  ;;  %vm2742_vm4 = vcmp.eq.f32.partialorder %v3418_v7, %v4268_v54  ;;  %1885 = vadd.xlane.f32.xlu1 %v1884_v33  ;;  %v2175_v16 = vsel %vm1870_vm11, %v2174_v41, 0.0  ;;  %v1256_v39 = vrot.slane %v1255_v32, 1 }
0x1d06   :  { %v2887_v36 = vsel %vm2742_vm4, 1.0, %v4923_v9  ;;  %v2461_v28 = vmul.f32 %v2879_v38, %v2444_v14  ;;  %v1543_v6 = vmin.f32 %v1541_v21, %v1542_v58  ;;  %v2409_v21 = vsel %vm1107_vm9, %v2408_v52, inf }
0x1d07   :  { %v4275_v56 = vmul.f32 %v2887_v36, %v2728_v51  ;;  %v1257_v14 = vmin.f32 %v1255_v32, %v1256_v39  ;;  %v1830_v24 = vmin.f32 %v1828_v22, %v1829_v2  ;;  %v2121_v3 = vrot.slane %v2120_v19, 4 }
0x1d08   :  { %v2462_v34 = vsel %vm1870_vm11, %v2461_v28, 0.0  ;;  %v1544_v27 = vrot.slane %v1543_v6, 1  ;;  %v2410_v59 = vrot.slane %v2409_v21, 4  ;;  %vm4927_vm3 = vcmp.eq.f32.partialorder %v3921_v46, %v3933_v10 }
0x1d09   :  { %2463 = vadd.xlane.f32.xlu0 %v2462_v34  ;;  %2176 = vadd.xlane.f32.xlu1 %v2175_v16  ;;  %v1831_v58 = vrot.slane %v1830_v24, 2  ;;  %v2122_v32 = vmin.f32 %v2120_v19, %v2121_v3  ;;  %v2746_v3 = vsel %vm1870_vm11, %v4275_v56, 0.0  ;;  %vm4928_vm4 = vcmp.eq.f32.partialorder %v3916_v12, %v3925_v62 }
0x1d0a   :  { %v1545_v34 = vmin.f32 %v1543_v6, %v1544_v27  ;;  %v2411_v6 = vmin.f32 %v2409_v21, %v2410_v59  ;;  %v1224_v59 = vsel %vm4927_vm3, %v3421_v0, 8.0  ;;  %vm4931_vm2 = vcmp.eq.f32.partialorder %v3949_v15, %v3967_v4 }
0x1d0b   :  { %v1832_v39 = vmin.f32 %v1830_v24, %v1831_v58  ;;  %v1225_v58 = vsel %vm1107_vm9, %v1224_v59, inf }
0x1d0c   :  { %v2412_v61 = vrot.slane %v2411_v6, 2 }
0x1d0d   :  { %v1833_v27 = vrot.slane %v1832_v39, 1 }
0x1d0f   :  { %v1834_v48 = vmin.f32 %v1832_v39, %v1833_v27 }
0x1d4a   :  { %v1304_v44 = vpop.xlane.xlu1 %1303 }
0x1d4b   :  { %v1308_v33 = vmul.f32 %v4295_v37, %v1304_v44  ;;  %vm1310_vm5 = vcmp.eq.f32.partialorder %v3418_v7, %v1304_v44  ;;  %v2123_v44 = vrot.slane %v2122_v32, 2 }
0x1d4c   :  { %v2842_v41 = vsel %vm1310_vm5, 1.0, %v4923_v9 }
0x1d4d   :  { %v4302_v38 = vadd.f32 %v1308_v33, %v1297_v50  ;;  %v1313_v51 = vmul.f32 %v2842_v41, %v1257_v14  ;;  %v2124_v23 = vmin.f32 %v2122_v32, %v2123_v44  ;;  %v2413_v50 = vmin.f32 %v2411_v6, %v2412_v61 }
0x1d4e   :  { %v4304_v36 = vpop.xlane.xlu1 %1588  ;;  %v1879_v14 = vmul.f32 %v4292_v13, %v4254_v30  ;;  %v1512_v32 = vsel %vm4928_vm4, %v3421_v0, 8.0  ;;  %v1226_v6 = vrot.slane %v1225_v58, 4  ;;  %vm4933_vm4 = vcmp.eq.f32.partialorder %v3820_v25, %v3832_v18 }
0x1d4f   :  { %vm1592_vm8 = vcmp.eq.f32.partialorder %v3418_v7, %v4304_v36  ;;  %v1314_v28 = vsel %vm1285_vm13, %v1313_v51, 0.0  ;;  %v2125_v17 = vrot.slane %v2124_v23, 1  ;;  %v2414_v51 = vrot.slane %v2413_v50, 1 }
0x1d50   :  { %v2856_v42 = vsel %vm1592_vm8, 1.0, %v4923_v9  ;;  %1315 = vadd.xlane.f32.xlu0 %v1314_v28  ;;  %v1513_v39 = vsel %vm1107_vm9, %v1512_v32, inf  ;;  %v1227_v61 = vmin.f32 %v1225_v58, %v1226_v6  ;;  %vm4929_vm8 = vcmp.eq.f32.partialorder %v3946_v53, %v3965_v43 }
0x1d51   :  { %v1595_v16 = vmul.f32 %v2856_v42, %v1545_v34  ;;  %v2415_v30 = vmin.f32 %v2413_v50, %v2414_v51  ;;  %v2126_v5 = vmin.f32 %v2124_v23, %v2125_v17  ;;  %v1514_v44 = vrot.slane %v1513_v39, 4 }
0x1d52   :  { %v1228_v56 = vrot.slane %v1227_v61, 2  ;;  %v2692_v53 = vsel %vm4932_vm12, %v3421_v0, 8.0 }
0x1d53   :  { %v1596_v57 = vsel %vm1573_vm14, %v1595_v16, 0.0  ;;  %v1515_v23 = vmin.f32 %v1513_v39, %v1514_v44  ;;  %v2693_v59 = vsel %vm1107_vm9, %v2692_v53, inf }
0x1d54   :  { %1597 = vadd.xlane.f32.xlu0 %v1596_v57  ;;  %v1229_v50 = vmin.f32 %v1227_v61, %v1228_v56  ;;  %v2694_v58 = vrot.slane %v2693_v59, 4 }
0x1d55   :  { %v1516_v27 = vrot.slane %v1515_v23, 2 }
0x1d56   :  { %v1230_v46 = vrot.slane %v1229_v50, 1  ;;  %v2695_v4 = vmin.f32 %v2693_v59, %v2694_v58 }
0x1d57   :  { %v1517_v10 = vmin.f32 %v1515_v23, %v1516_v27 }
0x1d58   :  { %v1231_v62 = vmin.f32 %v1229_v50, %v1230_v46  ;;  %v2696_v23 = vrot.slane %v2695_v4, 2 }
0x1d59   :  { %v1518_v17 = vrot.slane %v1517_v10, 1 }
0x1d5a   :  { %v2697_v1 = vmin.f32 %v2695_v4, %v2696_v23 }
0x1d92   :  { %v1886_v33 = vpop.xlane.xlu1 %1885 }
0x1d93   :  { %v1887_v41 = vmul.f32 %v4295_v37, %v1886_v33  ;;  %vm1889_vm10 = vcmp.eq.f32.partialorder %v3418_v7, %v1886_v33  ;;  %v4360_v33 = vsel %vm1317_vm6, 1.0, %v4923_v9  ;;  %vm4934_vm6 = vcmp.eq.f32.partialorder %v3815_v55, %v3824_v49 }
0x1d94   :  { %v2864_v28 = vsel %vm1889_vm10, 1.0, %v4923_v9 }
0x1d95   :  { %v4331_v34 = vadd.f32 %v1887_v41, %v1879_v14  ;;  %v1892_v42 = vmul.f32 %v2864_v28, %v1834_v48 }
0x1d96   :  { %v4333_v16 = vpop.xlane.xlu0 %2463  ;;  %v4335_v57 = vpop.xlane.xlu1 %2176 }
0x1d97   :  { %vm2467_vm0 = vcmp.eq.f32.partialorder %v3418_v7, %v4333_v16  ;;  %vm2180_vm1 = vcmp.eq.f32.partialorder %v3418_v7, %v4335_v57  ;;  %v1893_v52 = vsel %vm1870_vm11, %v1892_v42, 0.0  ;;  %v2465_v50 = vmul.f32 %v4295_v37, %v4333_v16 }
0x1d98   :  { %v2880_v22 = vsel %vm2467_vm0, 1.0, %v4923_v9  ;;  %v2872_v31 = vsel %vm2180_vm1, 1.0, %v4923_v9  ;;  %1894 = vadd.xlane.f32.xlu0 %v1893_v52 }
0x1d99   :  { %v2470_v2 = vmul.f32 %v2880_v22, %v2415_v30  ;;  %v2183_v19 = vmul.f32 %v2872_v31, %v2126_v5  ;;  %v1519_v30 = vmin.f32 %v1517_v10, %v1518_v17  ;;  %v2457_v17 = vmul.f32 %v4292_v13, %v4264_v45 }
0x1d9b   :  { %v2471_v21 = vsel %vm1870_vm11, %v2470_v2, 0.0  ;;  %v2184_v24 = vsel %vm1870_vm11, %v2183_v19, 0.0  ;;  %v2379_v2 = vsel %vm4930_vm15, %v3421_v0, 8.0  ;;  %v2089_v19 = vsel %vm4931_vm2, %v3421_v0, 8.0 }
0x1d9c   :  { %2472 = vadd.xlane.f32.xlu1 %v2471_v21  ;;  %2185 = vadd.xlane.f32.xlu0 %v2184_v24  ;;  %v2380_v24 = vsel %vm1107_vm9, %v2379_v2, inf  ;;  %v2090_v43 = vsel %vm1107_vm9, %v2089_v19, inf  ;;  %v2466_v16 = vadd.f32 %v2465_v50, %v2457_v17  ;;  %vm4935_vm15 = vcmp.eq.f32.partialorder %v3844_v11, %v3863_v47  ;;  %v4940_v11 = vld [vmem:[#allocation45_spill] sm:$0xff]  ;;  %v4941_v47 = vld [vmem:[#allocation46_spill] sm:$0xff] }
0x1d9d   :  { %v2091_v40 = vrot.slane %v2090_v43, 4  ;;  %vm4936_vm2 = vcmp.eq.f32.partialorder %v3854_v35, %v3875_v29 }
0x1d9f   :  { %v2092_v15 = vmin.f32 %v2090_v43, %v2091_v40 }
0x1da0   :  { %2747 = vadd.xlane.f32.xlu1 %v2746_v3  ;;  %v2381_v3 = vrot.slane %v2380_v24, 4 }
0x1da1   :  { %v2093_v61 = vrot.slane %v2092_v15, 2 }
0x1da2   :  { %v2382_v32 = vmin.f32 %v2380_v24, %v2381_v3  ;;  %v2741_v3 = vmul.f32 %v4292_v13, %v4268_v54  ;;  %v1198_v54 = vsel %vm4933_vm4, %v3421_v0, 8.0 }
0x1da3   :  { %v2094_v27 = vmin.f32 %v2092_v15, %v2093_v61  ;;  %v1199_v4 = vsel %vm1107_vm9, %v1198_v54, inf }
0x1da4   :  { %v2383_v39 = vrot.slane %v2382_v32, 2 }
0x1da6   :  { %v2384_v56 = vmin.f32 %v2382_v32, %v2383_v39  ;;  %v1486_v39 = vsel %vm4934_vm6, %v3421_v0, 8.0 }
0x1da7   :  { %v1487_v61 = vsel %vm1107_vm9, %v1486_v39, inf }
0x1da8   :  { %v2385_v46 = vrot.slane %v2384_v56, 1  ;;  %v1488_v23 = vrot.slane %v1487_v61, 4 }
0x1ddd   :  { %v1316_v48 = vpop.xlane.xlu0 %1315 }
0x1dde   :  { %v1320_v12 = vmul.f32 %v4360_v33, %v1316_v48  ;;  %vm1322_vm7 = vcmp.eq.f32.partialorder %v3418_v7, %v1316_v48 }
0x1ddf   :  { %v2844_v14 = vsel %vm1322_vm7, 1.0, %v4923_v9  ;;  %vm1329_vm7 = vcmp.eq.s32.totalorder %v3413_v8, 4 }
0x1de0   :  { %v4366_v41 = vadd.f32 %v1320_v12, %v4302_v38  ;;  %v1325_v51 = vmul.f32 %v2844_v14, %v1231_v62  ;;  %v1797_v38 = vsel %vm4929_vm8, %v3421_v0, 8.0  ;;  %v2095_v62 = vrot.slane %v2094_v27, 1 }
0x1de1   :  { %v4368_v28 = vpop.xlane.xlu0 %1597  ;;  %v1798_v52 = vsel %vm1107_vm9, %v1797_v38, inf  ;;  %v2386_v38 = vmin.f32 %v2384_v56, %v2385_v46 }
0x1de2   :  { %vm1601_vm5 = vcmp.eq.f32.partialorder %v3418_v7, %v4368_v28  ;;  %v1326_v42 = vsel %vm1285_vm13, %v1325_v51, 0.0  ;;  %v1799_v21 = vrot.slane %v1798_v52, 4 }
0x1de3   :  { %v2857_v5 = vsel %vm1601_vm5, 1.0, %v4923_v9  ;;  %1327 = vadd.xlane.f32.xlu1 %v1326_v42 }
0x1de4   :  { %v1604_v22 = vmul.f32 %v2857_v5, %v1519_v30  ;;  %v1800_v63 = vmin.f32 %v1798_v52, %v1799_v21  ;;  %v2698_v5 = vrot.slane %v2697_v1, 1 }
0x1de6   :  { %v1605_v31 = vsel %vm1573_vm14, %v1604_v22, 0.0  ;;  %v1801_v6 = vrot.slane %v1800_v63, 2  ;;  %v2699_v43 = vmin.f32 %v2697_v1, %v2698_v5 }
0x1de7   :  { %1606 = vadd.xlane.f32.xlu1 %v1605_v31 }
0x1de8   :  { %v1802_v44 = vmin.f32 %v1800_v63, %v1801_v6 }
0x1dea   :  { %v1803_v26 = vrot.slane %v1802_v44, 1 }
0x1dec   :  { %v1804_v12 = vmin.f32 %v1802_v44, %v1803_v26  ;;  %v1200_v44 = vrot.slane %v1199_v4, 4 }
0x1dee   :  { %v1201_v56 = vmin.f32 %v1199_v4, %v1200_v44 }
0x1df0   :  { %v1202_v26 = vrot.slane %v1201_v56, 2 }
0x1df2   :  { %v1203_v50 = vmin.f32 %v1201_v56, %v1202_v26 }
0x1df4   :  { %v1204_v25 = vrot.slane %v1203_v50, 1 }
0x1df6   :  { %v1205_v49 = vmin.f32 %v1203_v50, %v1204_v25 }
0x1e25   :  { %v1895_v10 = vpop.xlane.xlu0 %1894 }
0x1e26   :  { %v1896_v48 = vmul.f32 %v4360_v33, %v1895_v10  ;;  %vm1898_vm10 = vcmp.eq.f32.partialorder %v3418_v7, %v1895_v10  ;;  %v4438_v10 = vsel %vm1329_vm7, 1.0, %v4923_v9 }
0x1e27   :  { %v2865_v14 = vsel %vm1898_vm10, 1.0, %v4923_v9  ;;  %vm4942_vm10 = vcmp.eq.f32.partialorder %v4940_v11, %v4941_v47 }
0x1e28   :  { %v4403_v51 = vadd.f32 %v1896_v48, %v4331_v34  ;;  %v1901_v30 = vmul.f32 %v2865_v14, %v1804_v12  ;;  %v2096_v34 = vmin.f32 %v2094_v27, %v2095_v62  ;;  %v1489_v27 = vmin.f32 %v1487_v61, %v1488_v23 }
0x1e29   :  { %v2473_v42 = vpop.xlane.xlu1 %2472  ;;  %v4405_v22 = vpop.xlane.xlu0 %2185 }
0x1e2a   :  { %v2474_v31 = vmul.f32 %v4360_v33, %v2473_v42  ;;  %vm2476_vm0 = vcmp.eq.f32.partialorder %v3418_v7, %v2473_v42  ;;  %vm2189_vm1 = vcmp.eq.f32.partialorder %v3418_v7, %v4405_v22  ;;  %v1902_v52 = vsel %vm1870_vm11, %v1901_v30, 0.0 }
0x1e2b   :  { %v2881_v45 = vsel %vm2476_vm0, 1.0, %v4923_v9  ;;  %v2873_v2 = vsel %vm2189_vm1, 1.0, %v4923_v9  ;;  %1903 = vadd.xlane.f32.xlu1 %v1902_v52  ;;  %v1490_v1 = vrot.slane %v1489_v27, 2  ;;  %v4937_v52 = vld [vmem:[#allocation41_spill] sm:$0xff] }
0x1e2c   :  { %v4414_v19 = vadd.f32 %v2474_v31, %v2466_v16  ;;  %v2479_v21 = vmul.f32 %v2881_v45, %v2386_v38  ;;  %v2192_v53 = vmul.f32 %v2873_v2, %v2096_v34  ;;  %v2350_v45 = vsel %vm4936_vm2, %v3421_v0, 8.0  ;;  %v4938_v34 = vld [vmem:[#allocation43_spill] sm:$0xff] }
0x1e2d   :  { %v2748_v24 = vpop.xlane.xlu1 %2747  ;;  %v1491_v18 = vmin.f32 %v1489_v27, %v1490_v1  ;;  %vm4939_vm12 = vcmp.eq.f32.partialorder %v4937_v52, %v4938_v34 }
0x1e2e   :  { %v2749_v59 = vmul.f32 %v4295_v37, %v2748_v24  ;;  %vm2751_vm3 = vcmp.eq.f32.partialorder %v3418_v7, %v2748_v24  ;;  %v2480_v63 = vsel %vm1870_vm11, %v2479_v21, 0.0  ;;  %v2193_v58 = vsel %vm1870_vm11, %v2192_v53, 0.0 }
0x1e2f   :  { %v2888_v40 = vsel %vm2751_vm3, 1.0, %v4923_v9  ;;  %2481 = vadd.xlane.f32.xlu0 %v2480_v63  ;;  %2194 = vadd.xlane.f32.xlu1 %v2193_v58  ;;  %v1492_v48 = vrot.slane %v1491_v18, 1  ;;  %v2059_v2 = vsel %vm4939_vm12, %v3421_v0, 8.0  ;;  %v2351_v24 = vsel %vm1107_vm9, %v2350_v45, inf }
0x1e30   :  { %v4423_v32 = vadd.f32 %v2749_v59, %v2741_v3  ;;  %v2754_v6 = vmul.f32 %v2888_v40, %v2699_v43  ;;  %v2060_v53 = vsel %vm1107_vm9, %v2059_v2, inf  ;;  %v2663_v43 = vsel %vm4942_vm10, %v3421_v0, 8.0 }
0x1e31   :  { %v1493_v30 = vmin.f32 %v1491_v18, %v1492_v48  ;;  %v2352_v3 = vrot.slane %v2351_v24, 4  ;;  %v2061_v63 = vrot.slane %v2060_v53, 4  ;;  %v2664_v35 = vsel %vm1107_vm9, %v2663_v43, inf  ;;  %v4943_v43 = vld [vmem:[#allocation30_spill] sm:$0xff] }
0x1e32   :  { %v2755_v15 = vsel %vm1870_vm11, %v2754_v6, 0.0  ;;  %v2665_v40 = vrot.slane %v2664_v35, 4 }
0x1e33   :  { %2756 = vadd.xlane.f32.xlu0 %v2755_v15  ;;  %v2353_v29 = vmin.f32 %v2351_v24, %v2352_v3  ;;  %v2062_v6 = vmin.f32 %v2060_v53, %v2061_v63  ;;  %v4944_v3 = vld [vmem:[#allocation32_spill] sm:$0xff] }
0x1e34   :  { %v2666_v54 = vmin.f32 %v2664_v35, %v2665_v40  ;;  %vm4945_vm6 = vcmp.eq.f32.partialorder %v4943_v43, %v4944_v3  ;;  %v4946_v35 = vld [vmem:[#allocation29_spill] sm:$0xff]  ;;  %v4959_v43 = vld [vmem:[#allocation44_spill] sm:$0xff] }
0x1e35   :  { %v2354_v15 = vrot.slane %v2353_v29, 2  ;;  %v2063_v39 = vrot.slane %v2062_v6, 2 }
0x1e36   :  { %v2667_v61 = vrot.slane %v2666_v54, 2 }
0x1e37   :  { %v2355_v44 = vmin.f32 %v2353_v29, %v2354_v15  ;;  %v2064_v23 = vmin.f32 %v2062_v6, %v2063_v39  ;;  %v4947_v29 = vld [vmem:[#allocation31_spill] sm:$0xff] }
0x1e38   :  { %v2668_v27 = vmin.f32 %v2666_v54, %v2667_v61  ;;  %vm4948_vm7 = vcmp.eq.f32.partialorder %v4946_v35, %v4947_v29 }
0x1e39   :  { %v2356_v1 = vrot.slane %v2355_v44, 1  ;;  %v2065_v25 = vrot.slane %v2064_v23, 1  ;;  %v1460_v40 = vsel %vm4948_vm7, %v3421_v0, 8.0 }
0x1e70   :  { %v1328_v46 = vpop.xlane.xlu1 %1327 }
0x1e71   :  { %v1332_v55 = vmul.f32 %v4438_v10, %v1328_v46  ;;  %vm1334_vm5 = vcmp.eq.f32.partialorder %v3418_v7, %v1328_v46 }
0x1e72   :  { %v2846_v12 = vsel %vm1334_vm5, 1.0, %v4923_v9  ;;  %vm1341_vm5 = vcmp.eq.s32.totalorder %v3413_v8, 3 }
0x1e73   :  { %v4444_v62 = vadd.f32 %v1332_v55, %v4366_v41  ;;  %v1337_v17 = vmul.f32 %v2846_v12, %v1205_v49  ;;  %v1767_v41 = vsel %vm4935_vm15, %v3421_v0, 8.0 }
0x1e74   :  { %v4446_v14 = vpop.xlane.xlu1 %1606  ;;  %v1768_v38 = vsel %vm1107_vm9, %v1767_v41, inf }
0x1e75   :  { %vm1610_vm8 = vcmp.eq.f32.partialorder %v3418_v7, %v4446_v14  ;;  %v1338_v42 = vsel %vm1285_vm13, %v1337_v17, 0.0  ;;  %v1769_v21 = vrot.slane %v1768_v38, 4 }
0x1e76   :  { %v2858_v5 = vsel %vm1610_vm8, 1.0, %v4923_v9  ;;  %1339 = vadd.xlane.f32.xlu0 %v1338_v42  ;;  %v2357_v42 = vmin.f32 %v2355_v44, %v2356_v1 }
0x1e77   :  { %v1613_v16 = vmul.f32 %v2858_v5, %v1493_v30  ;;  %v1770_v59 = vmin.f32 %v1768_v38, %v1769_v21  ;;  %v2669_v30 = vrot.slane %v2668_v27, 1 }
0x1e79   :  { %v1614_v31 = vsel %vm1573_vm14, %v1613_v16, 0.0  ;;  %v1771_v58 = vrot.slane %v1770_v59, 2  ;;  %v2670_v21 = vmin.f32 %v2668_v27, %v2669_v30 }
0x1e7a   :  { %1615 = vadd.xlane.f32.xlu0 %v1614_v31  ;;  %v2066_v31 = vmin.f32 %v2064_v23, %v2065_v25 }
0x1e7b   :  { %v1772_v4 = vmin.f32 %v1770_v59, %v1771_v58  ;;  %v1172_v59 = vsel %vm4945_vm6, %v3421_v0, 8.0 }
0x1e7c   :  { %v1173_v63 = vsel %vm1107_vm9, %v1172_v59, inf }
0x1e7d   :  { %v1773_v56 = vrot.slane %v1772_v4, 1  ;;  %v1174_v58 = vrot.slane %v1173_v63, 4 }
0x1e7f   :  { %v1774_v18 = vmin.f32 %v1772_v4, %v1773_v56  ;;  %v1175_v15 = vmin.f32 %v1173_v63, %v1174_v58  ;;  %v4512_v56 = vsel %vm1341_vm5, 1.0, %v4923_v9 }
0x1e81   :  { %v1176_v4 = vrot.slane %v1175_v15, 2 }
0x1e83   :  { %v1177_v44 = vmin.f32 %v1175_v15, %v1176_v4 }
0x1e85   :  { %v1178_v61 = vrot.slane %v1177_v44, 1 }
0x1e87   :  { %v1179_v1 = vmin.f32 %v1177_v44, %v1178_v61 }
0x1eb8   :  { %v1904_v26 = vpop.xlane.xlu1 %1903 }
0x1eb9   :  { %v1905_v50 = vmul.f32 %v4438_v10, %v1904_v26  ;;  %vm1907_vm0 = vcmp.eq.f32.partialorder %v3418_v7, %v1904_v26 }
0x1eba   :  { %v2866_v46 = vsel %vm1907_vm0, 1.0, %v4923_v9 }
0x1ebb   :  { %v4477_v55 = vadd.f32 %v1905_v50, %v4403_v51  ;;  %v1910_v48 = vmul.f32 %v2866_v46, %v1774_v18 }
0x1ebc   :  { %v2482_v49 = vpop.xlane.xlu0 %2481  ;;  %v4481_v17 = vpop.xlane.xlu1 %2194 }
0x1ebd   :  { %v2483_v12 = vmul.f32 %v4438_v10, %v2482_v49  ;;  %vm2485_vm1 = vcmp.eq.f32.partialorder %v3418_v7, %v2482_v49  ;;  %vm2198_vm3 = vcmp.eq.f32.partialorder %v3418_v7, %v4481_v17  ;;  %v1911_v16 = vsel %vm1870_vm11, %v1910_v48, 0.0 }
0x1ebe   :  { %v2882_v5 = vsel %vm2485_vm1, 1.0, %v4923_v9  ;;  %v2874_v41 = vsel %vm2198_vm3, 1.0, %v4923_v9  ;;  %1912 = vadd.xlane.f32.xlu0 %v1911_v16  ;;  %v4949_v16 = vld [vmem:[#allocation33_spill] sm:$0xff] }
0x1ebf   :  { %v4488_v51 = vadd.f32 %v2483_v12, %v4414_v19  ;;  %v2488_v38 = vmul.f32 %v2882_v5, %v2357_v42  ;;  %v2201_v52 = vmul.f32 %v2874_v41, %v2066_v31 }
0x1ec0   :  { %v2757_v45 = vpop.xlane.xlu0 %2756 }
0x1ec1   :  { %v2758_v34 = vmul.f32 %v4360_v33, %v2757_v45  ;;  %vm2760_vm4 = vcmp.eq.f32.partialorder %v3418_v7, %v2757_v45  ;;  %v2489_v2 = vsel %vm1870_vm11, %v2488_v38, 0.0  ;;  %v2202_v53 = vsel %vm1870_vm11, %v2201_v52, 0.0  ;;  %v4952_v38 = vld [vmem:[#allocation35_spill] sm:$0xff] }
0x1ec2   :  { %v2889_v24 = vsel %vm2760_vm4, 1.0, %v4923_v9  ;;  %2490 = vadd.xlane.f32.xlu1 %v2489_v2  ;;  %2203 = vadd.xlane.f32.xlu0 %v2202_v53  ;;  %v4953_v45 = vld [vmem:[#allocation39_spill] sm:$0xff]  ;;  %v4956_v2 = vld [vmem:[#allocation38_spill] sm:$0xff] }
0x1ec3   :  { %v4497_v19 = vadd.f32 %v2758_v34, %v4423_v32  ;;  %v2763_v11 = vmul.f32 %v2889_v24, %v2670_v21  ;;  %v1461_v32 = vsel %vm1107_vm9, %v1460_v40, inf  ;;  %vm4954_vm12 = vcmp.eq.f32.partialorder %v4952_v38, %v4953_v45  ;;  %v4955_v34 = vld [vmem:[#allocation34_spill] sm:$0xff] }
0x1ec4   :  { %v1462_v6 = vrot.slane %v1461_v32, 4  ;;  %v2321_v52 = vsel %vm4954_vm12, %v3421_v0, 8.0  ;;  %vm4957_vm10 = vcmp.eq.f32.partialorder %v4955_v34, %v4956_v2 }
0x1ec5   :  { %v2764_v47 = vsel %vm1870_vm11, %v2763_v11, 0.0  ;;  %v2029_v21 = vsel %vm4957_vm10, %v3421_v0, 8.0  ;;  %v2322_v53 = vsel %vm1107_vm9, %v2321_v52, inf }
0x1ec6   :  { %2765 = vadd.xlane.f32.xlu1 %v2764_v47  ;;  %v1463_v54 = vmin.f32 %v1461_v32, %v1462_v6  ;;  %v2030_v11 = vsel %vm1107_vm9, %v2029_v21, inf  ;;  %v4958_v47 = vld [vmem:[#allocation42_spill] sm:$0xff]  ;;  %v2323_v59 = vrot.slane %v2322_v53, 4 }
0x1ec7   :  { %vm4960_vm0 = vcmp.eq.f32.partialorder %v4958_v47, %v4959_v43  ;;  %v2031_v35 = vrot.slane %v2030_v11, 4 }
0x1ec8   :  { %v1464_v39 = vrot.slane %v1463_v54, 2  ;;  %v2634_v3 = vsel %vm4960_vm0, %v3421_v0, 8.0  ;;  %v2324_v40 = vmin.f32 %v2322_v53, %v2323_v59 }
0x1ec9   :  { %v2635_v29 = vsel %vm1107_vm9, %v2634_v3, inf  ;;  %v2032_v6 = vmin.f32 %v2030_v11, %v2031_v35  ;;  %v4961_v35 = vld [vmem:[#allocation18_spill] sm:$0xff] }
0x1eca   :  { %v1465_v23 = vmin.f32 %v1463_v54, %v1464_v39  ;;  %v2636_v58 = vrot.slane %v2635_v29, 4  ;;  %v2325_v15 = vrot.slane %v2324_v40, 2 }
0x1ecb   :  { %v2033_v4 = vrot.slane %v2032_v6, 2 }
0x1ecc   :  { %v1466_v50 = vrot.slane %v1465_v23, 1  ;;  %v2637_v54 = vmin.f32 %v2635_v29, %v2636_v58  ;;  %v2326_v44 = vmin.f32 %v2324_v40, %v2325_v15  ;;  %v4962_v29 = vld [vmem:[#allocation20_spill] sm:$0xff] }
0x1ecd   :  { %vm4963_vm7 = vcmp.eq.f32.partialorder %v4961_v35, %v4962_v29 }
0x1ece   :  { %v1467_v12 = vmin.f32 %v1465_v23, %v1466_v50  ;;  %v2638_v61 = vrot.slane %v2637_v54, 2  ;;  %v2327_v50 = vrot.slane %v2326_v44, 1  ;;  %v1146_v40 = vsel %vm4963_vm7, %v3421_v0, 8.0 }
0x1ecf   :  { %v1147_v58 = vsel %vm1107_vm9, %v1146_v40, inf  ;;  %v4976_v40 = vld [vmem:[#allocation36_spill] sm:$0xff] }
0x1f03   :  { %v1340_v27 = vpop.xlane.xlu0 %1339 }
0x1f04   :  { %v1344_v26 = vmul.f32 %v4512_v56, %v1340_v27  ;;  %vm1346_vm8 = vcmp.eq.f32.partialorder %v3418_v7, %v1340_v27  ;;  %v2034_v27 = vmin.f32 %v2032_v6, %v2033_v4  ;;  %v4965_v6 = vld [vmem:[#allocation19_spill] sm:$0xff] }
0x1f05   :  { %v2848_v18 = vsel %vm1346_vm8, 1.0, %v4923_v9  ;;  %vm1353_vm8 = vcmp.eq.s32.totalorder %v3413_v8, 2 }
0x1f06   :  { %v4518_v25 = vadd.f32 %v1344_v26, %v4444_v62  ;;  %v1349_v46 = vmul.f32 %v2848_v18, %v1179_v1  ;;  %v4950_v62 = vld [vmem:[#allocation37_spill] sm:$0xff]  ;;  %v2639_v26 = vmin.f32 %v2637_v54, %v2638_v61 }
0x1f07   :  { %v4520_v49 = vpop.xlane.xlu0 %1615  ;;  %vm4951_vm2 = vcmp.eq.f32.partialorder %v4949_v16, %v4950_v62 }
0x1f08   :  { %vm1619_vm15 = vcmp.eq.f32.partialorder %v3418_v7, %v4520_v49  ;;  %v1350_v48 = vsel %vm1285_vm13, %v1349_v46, 0.0  ;;  %v1737_v31 = vsel %vm4951_vm2, %v3421_v0, 8.0 }
0x1f09   :  { %v2859_v42 = vsel %vm1619_vm15, 1.0, %v4923_v9  ;;  %1351 = vadd.xlane.f32.xlu1 %v1350_v48  ;;  %v1738_v41 = vsel %vm1107_vm9, %v1737_v31, inf  ;;  %v2035_v48 = vrot.slane %v2034_v27, 1  ;;  %v2328_v31 = vmin.f32 %v2326_v44, %v2327_v50 }
0x1f0a   :  { %v1622_v30 = vmul.f32 %v2859_v42, %v1467_v12  ;;  %v1739_v24 = vrot.slane %v1738_v41, 4  ;;  %v4586_v50 = vsel %vm1353_vm8, 1.0, %v4923_v9 }
0x1f0b   :  { %v2036_v52 = vmin.f32 %v2034_v27, %v2035_v48 }
0x1f0c   :  { %v1623_v5 = vsel %vm1573_vm14, %v1622_v30, 0.0  ;;  %v1740_v63 = vmin.f32 %v1738_v41, %v1739_v24  ;;  %v2640_v41 = vrot.slane %v2639_v26, 1 }
0x1f0d   :  { %1624 = vadd.xlane.f32.xlu1 %v1623_v5 }
0x1f0e   :  { %v1741_v32 = vrot.slane %v1740_v63, 2  ;;  %v2641_v47 = vmin.f32 %v2639_v26, %v2640_v41 }
0x1f10   :  { %v1742_v39 = vmin.f32 %v1740_v63, %v1741_v32  ;;  %v4964_v32 = vld [vmem:[#allocation17_spill] sm:$0xff] }
0x1f11   :  { %vm4966_vm5 = vcmp.eq.f32.partialorder %v4964_v32, %v4965_v6 }
0x1f12   :  { %v1743_v23 = vrot.slane %v1742_v39, 1  ;;  %v1434_v15 = vsel %vm4966_vm5, %v3421_v0, 8.0 }
0x1f13   :  { %v1435_v54 = vsel %vm1107_vm9, %v1434_v15, inf }
0x1f14   :  { %v1744_v46 = vmin.f32 %v1742_v39, %v1743_v23  ;;  %v1436_v4 = vrot.slane %v1435_v54, 4 }
0x1f16   :  { %v1437_v44 = vmin.f32 %v1435_v54, %v1436_v4 }
0x1f18   :  { %v1438_v23 = vrot.slane %v1437_v44, 2 }
0x1f4b   :  { %v1913_v1 = vpop.xlane.xlu0 %1912 }
0x1f4c   :  { %v1914_v18 = vmul.f32 %v4512_v56, %v1913_v1  ;;  %vm1916_vm1 = vcmp.eq.f32.partialorder %v3418_v7, %v1913_v1  ;;  %v1439_v1 = vmin.f32 %v1437_v44, %v1438_v23 }
0x1f4d   :  { %v2867_v12 = vsel %vm1916_vm1, 1.0, %v4923_v9 }
0x1f4e   :  { %v4551_v42 = vadd.f32 %v1914_v18, %v4477_v55  ;;  %v1919_v5 = vmul.f32 %v2867_v12, %v1744_v46  ;;  %v1440_v12 = vrot.slane %v1439_v1, 1 }
0x1f4f   :  { %v2491_v30 = vpop.xlane.xlu1 %2490  ;;  %v4553_v16 = vpop.xlane.xlu0 %2203 }
0x1f50   :  { %v2492_v62 = vmul.f32 %v4512_v56, %v2491_v30  ;;  %vm2494_vm3 = vcmp.eq.f32.partialorder %v3418_v7, %v2491_v30  ;;  %vm2207_vm4 = vcmp.eq.f32.partialorder %v3418_v7, %v4553_v16  ;;  %v1920_v45 = vsel %vm1870_vm11, %v1919_v5, 0.0 }
0x1f51   :  { %v2883_v38 = vsel %vm2494_vm3, 1.0, %v4923_v9  ;;  %v2875_v55 = vsel %vm2207_vm4, 1.0, %v4923_v9  ;;  %1921 = vadd.xlane.f32.xlu0 %v1920_v45 }
0x1f52   :  { %v4563_v34 = vadd.f32 %v2492_v62, %v4488_v51  ;;  %v2497_v2 = vmul.f32 %v2883_v38, %v2328_v31  ;;  %v2210_v24 = vmul.f32 %v2875_v55, %v2036_v52  ;;  %v1441_v38 = vmin.f32 %v1439_v1, %v1440_v12 }
0x1f53   :  { %v2766_v21 = vpop.xlane.xlu1 %2765 }
0x1f54   :  { %v2767_v53 = vmul.f32 %v4438_v10, %v2766_v21  ;;  %vm2769_vm6 = vcmp.eq.f32.partialorder %v3418_v7, %v2766_v21  ;;  %v2498_v11 = vsel %vm1870_vm11, %v2497_v2, 0.0  ;;  %v2211_v3 = vsel %vm1870_vm11, %v2210_v24, 0.0  ;;  %v4967_v2 = vld [vmem:[#allocation21_spill] sm:$0xff] }
0x1f55   :  { %v2890_v43 = vsel %vm2769_vm6, 1.0, %v4923_v9  ;;  %2212 = vadd.xlane.f32.xlu1 %v2211_v3  ;;  %2499 = vadd.xlane.f32.xlu0 %v2498_v11  ;;  %v4971_v11 = vld [vmem:[#allocation26_spill] sm:$0xff]  ;;  %v4974_v3 = vld [vmem:[#allocation27_spill] sm:$0xff] }
0x1f56   :  { %v4571_v59 = vadd.f32 %v2767_v53, %v4497_v19  ;;  %v2772_v51 = vmul.f32 %v2890_v43, %v2641_v47  ;;  %v1148_v19 = vrot.slane %v1147_v58, 4  ;;  %v4970_v53 = vld [vmem:[#allocation22_spill] sm:$0xff]  ;;  %v4973_v43 = vld [vmem:[#allocation23_spill] sm:$0xff] }
0x1f57   :  { %vm4972_vm10 = vcmp.eq.f32.partialorder %v4970_v53, %v4971_v11  ;;  %vm4975_vm0 = vcmp.eq.f32.partialorder %v4973_v43, %v4974_v3 }
0x1f58   :  { %v2773_v63 = vsel %vm1870_vm11, %v2772_v51, 0.0  ;;  %v1149_v39 = vmin.f32 %v1147_v58, %v1148_v19  ;;  %v1999_v47 = vsel %vm4972_vm10, %v3421_v0, 8.0  ;;  %v2292_v51 = vsel %vm4975_vm0, %v3421_v0, 8.0  ;;  %v4977_v58 = vld [vmem:[#allocation40_spill] sm:$0xff] }
0x1f59   :  { %2774 = vadd.xlane.f32.xlu0 %v2773_v63  ;;  %v2000_v35 = vsel %vm1107_vm9, %v1999_v47, inf  ;;  %v2293_v29 = vsel %vm1107_vm9, %v2292_v51, inf  ;;  %vm4978_vm1 = vcmp.eq.f32.partialorder %v4976_v40, %v4977_v58 }
0x1f5a   :  { %v1150_v61 = vrot.slane %v1149_v39, 2  ;;  %v2605_v32 = vsel %vm4978_vm1, %v3421_v0, 8.0  ;;  %v2001_v6 = vrot.slane %v2000_v35, 4  ;;  %v2294_v19 = vrot.slane %v2293_v29, 4 }
0x1f5b   :  { %v2606_v54 = vsel %vm1107_vm9, %v2605_v32, inf }
0x1f5c   :  { %v1151_v27 = vmin.f32 %v1149_v39, %v1150_v61  ;;  %v2002_v4 = vmin.f32 %v2000_v35, %v2001_v6  ;;  %v2607_v39 = vrot.slane %v2606_v54, 4  ;;  %v2295_v61 = vmin.f32 %v2293_v29, %v2294_v19 }
0x1f5e   :  { %v1152_v26 = vrot.slane %v1151_v27, 1  ;;  %v2003_v23 = vrot.slane %v2002_v4, 2 }
0x1f60   :  { %v1153_v48 = vmin.f32 %v1151_v27, %v1152_v26  ;;  %v2608_v27 = vmin.f32 %v2606_v54, %v2607_v39  ;;  %v2296_v26 = vrot.slane %v2295_v61, 2  ;;  %v4979_v39 = vld [vmem:[#allocation6_spill] sm:$0xff] }
0x1f62   :  { %v2297_v12 = vmin.f32 %v2295_v61, %v2296_v26  ;;  %v4983_v26 = vld [vmem:[#allocation7_spill] sm:$0xff] }
0x1f96   :  { %v1352_v18 = vpop.xlane.xlu1 %1351 }
0x1f97   :  { %v1356_v46 = vmul.f32 %v4586_v50, %v1352_v18  ;;  %vm1358_vm15 = vcmp.eq.f32.partialorder %v3418_v7, %v1352_v18  ;;  %v2609_v18 = vrot.slane %v2608_v27, 2 }
0x1f98   :  { %v2850_v30 = vsel %vm1358_vm15, 1.0, %v4923_v9  ;;  %vm1365_vm15 = vcmp.eq.s32.totalorder %v3413_v8, 1 }
0x1f99   :  { %v4592_v5 = vadd.f32 %v1356_v46, %v4518_v25  ;;  %v1361_v62 = vmul.f32 %v2850_v30, %v1153_v48  ;;  %v4968_v25 = vld [vmem:[#allocation25_spill] sm:$0xff]  ;;  %v2004_v46 = vmin.f32 %v2002_v4, %v2003_v23  ;;  %v2610_v30 = vmin.f32 %v2608_v27, %v2609_v18 }
0x1f9a   :  { %v4594_v31 = vpop.xlane.xlu1 %1624  ;;  %vm4969_vm12 = vcmp.eq.f32.partialorder %v4967_v2, %v4968_v25  ;;  %v4982_v27 = vld [vmem:[#allocation5_spill] sm:$0xff] }
0x1f9b   :  { %vm1628_vm2 = vcmp.eq.f32.partialorder %v3418_v7, %v4594_v31  ;;  %v1362_v41 = vsel %vm1285_vm13, %v1361_v62, 0.0  ;;  %v1707_v21 = vsel %vm4969_vm12, %v3421_v0, 8.0  ;;  %v2611_v11 = vrot.slane %v2610_v30, 1 }
0x1f9c   :  { %v2860_v45 = vsel %vm1628_vm2, 1.0, %v4923_v9  ;;  %1363 = vadd.xlane.f32.xlu0 %v1362_v41  ;;  %v1708_v24 = vsel %vm1107_vm9, %v1707_v21, inf  ;;  %v2005_v41 = vrot.slane %v2004_v46, 1  ;;  %vm4984_vm8 = vcmp.eq.f32.partialorder %v4982_v27, %v4983_v26  ;;  %v4994_v26 = vld [vmem:[#allocation24_spill] sm:$0xff] }
0x1f9d   :  { %v1631_v52 = vmul.f32 %v2860_v45, %v1441_v38  ;;  %v1709_v63 = vrot.slane %v1708_v24, 4  ;;  %v2612_v58 = vmin.f32 %v2610_v30, %v2611_v11 }
0x1f9e   :  { %v2006_v53 = vmin.f32 %v2004_v46, %v2005_v41 }
0x1f9f   :  { %v1632_v55 = vsel %vm1573_vm14, %v1631_v52, 0.0  ;;  %v1710_v15 = vmin.f32 %v1708_v24, %v1709_v63  ;;  %v2298_v52 = vrot.slane %v2297_v12, 1 }
0x1fa0   :  { %1633 = vadd.xlane.f32.xlu0 %v1632_v55 }
0x1fa1   :  { %v1711_v44 = vrot.slane %v1710_v15, 2  ;;  %v2299_v43 = vmin.f32 %v2297_v12, %v2298_v52  ;;  %v4660_v52 = vsel %vm1365_vm15, 1.0, %v4923_v9 }
0x1fa3   :  { %v1712_v1 = vmin.f32 %v1710_v15, %v1711_v44  ;;  %v4980_v44 = vld [vmem:[#allocation8_spill] sm:$0xff] }
0x1fa4   :  { %vm4981_vm5 = vcmp.eq.f32.partialorder %v4979_v39, %v4980_v44  ;;  %v4992_v39 = vld [vmem:[#allocation15_spill] sm:$0xff] }
0x1fa5   :  { %v1713_v48 = vrot.slane %v1712_v1, 1  ;;  %v1120_v61 = vsel %vm4981_vm5, %v3421_v0, 8.0  ;;  %vm1377_vm5 = vcmp.eq.s32.totalorder %v3413_v8, 0  ;;  %v2187_v8 = vmul.f32 %v4360_v33, %v4405_v22 }
0x1fa6   :  { %v1121_v23 = vsel %vm1107_vm9, %v1120_v61, inf }
0x1fa7   :  { %v1714_v45 = vmin.f32 %v1712_v1, %v1713_v48  ;;  %v1408_v1 = vsel %vm4984_vm8, %v3421_v0, 8.0  ;;  %v1122_v18 = vrot.slane %v1121_v23, 4 }
0x1fa9   :  { %v1123_v48 = vmin.f32 %v1121_v23, %v1122_v18 }
0x1fab   :  { %v1124_v30 = vrot.slane %v1123_v48, 2 }
0x1fad   :  { %v1125_v41 = vmin.f32 %v1123_v48, %v1124_v30 }
0x1fde   :  { %v1922_v62 = vpop.xlane.xlu0 %1921 }
0x1fdf   :  { %v1923_v38 = vmul.f32 %v4586_v50, %v1922_v62  ;;  %vm1925_vm3 = vcmp.eq.f32.partialorder %v3418_v7, %v1922_v62 }
0x1fe0   :  { %v2868_v55 = vsel %vm1925_vm3, 1.0, %v4923_v9 }
0x1fe1   :  { %v4625_v2 = vadd.f32 %v1923_v38, %v4551_v42  ;;  %v1928_v25 = vmul.f32 %v2868_v55, %v1714_v45  ;;  %v1126_v38 = vrot.slane %v1125_v41, 1 }
0x1fe2   :  { %v2500_v21 = vpop.xlane.xlu0 %2499  ;;  %v4627_v24 = vpop.xlane.xlu1 %2212 }
0x1fe3   :  { %v2501_v47 = vmul.f32 %v4586_v50, %v2500_v21  ;;  %vm2503_vm4 = vcmp.eq.f32.partialorder %v3418_v7, %v2500_v21  ;;  %vm2216_vm6 = vcmp.eq.f32.partialorder %v3418_v7, %v4627_v24  ;;  %v1929_v42 = vsel %vm1870_vm11, %v1928_v25, 0.0 }
0x1fe4   :  { %v2884_v3 = vsel %vm2503_vm4, 1.0, %v4923_v9  ;;  %v2876_v51 = vsel %vm2216_vm6, 1.0, %v4923_v9  ;;  %1930 = vadd.xlane.f32.xlu1 %v1929_v42  ;;  %v1127_v21 = vmin.f32 %v1125_v41, %v1126_v38 }
0x1fe5   :  { %v4637_v63 = vadd.f32 %v2501_v47, %v4563_v34  ;;  %v2506_v35 = vmul.f32 %v2884_v3, %v2299_v43  ;;  %v2219_v29 = vmul.f32 %v2876_v51, %v2006_v53 }
0x1fe6   :  { %v2775_v40 = vpop.xlane.xlu0 %2774 }
0x1fe7   :  { %v2776_v32 = vmul.f32 %v4512_v56, %v2775_v40  ;;  %vm2778_vm7 = vcmp.eq.f32.partialorder %v3418_v7, %v2775_v40  ;;  %v2507_v6 = vsel %vm1870_vm11, %v2506_v35, 0.0  ;;  %v2220_v15 = vsel %vm1870_vm11, %v2219_v29, 0.0 }
0x1fe8   :  { %v2891_v19 = vsel %vm2778_vm7, 1.0, %v4923_v9  ;;  %2221 = vadd.xlane.f32.xlu0 %v2220_v15  ;;  %2508 = vadd.xlane.f32.xlu1 %v2507_v6  ;;  %v4988_v15 = vld [vmem:[#allocation10_spill] sm:$0xff] }
0x1fe9   :  { %v4645_v54 = vadd.f32 %v2776_v32, %v4571_v59  ;;  %v2781_v34 = vmul.f32 %v2891_v19, %v2612_v58  ;;  %v1409_v59 = vsel %vm1107_vm9, %v1408_v1, inf  ;;  %v4985_v58 = vld [vmem:[#allocation9_spill] sm:$0xff]  ;;  %v4989_v19 = vld [vmem:[#allocation14_spill] sm:$0xff]  ;;  %v4995_v1 = vld [vmem:[#allocation28_spill] sm:$0xff] }
0x1fea   :  { %v1410_v46 = vrot.slane %v1409_v59, 4  ;;  %vm4990_vm0 = vcmp.eq.f32.partialorder %v4988_v15, %v4989_v19 }
0x1feb   :  { %v2782_v4 = vsel %vm1870_vm11, %v2781_v34, 0.0  ;;  %v1969_v34 = vsel %vm4990_vm0, %v3421_v0, 8.0 }
0x1fec   :  { %2783 = vadd.xlane.f32.xlu1 %v2782_v4  ;;  %v1411_v12 = vmin.f32 %v1409_v59, %v1410_v46  ;;  %v4991_v4 = vld [vmem:[#allocation11_spill] sm:$0xff]  ;;  %v1970_v23 = vsel %vm1107_vm9, %v1969_v34, inf }
0x1fed   :  { %v1971_v59 = vrot.slane %v1970_v23, 4 }
0x1fee   :  { %v1412_v62 = vrot.slane %v1411_v12, 2 }
0x1fef   :  { %v1972_v30 = vmin.f32 %v1970_v23, %v1971_v59 }
0x1ff0   :  { %v1413_v45 = vmin.f32 %v1411_v12, %v1412_v62 }
0x1ff2   :  { %v1414_v53 = vrot.slane %v1413_v45, 1 }
0x1ff4   :  { %v1415_v42 = vmin.f32 %v1413_v45, %v1414_v53  ;;  %v1973_v45 = vrot.slane %v1972_v30, 2 }
0x2029   :  { %v1364_v55 = vpop.xlane.xlu0 %1363 }
0x202a   :  { %v1368_v25 = vmul.f32 %v4660_v52, %v1364_v55  ;;  %vm1370_vm2 = vcmp.eq.f32.partialorder %v3418_v7, %v1364_v55 }
0x202b   :  { %v2852_v11 = vsel %vm1370_vm2, 1.0, %v4923_v9 }
0x202c   :  { %v4666_v47 = vadd.f32 %v1368_v25, %v4592_v5  ;;  %v1373_v43 = vmul.f32 %v2852_v11, %v1127_v21  ;;  %v4986_v5 = vld [vmem:[#allocation13_spill] sm:$0xff]  ;;  %v1974_v11 = vmin.f32 %v1972_v30, %v1973_v45  ;;  %v1590_v45 = vmul.f32 %v4295_v37, %v4304_v36 }
0x202d   :  { %v4668_v3 = vpop.xlane.xlu0 %1633  ;;  %vm4987_vm10 = vcmp.eq.f32.partialorder %v4985_v58, %v4986_v5  ;;  %v1617_v36 = vmul.f32 %v4512_v56, %v4520_v49 }
0x202e   :  { %vm1637_vm12 = vcmp.eq.f32.partialorder %v3418_v7, %v4668_v3  ;;  %v1374_v51 = vsel %vm1285_vm13, %v1373_v43, 0.0  ;;  %v1676_v32 = vsel %vm4987_vm10, %v3421_v0, 8.0  ;;  %vm4993_vm13 = vcmp.eq.f32.partialorder %v4991_v4, %v4992_v39 }
0x202f   :  { %v2861_v35 = vsel %vm1637_vm12, 1.0, %v4923_v9  ;;  %1375 = vadd.xlane.f32.xlu1 %v1374_v51  ;;  %v1677_v6 = vsel %vm1107_vm9, %v1676_v32, inf  ;;  %v2263_v44 = vsel %vm4993_vm13, %v3421_v0, 8.0  ;;  %vm2815_vm13 = vcmask 62464  }
0x2030   :  { %v1640_v29 = vmul.f32 %v2861_v35, %v1415_v42  ;;  %v1678_v61 = vrot.slane %v1677_v6, 4  ;;  %v2264_v27 = vsel %vm1107_vm9, %v2263_v44, inf  ;;  %v1975_v35 = vrot.slane %v1974_v11, 1 }
0x2031   :  { %v2265_v46 = vrot.slane %v2264_v27, 4 }
0x2032   :  { %v1641_v40 = vsel %vm1573_vm14, %v1640_v29, 0.0  ;;  %vm4996_vm14 = vcmp.eq.f32.partialorder %v4994_v26, %v4995_v1  ;;  %v1679_v48 = vmin.f32 %v1677_v6, %v1678_v61  ;;  %v1976_v4 = vmin.f32 %v1974_v11, %v1975_v35 }
0x2033   :  { %1642 = vadd.xlane.f32.xlu1 %v1641_v40  ;;  %v2576_v18 = vsel %vm4996_vm14, %v3421_v0, 8.0  ;;  %v2266_v62 = vmin.f32 %v2264_v27, %v2265_v46  ;;  %v1599_v11 = vmul.f32 %v4360_v33, %v4368_v28 }
0x2034   :  { %v2577_v12 = vsel %vm1107_vm9, %v2576_v18, inf  ;;  %v1680_v38 = vrot.slane %v1679_v48, 2 }
0x2035   :  { %v2578_v41 = vrot.slane %v2577_v12, 4  ;;  %v2267_v55 = vrot.slane %v2266_v62, 2 }
0x2036   :  { %v1681_v21 = vmin.f32 %v1679_v48, %v1680_v38 }
0x2037   :  { %v2579_v25 = vmin.f32 %v2577_v12, %v2578_v41  ;;  %v2268_v43 = vmin.f32 %v2266_v62, %v2267_v55  ;;  %v4997_v55 = vld [vmem:[#allocation12_spill] sm:$0xff] }
0x2038   :  { %v1682_v51 = vrot.slane %v1681_v21, 1 }
0x2039   :  { %v2580_v53 = vrot.slane %v2579_v25, 2  ;;  %v2269_v29 = vrot.slane %v2268_v43, 1 }
0x203a   :  { %v1683_v5 = vmin.f32 %v1681_v21, %v1682_v51  ;;  %v1608_v51 = vmul.f32 %v4438_v10, %v4446_v14  ;;  %v2178_v14 = vmul.f32 %v4295_v37, %v4335_v57  ;;  %v2196_v37 = vmul.f32 %v4438_v10, %v4481_v17 }
0x203b   :  { %v2581_v40 = vmin.f32 %v2579_v25, %v2580_v53  ;;  %v2270_v39 = vmin.f32 %v2268_v43, %v2269_v29  ;;  %v4998_v25 = vld [vmem:[#allocation16_spill] sm:$0xff]  ;;  %v1582_v53 = vmul.f32 %v4292_v13, %v4227_v60 }
0x203c   :  { %vm4999_vm7 = vcmp.eq.f32.partialorder %v4997_v55, %v4998_v25 }
0x203d   :  { %v2582_v44 = vrot.slane %v2581_v40, 1  ;;  %v2547_v21 = vsel %vm4999_vm7, %v3421_v0, 8.0  ;;  %v1591_v43 = vadd.f32 %v1590_v45, %v1582_v53  ;;  %v1626_v0 = vmul.f32 %v4586_v50, %v4594_v31  ;;  %v5003_v45 = vld [vmem:[#allocation4_spill] sm:$0xff] }
0x203e   :  { %v2170_v31 = vmul.f32 %v4292_v13, %v4256_v20  ;;  %v2214_v13 = vmul.f32 %v4586_v50, %v4627_v24 }
0x203f   :  { %v2583_v30 = vmin.f32 %v2581_v40, %v2582_v44  ;;  %v1600_v35 = vadd.f32 %v1599_v11, %v1591_v43 }
0x2041   :  { %v1609_v40 = vadd.f32 %v1608_v51, %v1600_v35 }
0x2043   :  { %v1618_v28 = vadd.f32 %v1617_v36, %v1609_v40 }
0x2045   :  { %v1627_v49 = vadd.f32 %v1626_v0, %v1618_v28 }
0x2071   :  { %v1931_v42 = vpop.xlane.xlu1 %1930 }
0x2072   :  { %v1932_v58 = vmul.f32 %v4660_v52, %v1931_v42  ;;  %vm1934_vm1 = vcmp.eq.f32.partialorder %v3418_v7, %v1931_v42  ;;  %v2548_v42 = vsel %vm1107_vm9, %v2547_v21, inf }
0x2073   :  { %v2869_v32 = vsel %vm1934_vm1, 1.0, %v4923_v9  ;;  %v2549_v29 = vrot.slane %v2548_v42, 4 }
0x2074   :  { %v4699_v6 = vadd.f32 %v1932_v58, %v4625_v2  ;;  %v1937_v19 = vmul.f32 %v2869_v32, %v1683_v5  ;;  %v1635_v58 = vmul.f32 %v4660_v52, %v4668_v3  ;;  %v4745_v5 = vsel %vm1377_vm5, 1.0, %v4923_v9 }
0x2075   :  { %v4701_v15 = vpop.xlane.xlu0 %2221  ;;  %v2509_v34 = vpop.xlane.xlu1 %2508  ;;  %v2550_v32 = vmin.f32 %v2548_v42, %v2549_v29  ;;  %v2179_v3 = vadd.f32 %v2178_v14, %v2170_v31 }
0x2076   :  { %vm2225_vm3 = vcmp.eq.f32.partialorder %v3418_v7, %v4701_v15  ;;  %v2510_v23 = vmul.f32 %v4660_v52, %v2509_v34  ;;  %vm2512_vm4 = vcmp.eq.f32.partialorder %v3418_v7, %v2509_v34  ;;  %v1938_v27 = vsel %vm1870_vm11, %v1937_v19, 0.0 }
0x2077   :  { %v2877_v61 = vsel %vm2225_vm3, 1.0, %v4923_v9  ;;  %v2885_v2 = vsel %vm2512_vm4, 1.0, %v4923_v9  ;;  %1939 = vadd.xlane.f32.xlu0 %v1938_v27  ;;  %v1636_v34 = vadd.f32 %v1635_v58, %v1627_v49  ;;  %v2188_v44 = vadd.f32 %v2187_v8, %v2179_v3  ;;  %v5000_v27 = vld [vmem:[#allocation3_spill] sm:$0xff] }
0x2078   :  { %v2228_v26 = vmul.f32 %v2877_v61, %v1976_v4  ;;  %v4711_v1 = vadd.f32 %v2510_v23, %v4637_v63  ;;  %v2515_v18 = vmul.f32 %v2885_v2, %v2270_v39  ;;  %v2551_v39 = vrot.slane %v2550_v32, 2 }
0x2079   :  { %v2784_v59 = vpop.xlane.xlu1 %2783  ;;  %v2205_v61 = vmul.f32 %v4512_v56, %v4553_v16  ;;  %vm1646_vm9 = vcmp.eq.s32.totalorder %v5000_v27, 1  ;;  %v2197_v20 = vadd.f32 %v2196_v37, %v2188_v44  ;;  %vm1382_vm8 = vcmp.eq.s32.totalorder %v5000_v27, 0 }
0x207a   :  { %v2229_v46 = vsel %vm1870_vm11, %v2228_v26, 0.0  ;;  %v2785_v48 = vmul.f32 %v4586_v50, %v2784_v59  ;;  %vm2787_vm6 = vcmp.eq.f32.partialorder %v3418_v7, %v2784_v59  ;;  %v2516_v12 = vsel %vm1870_vm11, %v2515_v18, 0.0 }
0x207b   :  { %2230 = vadd.xlane.f32.xlu1 %v2229_v46  ;;  %v2892_v62 = vsel %vm2787_vm6, 1.0, %v4923_v9  ;;  %2517 = vadd.xlane.f32.xlu0 %v2516_v12  ;;  %v5001_v33 = vsub.s32 7, %v5000_v27  ;;  %v2552_v10 = vmin.f32 %v2550_v32, %v2551_v39  ;;  %v2206_v17 = vadd.f32 %v2205_v61, %v2197_v20 }
0x207c   :  { %v4719_v41 = vadd.f32 %v2785_v48, %v4645_v54  ;;  %v2790_v63 = vmul.f32 %v2892_v62, %v2583_v30  ;;  %v2223_v2 = vmul.f32 %v4660_v52, %v4701_v15  ;;  %v2862_v56 = vsel %vm1646_vm9, 1.0, %v4923_v9 }
0x207d   :  { %vm1943_vm15 = vcmp.eq.s32.totalorder %v5000_v27, 2  ;;  %v2215_v24 = vadd.f32 %v2214_v13, %v2206_v17  ;;  %v2854_v18 = vsel %vm1382_vm8, 1.0, %v4923_v9  ;;  %v2553_v12 = vrot.slane %v2552_v10, 1 }
0x207e   :  { %v2791_v38 = vsel %vm1870_vm11, %v2790_v63, 0.0  ;;  %v2870_v15 = vsel %vm1943_vm15, 1.0, %v4923_v9  ;;  %vm2234_vm2 = vcmp.eq.s32.totalorder %v5000_v27, 3  ;;  %vm2521_vm12 = vcmp.eq.s32.totalorder %v5000_v27, 4 }
0x207f   :  { %2792 = vadd.xlane.f32.xlu0 %v2791_v38  ;;  %v2224_v30 = vadd.f32 %v2223_v2, %v2215_v24  ;;  %v2886_v43 = vsel %vm2521_vm12, 1.0, %v4923_v9  ;;  %v2554_v42 = vmin.f32 %v2552_v10, %v2553_v12  ;;  %vm2805_vm0 = vcmp.eq.s32.totalorder %v5000_v27, 5 }
0x20bc   :  { %v1376_v54 = vpop.xlane.xlu1 %1375 }
0x20bd   :  { %v1380_v4 = vmul.f32 %v4745_v5, %v1376_v54  ;;  %v2878_v54 = vsel %vm2234_vm2, 1.0, %v4923_v9 }
0x20bf   :  { %v1381_v23 = vadd.f32 %v1380_v4, %v4666_v47  ;;  %v5002_v47 = vsub.s32 6, %v5000_v27 }
0x20c0   :  { %v1643_v60 = vpop.xlane.xlu1 %1642 }
0x20c1   :  { %v1644_v19 = vmul.f32 %v4745_v5, %v1643_v60  ;;  %v1388_v26 = vrot.slane %v1381_v23, %v5002_v47 }
0x20c3   :  { %v1645_v57 = vadd.f32 %v1644_v19, %v1636_v34  ;;  %v1389_v38 = vmul.f32 %v2854_v18, %v1388_v26 }
0x20c5   :  { %v1652_v22 = vrot.slane %v1645_v57, %v5001_v33 }
0x20c7   :  { %v1653_v59 = vmul.f32 %v2862_v56, %v1652_v22 }
0x20c9   :  { %v1654_v53 = vadd.f32 %v1653_v59, %v1389_v38 }
0x2104   :  { %v1940_v16 = vpop.xlane.xlu0 %1939 }
0x2105   :  { %v1941_v50 = vmul.f32 %v4745_v5, %v1940_v16 }
0x2107   :  { %v1942_v46 = vadd.f32 %v1941_v50, %v4699_v6 }
0x2108   :  { %v2231_v48 = vpop.xlane.xlu1 %2230  ;;  %v2518_v62 = vpop.xlane.xlu0 %2517 }
0x2109   :  { %v2232_v63 = vmul.f32 %v4745_v5, %v2231_v48  ;;  %v1949_v55 = vrot.slane %v1942_v46, %v5003_v45  ;;  %v2519_v25 = vmul.f32 %v4745_v5, %v2518_v62 }
0x210b   :  { %v2233_v21 = vadd.f32 %v2232_v63, %v2224_v30  ;;  %v1950_v6 = vmul.f32 %v2870_v15, %v1949_v55  ;;  %v2520_v11 = vadd.f32 %v2519_v25, %v4711_v1 }
0x210c   :  { %v2793_v35 = vpop.xlane.xlu0 %2792 }
0x210d   :  { %v2240_v51 = vrot.slane %v2233_v21, %v5003_v45  ;;  %v1951_v36 = vadd.f32 %v1950_v6, %v1654_v53  ;;  %v2527_v29 = vrot.slane %v2520_v11, %v5003_v45  ;;  %v2794_v40 = vmul.f32 %v4660_v52, %v2793_v35 }
0x210e   :  { %vm2796_vm10 = vcmp.eq.f32.partialorder %v3418_v7, %v2793_v35  ;;  %v2894_v7 = vsel %vm2805_vm0, 1.0, %v4923_v9 }
0x210f   :  { %v2241_v0 = vmul.f32 %v2878_v54, %v2240_v51  ;;  %v2893_v60 = vsel %vm2796_vm10, 1.0, %v4923_v9  ;;  %v2795_v1 = vadd.f32 %v2794_v40, %v4719_v41  ;;  %v2528_v58 = vmul.f32 %v2886_v43, %v2527_v29 }
0x2110   :  { %v2799_v28 = vmul.f32 %v2893_v60, %v2554_v42 }
0x2111   :  { %v2242_v14 = vadd.f32 %v2241_v0, %v1951_v36 }
0x2112   :  { %v2800_v32 = vsel %vm1870_vm11, %v2799_v28, 0.0 }
0x2113   :  { %2801 = vadd.xlane.f32.xlu1 %v2800_v32  ;;  %v2529_v49 = vadd.f32 %v2528_v58, %v2242_v14 }
0x21a0   :  { %v2802_v19 = vpop.xlane.xlu1 %2801 }
0x21a1   :  { %v2803_v31 = vmul.f32 %v4745_v5, %v2802_v19 }
0x21a3   :  { %v2804_v52 = vadd.f32 %v2803_v31, %v2795_v1 }
0x21a5   :  { %v2811_v8 = vrot.slane %v2804_v52, %v5003_v45 }
0x21a7   :  { %v2812_v34 = vmul.f32 %v2894_v7, %v2811_v8 }
0x21a9   :  { %v2813_v4 = vadd.f32 %v2812_v34, %v2529_v49 }
0x21ab   :  { %v3111_v41 = vtrunc.f32 %v2813_v4 }
0x21ad   :  { %v3112_v3 = vcvt.f32.s32 %v3111_v41 }
0x21af   :  { %2816 = vst.msk [vmem:[%s4804_s8] sm:$0x3f] %vm2815_vm13, %v3112_v3 }

</bundles_post_ra>
